<compile_context>
chip_gen: v7x
topology: tpu7x:2x2x1
jax: 0.10.0
libtpu: 0.0.40
codegen_flags: <defaults>
</compile_context>

<pallas_src>
import math

import jax
import jax.numpy as jnp
from jax.experimental import pallas as pl
from jax.experimental.pallas import tpu as pltpu

HIDDEN = 32                         # hidden_size
STATE = 8                           # SSM state size N
CONV_K = 4                          # depthwise conv kernel
N_LAYERS = 4
EXPAND = 2
INTER = EXPAND * HIDDEN             # intermediate size I = 64
DT_RANK = math.ceil(HIDDEN / 16)    # time-step rank = 2
EPS = 1e-5


def _silu(x):
    return x * jax.nn.sigmoid(x)                       # sigmoid -> EUP slot


def _softplus(x):
    return jnp.maximum(x, 0.0) + jnp.log(1.0 + jnp.exp(-jnp.abs(x)))


def _rmsnorm(x, w):                                    # f32 statistics
    var = jnp.mean(x * x, axis=-1, keepdims=True)
    return x * jax.lax.rsqrt(var + EPS) * w


def mamba_fused_kernel(x_ref, emb_ref,
                       nw_ref, win_ref, cw_ref, cb_ref, wbig_ref, bdt_ref,
                       aflat_ref, d_ref, wout_ref, smat_ref, tmat_ref,
                       fnw_ref, who_ref, bho_ref,
                       out_ref,
                       convpad_s):
    Bt, L, F = x_ref.shape
    n_layers = nw_ref.shape[0]
    K = cw_ref.shape[1]
    I = d_ref.shape[2]
    NI = aflat_ref.shape[2]                            # N * I (lane-flattened state)
    H = nw_ref.shape[2]
    VP = emb_ref.shape[1]
    M = Bt * L
    bf = jnp.bfloat16

    # ---- embeddings: exact one-hot f32 matmuls against VMEM-resident tables ----
    ids = x_ref[...].reshape(M, F)
    lane = jax.lax.broadcasted_iota(jnp.int32, (M, VP), 1)
    h2 = jnp.zeros((M, H), jnp.float32)                # residual stream (f32)
    for f in range(F):
        onehot = (ids[:, f:f + 1] == lane).astype(jnp.float32)
        h2 = h2 + jnp.dot(onehot, emb_ref[f], preferred_element_type=jnp.float32)

    # causal zero padding rows of the conv scratch stay zero for all layers
    convpad_s[...] = jnp.zeros(convpad_s.shape, jnp.float32)

    smat = smat_ref[...]                               # (I, N*I)  bf16 spread matrix
    tmat = tmat_ref[...]                               # (N*I, I)  bf16 summing matrix

    for l in range(n_layers):                          # all layers fused in one kernel
        nw, w_in, cw, cb = nw_ref[l], win_ref[l], cw_ref[l], cb_ref[l]
        w_big, b_dt, a_flat = wbig_ref[l], bdt_ref[l], aflat_ref[l]
        dskip, w_out = d_ref[l], wout_ref[l]

        # ---- RMSNorm (f32) + in_proj: one (M,H)x(H,2I) bf16 MXU matmul ----
        proj = jnp.dot(_rmsnorm(h2, nw).astype(bf), w_in,
                       preferred_element_type=jnp.float32)          # (M, 2I)
        xs3 = proj[:, :I].reshape(Bt, L, I)
        gate = proj[:, I:]                                           # (M, I)

        # ---- causal depthwise conv: padded VMEM scratch + K static slides ----
        convpad_s[:, pl.ds(K - 1, L), :] = xs3
        acc = xs3 * cw[K - 1:K, :]                                   # s = 0 tap
        for s in range(1, K):
            acc = acc + convpad_s[:, pl.ds(K - 1 - s, L), :] * cw[K - 1 - s:K - s, :]
        xact3 = _silu(acc + cb)                                      # (Bt, L, I)
        xact2 = xact3.reshape(M, I)

        # ---- fused x_proj: [ B-spread | C-spread | dt_pre ] in one matmul ----
        big = jnp.dot(xact2.astype(bf), w_big,
                      preferred_element_type=jnp.float32)            # (M, 2NI+I)
        BN = big[:, :NI]                         # BN[m, n*I+i] = B[m, n]
        CN = big[:, NI:2 * NI]
        dt2 = _softplus(big[:, 2 * NI:] + b_dt)                      # (M, I)

        # ---- spread dt / dt*u across the N state copies on the MXU ----
        dtN = jnp.dot(dt2.astype(bf), smat,
                      preferred_element_type=jnp.float32)            # (M, N*I)
        dtxN = jnp.dot((dt2 * xact2).astype(bf), smat,
                       preferred_element_type=jnp.float32)           # (M, N*I)

        dA = jnp.exp(dtN * a_flat).reshape(Bt, L, NI)                # exp(dt * A)
        dBu = (dtxN * BN).reshape(Bt, L, NI)                         # dt * B * u

        # ---- selective scan: log-depth (Hillis-Steele) associative scan ----
        # combine((a1,b1),(a2,b2)) = (a1*a2, a2*b1 + b2); h_t = b component
        a_s, b_s = dA, dBu
        d = 1
        while d < L:
            a_prev = jnp.concatenate(
                [jnp.ones((Bt, d, NI), jnp.float32), a_s[:, :L - d, :]], axis=1)
            b_prev = jnp.concatenate(
                [jnp.zeros((Bt, d, NI), jnp.float32), b_s[:, :L - d, :]], axis=1)
            b_s = a_s * b_prev + b_s
            a_s = a_s * a_prev
            d *= 2
        hs = b_s.reshape(M, NI)                                      # state per token (f32)

        # ---- y = sum_n state*C (MXU), D skip, gate, out_proj, residual ----
        y2 = jnp.dot((hs * CN).astype(bf), tmat,
                     preferred_element_type=jnp.float32)             # (M, I)
        y2 = (y2 + xact2 * dskip) * _silu(gate)
        h2 = h2 + jnp.dot(y2.astype(bf), w_out,
                          preferred_element_type=jnp.float32)

    # ---- head (fused): final RMSNorm + output Linear (lane-padded to 128) ----
    logits = jnp.dot(_rmsnorm(h2, fnw_ref[...]).astype(bf), who_ref[...],
                     preferred_element_type=jnp.float32) + bho_ref[...]
    out_ref[...] = logits.reshape(Bt, L, -1).astype(out_ref.dtype)


def _full_spec(a):
    return pl.BlockSpec(a.shape, lambda b, _n=a.ndim: (0,) * _n)


def _pick_block_batch(batch, seq, target_m=1024):
    """Largest divisor of `batch` whose block holds <= target_m tokens.
    Grid steps are a SEQUENTIAL loop on v5e/v6e (1 TC), so prefer grid=1 when
    everything fits; splitting only pays on v7x (2 TCs) when each core still
    gets >= ~256 tokens of MXU work (handled naturally by the token cap)."""
    best = 1
    for cand in range(1, batch + 1):
        if batch % cand == 0 and cand * seq <= target_m:
            best = cand
    return best


def _prepare_weights(params, v_pad):
    """Stack per-layer weights, fold dt_proj and the B/C lane-spread into the
    x_proj weight, pre-cast matmul weights to bf16, pad embedding tables and
    the head to lane-friendly shapes (exact algebraic rewrites, host side)."""
    ls = params['layers']
    I, N = INTER, STATE
    bf = jnp.bfloat16

    # stacked, zero-padded embedding tables: (F, VP, H)
    tabs = params['emb']
    vmax = max(t.shape[0] for t in tabs)
    VP = ((vmax + 7) // 8) * 8
    emb_tab = jnp.stack([
        jnp.pad(t.astype(jnp.float32), ((0, VP - t.shape[0]), (0, 0)))
        for t in tabs])

    def fuse_xproj(lp):
        w_dt_fused = lp['w_x'][:, :DT_RANK] @ lp['w_dt']                    # (I, I)
        w_b = jnp.repeat(lp['w_x'][:, DT_RANK:DT_RANK + N], I, axis=1)      # (I, N*I)
        w_c = jnp.repeat(lp['w_x'][:, DT_RANK + N:], I, axis=1)             # (I, N*I)
        return jnp.concatenate([w_b, w_c, w_dt_fused], axis=1)              # (I, 2NI+I)

    nw = jnp.stack([lp['norm_w'] for lp in ls])
    win = jnp.stack([lp['w_in'] for lp in ls]).astype(bf)
    cw = jnp.stack([lp['conv_w'] for lp in ls])
    cb = jnp.stack([lp['conv_b'] for lp in ls])
    wbig = jnp.stack([fuse_xproj(lp) for lp in ls]).astype(bf)
    bdt = jnp.stack([lp['b_dt'] for lp in ls])
    aflat = jnp.stack([(-jnp.exp(lp['A_log'])).T.reshape(1, N * I) for lp in ls])
    dd = jnp.stack([lp['D'] for lp in ls])
    wout = jnp.stack([lp['w_out'] for lp in ls]).astype(bf)
    tmat = jnp.tile(jnp.eye(I, dtype=jnp.float32), (N, 1))                  # (N*I, I)
    smat = tmat.T                                                           # (I, N*I)
    head_w = jnp.pad(params['head_w'],
                     ((0, 0), (0, v_pad - params['head_w'].shape[1]))).astype(bf)
    head_b = jnp.pad(params['head_b'],
                     ((0, 0), (0, v_pad - params['head_b'].shape[1])))
    return [emb_tab, nw, win, cw, cb, wbig, bdt, aflat, dd, wout,
            smat.astype(bf), tmat.astype(bf),
            params['final_norm_w'], head_w, head_b]


def mamba_sequence_model(params, x, block_batch=None):
    B, L, F = x.shape
    V = params['head_w'].shape[1]
    Vp = ((V + 127) // 128) * 128                     # lane-dense head / output stores
    Bt = block_batch if block_batch is not None else _pick_block_batch(B, L)
    assert B % Bt == 0

    weights = _prepare_weights(params, Vp)
    in_specs = [pl.BlockSpec((Bt, L, F), lambda b: (b, 0, 0))]
    in_specs += [_full_spec(w) for w in weights]

    out = pl.pallas_call(
        mamba_fused_kernel,
        out_shape=jax.ShapeDtypeStruct((B, L, Vp), jnp.float32),
        grid=(B // Bt,),
        in_specs=in_specs,
        out_specs=pl.BlockSpec((Bt, L, Vp), lambda b: (b, 0, 0)),
        scratch_shapes=[pltpu.VMEM((Bt, L + CONV_K - 1, INTER), jnp.float32)],
        compiler_params=pltpu.CompilerParams(dimension_semantics=("parallel",)),
    )(x.astype(jnp.int32), *weights)
    return out[:, :, :V]


def init_params(key, hidden_dim, feature2vocab):
    I = EXPAND * hidden_dim
    R = math.ceil(hidden_dim / 16)
    N = STATE
    keys = iter(jax.random.split(key, 64))

    def nrm(shape, scale=0.02):
        return (scale * jax.random.normal(next(keys), shape)).astype(jnp.float32)

    params = {'emb': [nrm((v, hidden_dim)) for v in feature2vocab.values()]}
    layers = []
    for _ in range(N_LAYERS):
        A = jnp.tile(jnp.arange(1, N + 1, dtype=jnp.float32)[None, :], (I, 1))
        layers.append(dict(
            norm_w=jnp.ones((1, hidden_dim), jnp.float32),
            w_in=nrm((hidden_dim, 2 * I)),      # in_proj (transposed, no bias)
            conv_w=nrm((CONV_K, I)),            # depthwise conv, (K, I)
            conv_b=nrm((1, I)),
            w_x=nrm((I, R + 2 * N)),            # x_proj (transposed, no bias)
            w_dt=nrm((R, I)),                   # dt_proj (transposed)
            b_dt=nrm((1, I)),
            A_log=jnp.log(A),                   # HF init: log(arange(1..N))
            D=jnp.ones((1, I), jnp.float32),
            w_out=nrm((I, hidden_dim)),         # out_proj (transposed, no bias)
        ))
    params['layers'] = layers
    params['final_norm_w'] = jnp.ones((1, hidden_dim), jnp.float32)
    params['head_w'] = nrm((hidden_dim, feature2vocab['mcc']))
    params['head_b'] = nrm((1, feature2vocab['mcc']))
    return params


if __name__ == "__main__":
    feature2vocab = {'mcc': 50, 'amount_bin': 10, 'hour': 24}
    key = jax.random.PRNGKey(0)
    pkey, xkey = jax.random.split(key)
    params = init_params(pkey, HIDDEN, feature2vocab)

    B, L, F = 2, 8, len(feature2vocab)
    # token ids in [0, 10) are valid for every feature's vocab
    x = jax.random.randint(xkey, (B, L, F), 0, 10).astype(jnp.int32)

    fwd = jax.jit(mamba_sequence_model)
    logits = fwd(params, x)
    jax.block_until_ready(logits)
    assert logits.shape == (B, L, feature2vocab['mcc']), logits.shape
    assert bool(jnp.all(jnp.isfinite(logits)))
    print("KERNEL_OK")
</pallas_src>

<mosaic_0001>
module attributes {stable_mosaic.version = 11 : i64} {
  func.func @mamba_fused_kernel(%arg0: i32, %arg1: memref<2x8x3xi32, #tpu.memory_space<vmem>>, %arg2: memref<3x56x32xf32, #tpu.memory_space<vmem>>, %arg3: memref<4x1x32xf32, #tpu.memory_space<vmem>>, %arg4: memref<4x32x128xbf16, #tpu.memory_space<vmem>>, %arg5: memref<4x4x64xf32, #tpu.memory_space<vmem>>, %arg6: memref<4x1x64xf32, #tpu.memory_space<vmem>>, %arg7: memref<4x64x1088xbf16, #tpu.memory_space<vmem>>, %arg8: memref<4x1x64xf32, #tpu.memory_space<vmem>>, %arg9: memref<4x1x512xf32, #tpu.memory_space<vmem>>, %arg10: memref<4x1x64xf32, #tpu.memory_space<vmem>>, %arg11: memref<4x64x32xbf16, #tpu.memory_space<vmem>>, %arg12: memref<64x512xbf16, #tpu.memory_space<vmem>>, %arg13: memref<512x64xbf16, #tpu.memory_space<vmem>>, %arg14: memref<1x32xf32, #tpu.memory_space<vmem>>, %arg15: memref<32x128xbf16, #tpu.memory_space<vmem>>, %arg16: memref<1x128xf32, #tpu.memory_space<vmem>>, %arg17: memref<2x8x128xf32, #tpu.memory_space<vmem>>, %arg18: memref<2x11x64xf32, #tpu.memory_space<vmem>>) attributes {dimension_semantics = [#tpu.dimension_semantics<parallel>], iteration_bounds = array<i64: 1>, scalar_prefetch = 0 : i64, scratch_operands = 1 : i64, tpu.core_type = #tpu.core_type<tc>, window_params = [{transform_indices = @transform_0, window_bounds = array<i64: 2, 8, 3>}, {pipeline_mode = #tpu.pipeline_mode<synchronous>, transform_indices = @transform_1, window_bounds = array<i64: 3, 56, 32>}, {pipeline_mode = #tpu.pipeline_mode<synchronous>, transform_indices = @transform_2, window_bounds = array<i64: 4, 1, 32>}, {pipeline_mode = #tpu.pipeline_mode<synchronous>, transform_indices = @transform_3, window_bounds = array<i64: 4, 32, 128>}, {pipeline_mode = #tpu.pipeline_mode<synchronous>, transform_indices = @transform_4, window_bounds = array<i64: 4, 4, 64>}, {pipeline_mode = #tpu.pipeline_mode<synchronous>, transform_indices = @transform_5, window_bounds = array<i64: 4, 1, 64>}, {pipeline_mode = #tpu.pipeline_mode<synchronous>, transform_indices = @transform_6, window_bounds = array<i64: 4, 64, 1088>}, {pipeline_mode = #tpu.pipeline_mode<synchronous>, transform_indices = @transform_7, window_bounds = array<i64: 4, 1, 64>}, {pipeline_mode = #tpu.pipeline_mode<synchronous>, transform_indices = @transform_8, window_bounds = array<i64: 4, 1, 512>}, {pipeline_mode = #tpu.pipeline_mode<synchronous>, transform_indices = @transform_9, window_bounds = array<i64: 4, 1, 64>}, {pipeline_mode = #tpu.pipeline_mode<synchronous>, transform_indices = @transform_10, window_bounds = array<i64: 4, 64, 32>}, {pipeline_mode = #tpu.pipeline_mode<synchronous>, transform_indices = @transform_11, window_bounds = array<i64: 64, 512>}, {pipeline_mode = #tpu.pipeline_mode<synchronous>, transform_indices = @transform_12, window_bounds = array<i64: 512, 64>}, {pipeline_mode = #tpu.pipeline_mode<synchronous>, transform_indices = @transform_13, window_bounds = array<i64: 1, 32>}, {pipeline_mode = #tpu.pipeline_mode<synchronous>, transform_indices = @transform_14, window_bounds = array<i64: 32, 128>}, {pipeline_mode = #tpu.pipeline_mode<synchronous>, transform_indices = @transform_15, window_bounds = array<i64: 1, 128>}, {transform_indices = @transform_16, window_bounds = array<i64: 2, 8, 128>}]} {
    %c0 = arith.constant 0 : index
    %c0_0 = arith.constant 0 : index
    %c0_1 = arith.constant 0 : index
    %0 = vector.load %arg1[%c0, %c0_0, %c0_1] : memref<2x8x3xi32, #tpu.memory_space<vmem>>, vector<2x8x3xi32>
    %1 = vector.shape_cast %0 : vector<2x8x3xi32> to vector<16x3xi32>
    %2 = tpu.iota {dimensions = array<i32: 1>} : vector<16x56xi32>
    %cst = arith.constant 0.000000e+00 : f32
    %3 = vector.broadcast %cst : f32 to vector<16x32xf32>
    %4 = vector.extract_strided_slice %1 {offsets = [0, 0], sizes = [16, 1], strides = [1, 1]} : vector<16x3xi32> to vector<16x1xi32>
    %5 = vector.broadcast %4 : vector<16x1xi32> to vector<16x56xi32>
    %6 = arith.cmpi eq, %5, %2 : vector<16x56xi32>
    %7 = arith.extui %6 : vector<16x56xi1> to vector<16x56xi32>
    %8 = arith.sitofp %7 : vector<16x56xi32> to vector<16x56xf32>
    %c0_2 = arith.constant 0 : index
    %c0_3 = arith.constant 0 : index
    %c0_4 = arith.constant 0 : index
    %9 = vector.load %arg2[%c0_2, %c0_3, %c0_4] : memref<3x56x32xf32, #tpu.memory_space<vmem>>, vector<1x56x32xf32>
    %10 = vector.shape_cast %9 : vector<1x56x32xf32> to vector<56x32xf32>
    %cst_5 = arith.constant dense<0.000000e+00> : vector<16x32xf32>
    %11 = tpu.matmul %8, %10, %cst_5 {dimension_numbers = #tpu.dot_dimension_numbers<[1], [0], [0], [1], [0, 0, 1, 1], [], []>} : vector<16x56xf32>, vector<56x32xf32>, vector<16x32xf32> -> vector<16x32xf32>
    %12 = arith.addf %3, %11 : vector<16x32xf32>
    %13 = vector.extract_strided_slice %1 {offsets = [0, 1], sizes = [16, 1], strides = [1, 1]} : vector<16x3xi32> to vector<16x1xi32>
    %14 = vector.broadcast %13 : vector<16x1xi32> to vector<16x56xi32>
    %15 = arith.cmpi eq, %14, %2 : vector<16x56xi32>
    %16 = arith.extui %15 : vector<16x56xi1> to vector<16x56xi32>
    %17 = arith.sitofp %16 : vector<16x56xi32> to vector<16x56xf32>
    %c1 = arith.constant 1 : index
    %c0_6 = arith.constant 0 : index
    %c0_7 = arith.constant 0 : index
    %18 = vector.load %arg2[%c1, %c0_6, %c0_7] : memref<3x56x32xf32, #tpu.memory_space<vmem>>, vector<1x56x32xf32>
    %19 = vector.shape_cast %18 : vector<1x56x32xf32> to vector<56x32xf32>
    %cst_8 = arith.constant dense<0.000000e+00> : vector<16x32xf32>
    %20 = tpu.matmul %17, %19, %cst_8 {dimension_numbers = #tpu.dot_dimension_numbers<[1], [0], [0], [1], [0, 0, 1, 1], [], []>} : vector<16x56xf32>, vector<56x32xf32>, vector<16x32xf32> -> vector<16x32xf32>
    %21 = arith.addf %12, %20 : vector<16x32xf32>
    %22 = vector.extract_strided_slice %1 {offsets = [0, 2], sizes = [16, 1], strides = [1, 1]} : vector<16x3xi32> to vector<16x1xi32>
    %23 = vector.broadcast %22 : vector<16x1xi32> to vector<16x56xi32>
    %24 = arith.cmpi eq, %23, %2 : vector<16x56xi32>
    %25 = arith.extui %24 : vector<16x56xi1> to vector<16x56xi32>
    %26 = arith.sitofp %25 : vector<16x56xi32> to vector<16x56xf32>
    %c2 = arith.constant 2 : index
    %c0_9 = arith.constant 0 : index
    %c0_10 = arith.constant 0 : index
    %27 = vector.load %arg2[%c2, %c0_9, %c0_10] : memref<3x56x32xf32, #tpu.memory_space<vmem>>, vector<1x56x32xf32>
    %28 = vector.shape_cast %27 : vector<1x56x32xf32> to vector<56x32xf32>
    %cst_11 = arith.constant dense<0.000000e+00> : vector<16x32xf32>
    %29 = tpu.matmul %26, %28, %cst_11 {dimension_numbers = #tpu.dot_dimension_numbers<[1], [0], [0], [1], [0, 0, 1, 1], [], []>} : vector<16x56xf32>, vector<56x32xf32>, vector<16x32xf32> -> vector<16x32xf32>
    %30 = arith.addf %21, %29 : vector<16x32xf32>
    %cst_12 = arith.constant 0.000000e+00 : f32
    %31 = vector.broadcast %cst_12 : f32 to vector<2x11x64xf32>
    %c0_13 = arith.constant 0 : index
    %c0_14 = arith.constant 0 : index
    %c0_15 = arith.constant 0 : index
    %32 = vector.load %arg18[%c0_13, %c0_14, %c0_15] : memref<2x11x64xf32, #tpu.memory_space<vmem>>, vector<2x11x64xf32>
    tpu.vector_store %arg18[%c0_13, %c0_14, %c0_15], %31 {strides = array<i32>} : memref<2x11x64xf32, #tpu.memory_space<vmem>>, vector<2x11x64xf32>,
    %c0_16 = arith.constant 0 : index
    %c0_17 = arith.constant 0 : index
    %33 = vector.load %arg12[%c0_16, %c0_17] : memref<64x512xbf16, #tpu.memory_space<vmem>>, vector<64x512xbf16>
    %c0_18 = arith.constant 0 : index
    %c0_19 = arith.constant 0 : index
    %34 = vector.load %arg13[%c0_18, %c0_19] : memref<512x64xbf16, #tpu.memory_space<vmem>>, vector<512x64xbf16>
    %c0_20 = arith.constant 0 : index
    %c0_21 = arith.constant 0 : index
    %c0_22 = arith.constant 0 : index
    %35 = vector.load %arg3[%c0_20, %c0_21, %c0_22] : memref<4x1x32xf32, #tpu.memory_space<vmem>>, vector<1x1x32xf32>
    %36 = vector.shape_cast %35 : vector<1x1x32xf32> to vector<1x32xf32>
    %c0_23 = arith.constant 0 : index
    %c0_24 = arith.constant 0 : index
    %c0_25 = arith.constant 0 : index
    %37 = vector.load %arg4[%c0_23, %c0_24, %c0_25] : memref<4x32x128xbf16, #tpu.memory_space<vmem>>, vector<1x32x128xbf16>
    %38 = vector.shape_cast %37 : vector<1x32x128xbf16> to vector<32x128xbf16>
    %c0_26 = arith.constant 0 : index
    %c0_27 = arith.constant 0 : index
    %c0_28 = arith.constant 0 : index
    %39 = vector.load %arg5[%c0_26, %c0_27, %c0_28] : memref<4x4x64xf32, #tpu.memory_space<vmem>>, vector<1x4x64xf32>
    %40 = vector.shape_cast %39 : vector<1x4x64xf32> to vector<4x64xf32>
    %c0_29 = arith.constant 0 : index
    %c0_30 = arith.constant 0 : index
    %c0_31 = arith.constant 0 : index
    %41 = vector.load %arg6[%c0_29, %c0_30, %c0_31] : memref<4x1x64xf32, #tpu.memory_space<vmem>>, vector<1x1x64xf32>
    %42 = vector.shape_cast %41 : vector<1x1x64xf32> to vector<1x64xf32>
    %c0_32 = arith.constant 0 : index
    %c0_33 = arith.constant 0 : index
    %c0_34 = arith.constant 0 : index
    %43 = vector.load %arg7[%c0_32, %c0_33, %c0_34] : memref<4x64x1088xbf16, #tpu.memory_space<vmem>>, vector<1x64x1088xbf16>
    %44 = vector.shape_cast %43 : vector<1x64x1088xbf16> to vector<64x1088xbf16>
    %c0_35 = arith.constant 0 : index
    %c0_36 = arith.constant 0 : index
    %c0_37 = arith.constant 0 : index
    %45 = vector.load %arg8[%c0_35, %c0_36, %c0_37] : memref<4x1x64xf32, #tpu.memory_space<vmem>>, vector<1x1x64xf32>
    %46 = vector.shape_cast %45 : vector<1x1x64xf32> to vector<1x64xf32>
    %c0_38 = arith.constant 0 : index
    %c0_39 = arith.constant 0 : index
    %c0_40 = arith.constant 0 : index
    %47 = vector.load %arg9[%c0_38, %c0_39, %c0_40] : memref<4x1x512xf32, #tpu.memory_space<vmem>>, vector<1x1x512xf32>
    %48 = vector.shape_cast %47 : vector<1x1x512xf32> to vector<1x512xf32>
    %c0_41 = arith.constant 0 : index
    %c0_42 = arith.constant 0 : index
    %c0_43 = arith.constant 0 : index
    %49 = vector.load %arg10[%c0_41, %c0_42, %c0_43] : memref<4x1x64xf32, #tpu.memory_space<vmem>>, vector<1x1x64xf32>
    %50 = vector.shape_cast %49 : vector<1x1x64xf32> to vector<1x64xf32>
    %c0_44 = arith.constant 0 : index
    %c0_45 = arith.constant 0 : index
    %c0_46 = arith.constant 0 : index
    %51 = vector.load %arg11[%c0_44, %c0_45, %c0_46] : memref<4x64x32xbf16, #tpu.memory_space<vmem>>, vector<1x64x32xbf16>
    %52 = vector.shape_cast %51 : vector<1x64x32xbf16> to vector<64x32xbf16>
    %53 = arith.mulf %30, %30 : vector<16x32xf32>
    %cst_47 = arith.constant dense<0.000000e+00> : vector<16xf32>
    %54 = vector.multi_reduction <add>, %53, %cst_47 [1] : vector<16x32xf32> to vector<16xf32>
    %55 = vector.shape_cast %54 : vector<16xf32> to vector<16x1xf32>
    %cst_48 = arith.constant 3.200000e+01 : f32
    %56 = vector.broadcast %cst_48 : f32 to vector<16x1xf32>
    %57 = arith.divf %55, %56 : vector<16x1xf32>
    %cst_49 = arith.constant 9.99999974E-6 : f32
    %58 = vector.broadcast %cst_49 : f32 to vector<16x1xf32>
    %59 = arith.addf %57, %58 : vector<16x1xf32>
    %60 = math.rsqrt %59 : vector<16x1xf32>
    %61 = vector.broadcast %60 : vector<16x1xf32> to vector<16x32xf32>
    %62 = arith.mulf %30, %61 : vector<16x32xf32>
    %63 = vector.broadcast %36 : vector<1x32xf32> to vector<16x32xf32>
    %64 = arith.mulf %62, %63 : vector<16x32xf32>
    %65 = arith.truncf %64 : vector<16x32xf32> to vector<16x32xbf16>
    %cst_50 = arith.constant dense<0.000000e+00> : vector<16x128xf32>
    %66 = tpu.matmul %65, %38, %cst_50 {dimension_numbers = #tpu.dot_dimension_numbers<[1], [0], [0], [1], [0, 0, 1, 1], [], []>} : vector<16x32xbf16>, vector<32x128xbf16>, vector<16x128xf32> -> vector<16x128xf32>
    %67 = vector.extract_strided_slice %66 {offsets = [0, 0], sizes = [16, 64], strides = [1, 1]} : vector<16x128xf32> to vector<16x64xf32>
    %68 = vector.shape_cast %67 : vector<16x64xf32> to vector<2x8x64xf32>
    %69 = vector.extract_strided_slice %66 {offsets = [0, 64], sizes = [16, 64], strides = [1, 1]} : vector<16x128xf32> to vector<16x64xf32>
    %c0_51 = arith.constant 0 : index
    %c3 = arith.constant 3 : index
    %c0_52 = arith.constant 0 : index
    %70 = vector.load %arg18[%c0_51, %c3, %c0_52] : memref<2x11x64xf32, #tpu.memory_space<vmem>>, vector<2x8x64xf32>
    tpu.vector_store %arg18[%c0_51, %c3, %c0_52], %68 {strides = array<i32>} : memref<2x11x64xf32, #tpu.memory_space<vmem>>, vector<2x8x64xf32>,
    %71 = vector.extract_strided_slice %40 {offsets = [3, 0], sizes = [1, 64], strides = [1, 1]} : vector<4x64xf32> to vector<1x64xf32>
    %72 = vector.shape_cast %71 : vector<1x64xf32> to vector<1x1x64xf32>
    %73 = vector.broadcast %72 : vector<1x1x64xf32> to vector<2x8x64xf32>
    %74 = arith.mulf %68, %73 : vector<2x8x64xf32>
    %c0_53 = arith.constant 0 : index
    %c2_54 = arith.constant 2 : index
    %c0_55 = arith.constant 0 : index
    %75 = vector.load %arg18[%c0_53, %c2_54, %c0_55] : memref<2x11x64xf32, #tpu.memory_space<vmem>>, vector<2x8x64xf32>
    %76 = vector.extract_strided_slice %40 {offsets = [2, 0], sizes = [1, 64], strides = [1, 1]} : vector<4x64xf32> to vector<1x64xf32>
    %77 = vector.shape_cast %76 : vector<1x64xf32> to vector<1x1x64xf32>
    %78 = vector.broadcast %77 : vector<1x1x64xf32> to vector<2x8x64xf32>
    %79 = arith.mulf %75, %78 : vector<2x8x64xf32>
    %80 = arith.addf %74, %79 : vector<2x8x64xf32>
    %c0_56 = arith.constant 0 : index
    %c1_57 = arith.constant 1 : index
    %c0_58 = arith.constant 0 : index
    %81 = vector.load %arg18[%c0_56, %c1_57, %c0_58] : memref<2x11x64xf32, #tpu.memory_space<vmem>>, vector<2x8x64xf32>
    %82 = vector.extract_strided_slice %40 {offsets = [1, 0], sizes = [1, 64], strides = [1, 1]} : vector<4x64xf32> to vector<1x64xf32>
    %83 = vector.shape_cast %82 : vector<1x64xf32> to vector<1x1x64xf32>
    %84 = vector.broadcast %83 : vector<1x1x64xf32> to vector<2x8x64xf32>
    %85 = arith.mulf %81, %84 : vector<2x8x64xf32>
    %86 = arith.addf %80, %85 : vector<2x8x64xf32>
    %c0_59 = arith.constant 0 : index
    %c0_60 = arith.constant 0 : index
    %c0_61 = arith.constant 0 : index
    %87 = vector.load %arg18[%c0_59, %c0_60, %c0_61] : memref<2x11x64xf32, #tpu.memory_space<vmem>>, vector<2x8x64xf32>
    %88 = vector.extract_strided_slice %40 {offsets = [0, 0], sizes = [1, 64], strides = [1, 1]} : vector<4x64xf32> to vector<1x64xf32>
    %89 = vector.shape_cast %88 : vector<1x64xf32> to vector<1x1x64xf32>
    %90 = vector.broadcast %89 : vector<1x1x64xf32> to vector<2x8x64xf32>
    %91 = arith.mulf %87, %90 : vector<2x8x64xf32>
    %92 = arith.addf %86, %91 : vector<2x8x64xf32>
    %93 = vector.shape_cast %42 : vector<1x64xf32> to vector<1x1x64xf32>
    %94 = vector.broadcast %93 : vector<1x1x64xf32> to vector<2x8x64xf32>
    %95 = arith.addf %92, %94 : vector<2x8x64xf32>
    %96 = arith.negf %95 : vector<2x8x64xf32>
    %97 = math.exp %96 : vector<2x8x64xf32>
    %cst_62 = arith.constant 1.000000e+00 : f32
    %98 = vector.broadcast %cst_62 : f32 to vector<2x8x64xf32>
    %99 = arith.addf %98, %97 : vector<2x8x64xf32>
    %100 = arith.divf %98, %99 : vector<2x8x64xf32>
    %101 = arith.mulf %95, %100 : vector<2x8x64xf32>
    %102 = vector.shape_cast %101 : vector<2x8x64xf32> to vector<16x64xf32>
    %103 = arith.truncf %102 : vector<16x64xf32> to vector<16x64xbf16>
    %cst_63 = arith.constant dense<0.000000e+00> : vector<16x1088xf32>
    %104 = tpu.matmul %103, %44, %cst_63 {dimension_numbers = #tpu.dot_dimension_numbers<[1], [0], [0], [1], [0, 0, 1, 1], [], []>} : vector<16x64xbf16>, vector<64x1088xbf16>, vector<16x1088xf32> -> vector<16x1088xf32>
    %105 = vector.extract_strided_slice %104 {offsets = [0, 0], sizes = [16, 512], strides = [1, 1]} : vector<16x1088xf32> to vector<16x512xf32>
    %106 = vector.extract_strided_slice %104 {offsets = [0, 512], sizes = [16, 512], strides = [1, 1]} : vector<16x1088xf32> to vector<16x512xf32>
    %107 = vector.extract_strided_slice %104 {offsets = [0, 1024], sizes = [16, 64], strides = [1, 1]} : vector<16x1088xf32> to vector<16x64xf32>
    %108 = vector.broadcast %46 : vector<1x64xf32> to vector<16x64xf32>
    %109 = arith.addf %107, %108 : vector<16x64xf32>
    %cst_64 = arith.constant 0.000000e+00 : f32
    %110 = vector.broadcast %cst_64 : f32 to vector<16x64xf32>
    %111 = arith.maximumf %109, %110 : vector<16x64xf32>
    %112 = math.absf %109 : vector<16x64xf32>
    %cst_65 = arith.constant 0.000000e+00 : f32
    %113 = vector.broadcast %cst_65 : f32 to vector<16x64xf32>
    %114 = arith.subf %113, %112 : vector<16x64xf32>
    %115 = math.exp %114 : vector<16x64xf32>
    %cst_66 = arith.constant 1.000000e+00 : f32
    %116 = vector.broadcast %cst_66 : f32 to vector<16x64xf32>
    %117 = arith.addf %116, %115 : vector<16x64xf32>
    %118 = math.log %117 : vector<16x64xf32>
    %119 = arith.addf %111, %118 : vector<16x64xf32>
    %120 = arith.truncf %119 : vector<16x64xf32> to vector<16x64xbf16>
    %cst_67 = arith.constant dense<0.000000e+00> : vector<16x512xf32>
    %121 = tpu.matmul %120, %33, %cst_67 {dimension_numbers = #tpu.dot_dimension_numbers<[1], [0], [0], [1], [0, 0, 1, 1], [], []>} : vector<16x64xbf16>, vector<64x512xbf16>, vector<16x512xf32> -> vector<16x512xf32>
    %122 = arith.mulf %119, %102 : vector<16x64xf32>
    %123 = arith.truncf %122 : vector<16x64xf32> to vector<16x64xbf16>
    %cst_68 = arith.constant dense<0.000000e+00> : vector<16x512xf32>
    %124 = tpu.matmul %123, %33, %cst_68 {dimension_numbers = #tpu.dot_dimension_numbers<[1], [0], [0], [1], [0, 0, 1, 1], [], []>} : vector<16x64xbf16>, vector<64x512xbf16>, vector<16x512xf32> -> vector<16x512xf32>
    %125 = vector.broadcast %48 : vector<1x512xf32> to vector<16x512xf32>
    %126 = arith.mulf %121, %125 : vector<16x512xf32>
    %127 = math.exp %126 : vector<16x512xf32>
    %128 = vector.shape_cast %127 : vector<16x512xf32> to vector<2x8x512xf32>
    %129 = arith.mulf %124, %105 : vector<16x512xf32>
    %130 = vector.shape_cast %129 : vector<16x512xf32> to vector<2x8x512xf32>
    %cst_69 = arith.constant 1.000000e+00 : f32
    %131 = vector.broadcast %cst_69 : f32 to vector<2x1x512xf32>
    %132 = vector.extract_strided_slice %128 {offsets = [0, 0, 0], sizes = [2, 7, 512], strides = [1, 1, 1]} : vector<2x8x512xf32> to vector<2x7x512xf32>
    %133 = tpu.concatenate %131, %132 in 1 : vector<2x1x512xf32>, vector<2x7x512xf32> -> vector<2x8x512xf32>
    %cst_70 = arith.constant 0.000000e+00 : f32
    %134 = vector.broadcast %cst_70 : f32 to vector<2x1x512xf32>
    %135 = vector.extract_strided_slice %130 {offsets = [0, 0, 0], sizes = [2, 7, 512], strides = [1, 1, 1]} : vector<2x8x512xf32> to vector<2x7x512xf32>
    %136 = tpu.concatenate %134, %135 in 1 : vector<2x1x512xf32>, vector<2x7x512xf32> -> vector<2x8x512xf32>
    %137 = arith.mulf %128, %136 : vector<2x8x512xf32>
    %138 = arith.addf %137, %130 : vector<2x8x512xf32>
    %139 = arith.mulf %128, %133 : vector<2x8x512xf32>
    %cst_71 = arith.constant 1.000000e+00 : f32
    %140 = vector.broadcast %cst_71 : f32 to vector<2x2x512xf32>
    %141 = vector.extract_strided_slice %139 {offsets = [0, 0, 0], sizes = [2, 6, 512], strides = [1, 1, 1]} : vector<2x8x512xf32> to vector<2x6x512xf32>
    %142 = tpu.concatenate %140, %141 in 1 : vector<2x2x512xf32>, vector<2x6x512xf32> -> vector<2x8x512xf32>
    %cst_72 = arith.constant 0.000000e+00 : f32
    %143 = vector.broadcast %cst_72 : f32 to vector<2x2x512xf32>
    %144 = vector.extract_strided_slice %138 {offsets = [0, 0, 0], sizes = [2, 6, 512], strides = [1, 1, 1]} : vector<2x8x512xf32> to vector<2x6x512xf32>
    %145 = tpu.concatenate %143, %144 in 1 : vector<2x2x512xf32>, vector<2x6x512xf32> -> vector<2x8x512xf32>
    %146 = arith.mulf %139, %145 : vector<2x8x512xf32>
    %147 = arith.addf %146, %138 : vector<2x8x512xf32>
    %148 = arith.mulf %139, %142 : vector<2x8x512xf32>
    %cst_73 = arith.constant 0.000000e+00 : f32
    %149 = vector.broadcast %cst_73 : f32 to vector<2x4x512xf32>
    %150 = vector.extract_strided_slice %147 {offsets = [0, 0, 0], sizes = [2, 4, 512], strides = [1, 1, 1]} : vector<2x8x512xf32> to vector<2x4x512xf32>
    %151 = tpu.concatenate %149, %150 in 1 : vector<2x4x512xf32>, vector<2x4x512xf32> -> vector<2x8x512xf32>
    %152 = arith.mulf %148, %151 : vector<2x8x512xf32>
    %153 = arith.addf %152, %147 : vector<2x8x512xf32>
    %154 = vector.shape_cast %153 : vector<2x8x512xf32> to vector<16x512xf32>
    %155 = arith.mulf %154, %106 : vector<16x512xf32>
    %156 = arith.truncf %155 : vector<16x512xf32> to vector<16x512xbf16>
    %cst_74 = arith.constant dense<0.000000e+00> : vector<16x64xf32>
    %157 = tpu.matmul %156, %34, %cst_74 {dimension_numbers = #tpu.dot_dimension_numbers<[1], [0], [0], [1], [0, 0, 1, 1], [], []>} : vector<16x512xbf16>, vector<512x64xbf16>, vector<16x64xf32> -> vector<16x64xf32>
    %158 = vector.broadcast %50 : vector<1x64xf32> to vector<16x64xf32>
    %159 = arith.mulf %102, %158 : vector<16x64xf32>
    %160 = arith.addf %157, %159 : vector<16x64xf32>
    %161 = arith.negf %69 : vector<16x64xf32>
    %162 = math.exp %161 : vector<16x64xf32>
    %cst_75 = arith.constant 1.000000e+00 : f32
    %163 = vector.broadcast %cst_75 : f32 to vector<16x64xf32>
    %164 = arith.addf %163, %162 : vector<16x64xf32>
    %165 = arith.divf %163, %164 : vector<16x64xf32>
    %166 = arith.mulf %69, %165 : vector<16x64xf32>
    %167 = arith.mulf %160, %166 : vector<16x64xf32>
    %168 = arith.truncf %167 : vector<16x64xf32> to vector<16x64xbf16>
    %cst_76 = arith.constant dense<0.000000e+00> : vector<16x32xf32>
    %169 = tpu.matmul %168, %52, %cst_76 {dimension_numbers = #tpu.dot_dimension_numbers<[1], [0], [0], [1], [0, 0, 1, 1], [], []>} : vector<16x64xbf16>, vector<64x32xbf16>, vector<16x32xf32> -> vector<16x32xf32>
    %170 = arith.addf %30, %169 : vector<16x32xf32>
    %c1_77 = arith.constant 1 : index
    %c0_78 = arith.constant 0 : index
    %c0_79 = arith.constant 0 : index
    %171 = vector.load %arg3[%c1_77, %c0_78, %c0_79] : memref<4x1x32xf32, #tpu.memory_space<vmem>>, vector<1x1x32xf32>
    %172 = vector.shape_cast %171 : vector<1x1x32xf32> to vector<1x32xf32>
    %c1_80 = arith.constant 1 : index
    %c0_81 = arith.constant 0 : index
    %c0_82 = arith.constant 0 : index
    %173 = vector.load %arg4[%c1_80, %c0_81, %c0_82] : memref<4x32x128xbf16, #tpu.memory_space<vmem>>, vector<1x32x128xbf16>
    %174 = vector.shape_cast %173 : vector<1x32x128xbf16> to vector<32x128xbf16>
    %c1_83 = arith.constant 1 : index
    %c0_84 = arith.constant 0 : index
    %c0_85 = arith.constant 0 : index
    %175 = vector.load %arg5[%c1_83, %c0_84, %c0_85] : memref<4x4x64xf32, #tpu.memory_space<vmem>>, vector<1x4x64xf32>
    %176 = vector.shape_cast %175 : vector<1x4x64xf32> to vector<4x64xf32>
    %c1_86 = arith.constant 1 : index
    %c0_87 = arith.constant 0 : index
    %c0_88 = arith.constant 0 : index
    %177 = vector.load %arg6[%c1_86, %c0_87, %c0_88] : memref<4x1x64xf32, #tpu.memory_space<vmem>>, vector<1x1x64xf32>
    %178 = vector.shape_cast %177 : vector<1x1x64xf32> to vector<1x64xf32>
    %c1_89 = arith.constant 1 : index
    %c0_90 = arith.constant 0 : index
    %c0_91 = arith.constant 0 : index
    %179 = vector.load %arg7[%c1_89, %c0_90, %c0_91] : memref<4x64x1088xbf16, #tpu.memory_space<vmem>>, vector<1x64x1088xbf16>
    %180 = vector.shape_cast %179 : vector<1x64x1088xbf16> to vector<64x1088xbf16>
    %c1_92 = arith.constant 1 : index
    %c0_93 = arith.constant 0 : index
    %c0_94 = arith.constant 0 : index
    %181 = vector.load %arg8[%c1_92, %c0_93, %c0_94] : memref<4x1x64xf32, #tpu.memory_space<vmem>>, vector<1x1x64xf32>
    %182 = vector.shape_cast %181 : vector<1x1x64xf32> to vector<1x64xf32>
    %c1_95 = arith.constant 1 : index
    %c0_96 = arith.constant 0 : index
    %c0_97 = arith.constant 0 : index
    %183 = vector.load %arg9[%c1_95, %c0_96, %c0_97] : memref<4x1x512xf32, #tpu.memory_space<vmem>>, vector<1x1x512xf32>
    %184 = vector.shape_cast %183 : vector<1x1x512xf32> to vector<1x512xf32>
    %c1_98 = arith.constant 1 : index
    %c0_99 = arith.constant 0 : index
    %c0_100 = arith.constant 0 : index
    %185 = vector.load %arg10[%c1_98, %c0_99, %c0_100] : memref<4x1x64xf32, #tpu.memory_space<vmem>>, vector<1x1x64xf32>
    %186 = vector.shape_cast %185 : vector<1x1x64xf32> to vector<1x64xf32>
    %c1_101 = arith.constant 1 : index
    %c0_102 = arith.constant 0 : index
    %c0_103 = arith.constant 0 : index
    %187 = vector.load %arg11[%c1_101, %c0_102, %c0_103] : memref<4x64x32xbf16, #tpu.memory_space<vmem>>, vector<1x64x32xbf16>
    %188 = vector.shape_cast %187 : vector<1x64x32xbf16> to vector<64x32xbf16>
    %189 = arith.mulf %170, %170 : vector<16x32xf32>
    %cst_104 = arith.constant dense<0.000000e+00> : vector<16xf32>
    %190 = vector.multi_reduction <add>, %189, %cst_104 [1] : vector<16x32xf32> to vector<16xf32>
    %191 = vector.shape_cast %190 : vector<16xf32> to vector<16x1xf32>
    %cst_105 = arith.constant 3.200000e+01 : f32
    %192 = vector.broadcast %cst_105 : f32 to vector<16x1xf32>
    %193 = arith.divf %191, %192 : vector<16x1xf32>
    %cst_106 = arith.constant 9.99999974E-6 : f32
    %194 = vector.broadcast %cst_106 : f32 to vector<16x1xf32>
    %195 = arith.addf %193, %194 : vector<16x1xf32>
    %196 = math.rsqrt %195 : vector<16x1xf32>
    %197 = vector.broadcast %196 : vector<16x1xf32> to vector<16x32xf32>
    %198 = arith.mulf %170, %197 : vector<16x32xf32>
    %199 = vector.broadcast %172 : vector<1x32xf32> to vector<16x32xf32>
    %200 = arith.mulf %198, %199 : vector<16x32xf32>
    %201 = arith.truncf %200 : vector<16x32xf32> to vector<16x32xbf16>
    %cst_107 = arith.constant dense<0.000000e+00> : vector<16x128xf32>
    %202 = tpu.matmul %201, %174, %cst_107 {dimension_numbers = #tpu.dot_dimension_numbers<[1], [0], [0], [1], [0, 0, 1, 1], [], []>} : vector<16x32xbf16>, vector<32x128xbf16>, vector<16x128xf32> -> vector<16x128xf32>
    %203 = vector.extract_strided_slice %202 {offsets = [0, 0], sizes = [16, 64], strides = [1, 1]} : vector<16x128xf32> to vector<16x64xf32>
    %204 = vector.shape_cast %203 : vector<16x64xf32> to vector<2x8x64xf32>
    %205 = vector.extract_strided_slice %202 {offsets = [0, 64], sizes = [16, 64], strides = [1, 1]} : vector<16x128xf32> to vector<16x64xf32>
    %c0_108 = arith.constant 0 : index
    %c3_109 = arith.constant 3 : index
    %c0_110 = arith.constant 0 : index
    %206 = vector.load %arg18[%c0_108, %c3_109, %c0_110] : memref<2x11x64xf32, #tpu.memory_space<vmem>>, vector<2x8x64xf32>
    tpu.vector_store %arg18[%c0_108, %c3_109, %c0_110], %204 {strides = array<i32>} : memref<2x11x64xf32, #tpu.memory_space<vmem>>, vector<2x8x64xf32>,
    %207 = vector.extract_strided_slice %176 {offsets = [3, 0], sizes = [1, 64], strides = [1, 1]} : vector<4x64xf32> to vector<1x64xf32>
    %208 = vector.shape_cast %207 : vector<1x64xf32> to vector<1x1x64xf32>
    %209 = vector.broadcast %208 : vector<1x1x64xf32> to vector<2x8x64xf32>
    %210 = arith.mulf %204, %209 : vector<2x8x64xf32>
    %c0_111 = arith.constant 0 : index
    %c2_112 = arith.constant 2 : index
    %c0_113 = arith.constant 0 : index
    %211 = vector.load %arg18[%c0_111, %c2_112, %c0_113] : memref<2x11x64xf32, #tpu.memory_space<vmem>>, vector<2x8x64xf32>
    %212 = vector.extract_strided_slice %176 {offsets = [2, 0], sizes = [1, 64], strides = [1, 1]} : vector<4x64xf32> to vector<1x64xf32>
    %213 = vector.shape_cast %212 : vector<1x64xf32> to vector<1x1x64xf32>
    %214 = vector.broadcast %213 : vector<1x1x64xf32> to vector<2x8x64xf32>
    %215 = arith.mulf %211, %214 : vector<2x8x64xf32>
    %216 = arith.addf %210, %215 : vector<2x8x64xf32>
    %c0_114 = arith.constant 0 : index
    %c1_115 = arith.constant 1 : index
    %c0_116 = arith.constant 0 : index
    %217 = vector.load %arg18[%c0_114, %c1_115, %c0_116] : memref<2x11x64xf32, #tpu.memory_space<vmem>>, vector<2x8x64xf32>
    %218 = vector.extract_strided_slice %176 {offsets = [1, 0], sizes = [1, 64], strides = [1, 1]} : vector<4x64xf32> to vector<1x64xf32>
    %219 = vector.shape_cast %218 : vector<1x64xf32> to vector<1x1x64xf32>
    %220 = vector.broadcast %219 : vector<1x1x64xf32> to vector<2x8x64xf32>
    %221 = arith.mulf %217, %220 : vector<2x8x64xf32>
    %222 = arith.addf %216, %221 : vector<2x8x64xf32>
    %c0_117 = arith.constant 0 : index
    %c0_118 = arith.constant 0 : index
    %c0_119 = arith.constant 0 : index
    %223 = vector.load %arg18[%c0_117, %c0_118, %c0_119] : memref<2x11x64xf32, #tpu.memory_space<vmem>>, vector<2x8x64xf32>
    %224 = vector.extract_strided_slice %176 {offsets = [0, 0], sizes = [1, 64], strides = [1, 1]} : vector<4x64xf32> to vector<1x64xf32>
    %225 = vector.shape_cast %224 : vector<1x64xf32> to vector<1x1x64xf32>
    %226 = vector.broadcast %225 : vector<1x1x64xf32> to vector<2x8x64xf32>
    %227 = arith.mulf %223, %226 : vector<2x8x64xf32>
    %228 = arith.addf %222, %227 : vector<2x8x64xf32>
    %229 = vector.shape_cast %178 : vector<1x64xf32> to vector<1x1x64xf32>
    %230 = vector.broadcast %229 : vector<1x1x64xf32> to vector<2x8x64xf32>
    %231 = arith.addf %228, %230 : vector<2x8x64xf32>
    %232 = arith.negf %231 : vector<2x8x64xf32>
    %233 = math.exp %232 : vector<2x8x64xf32>
    %cst_120 = arith.constant 1.000000e+00 : f32
    %234 = vector.broadcast %cst_120 : f32 to vector<2x8x64xf32>
    %235 = arith.addf %234, %233 : vector<2x8x64xf32>
    %236 = arith.divf %234, %235 : vector<2x8x64xf32>
    %237 = arith.mulf %231, %236 : vector<2x8x64xf32>
    %238 = vector.shape_cast %237 : vector<2x8x64xf32> to vector<16x64xf32>
    %239 = arith.truncf %238 : vector<16x64xf32> to vector<16x64xbf16>
    %cst_121 = arith.constant dense<0.000000e+00> : vector<16x1088xf32>
    %240 = tpu.matmul %239, %180, %cst_121 {dimension_numbers = #tpu.dot_dimension_numbers<[1], [0], [0], [1], [0, 0, 1, 1], [], []>} : vector<16x64xbf16>, vector<64x1088xbf16>, vector<16x1088xf32> -> vector<16x1088xf32>
    %241 = vector.extract_strided_slice %240 {offsets = [0, 0], sizes = [16, 512], strides = [1, 1]} : vector<16x1088xf32> to vector<16x512xf32>
    %242 = vector.extract_strided_slice %240 {offsets = [0, 512], sizes = [16, 512], strides = [1, 1]} : vector<16x1088xf32> to vector<16x512xf32>
    %243 = vector.extract_strided_slice %240 {offsets = [0, 1024], sizes = [16, 64], strides = [1, 1]} : vector<16x1088xf32> to vector<16x64xf32>
    %244 = vector.broadcast %182 : vector<1x64xf32> to vector<16x64xf32>
    %245 = arith.addf %243, %244 : vector<16x64xf32>
    %cst_122 = arith.constant 0.000000e+00 : f32
    %246 = vector.broadcast %cst_122 : f32 to vector<16x64xf32>
    %247 = arith.maximumf %245, %246 : vector<16x64xf32>
    %248 = math.absf %245 : vector<16x64xf32>
    %cst_123 = arith.constant 0.000000e+00 : f32
    %249 = vector.broadcast %cst_123 : f32 to vector<16x64xf32>
    %250 = arith.subf %249, %248 : vector<16x64xf32>
    %251 = math.exp %250 : vector<16x64xf32>
    %cst_124 = arith.constant 1.000000e+00 : f32
    %252 = vector.broadcast %cst_124 : f32 to vector<16x64xf32>
    %253 = arith.addf %252, %251 : vector<16x64xf32>
    %254 = math.log %253 : vector<16x64xf32>
    %255 = arith.addf %247, %254 : vector<16x64xf32>
    %256 = arith.truncf %255 : vector<16x64xf32> to vector<16x64xbf16>
    %cst_125 = arith.constant dense<0.000000e+00> : vector<16x512xf32>
    %257 = tpu.matmul %256, %33, %cst_125 {dimension_numbers = #tpu.dot_dimension_numbers<[1], [0], [0], [1], [0, 0, 1, 1], [], []>} : vector<16x64xbf16>, vector<64x512xbf16>, vector<16x512xf32> -> vector<16x512xf32>
    %258 = arith.mulf %255, %238 : vector<16x64xf32>
    %259 = arith.truncf %258 : vector<16x64xf32> to vector<16x64xbf16>
    %cst_126 = arith.constant dense<0.000000e+00> : vector<16x512xf32>
    %260 = tpu.matmul %259, %33, %cst_126 {dimension_numbers = #tpu.dot_dimension_numbers<[1], [0], [0], [1], [0, 0, 1, 1], [], []>} : vector<16x64xbf16>, vector<64x512xbf16>, vector<16x512xf32> -> vector<16x512xf32>
    %261 = vector.broadcast %184 : vector<1x512xf32> to vector<16x512xf32>
    %262 = arith.mulf %257, %261 : vector<16x512xf32>
    %263 = math.exp %262 : vector<16x512xf32>
    %264 = vector.shape_cast %263 : vector<16x512xf32> to vector<2x8x512xf32>
    %265 = arith.mulf %260, %241 : vector<16x512xf32>
    %266 = vector.shape_cast %265 : vector<16x512xf32> to vector<2x8x512xf32>
    %cst_127 = arith.constant 1.000000e+00 : f32
    %267 = vector.broadcast %cst_127 : f32 to vector<2x1x512xf32>
    %268 = vector.extract_strided_slice %264 {offsets = [0, 0, 0], sizes = [2, 7, 512], strides = [1, 1, 1]} : vector<2x8x512xf32> to vector<2x7x512xf32>
    %269 = tpu.concatenate %267, %268 in 1 : vector<2x1x512xf32>, vector<2x7x512xf32> -> vector<2x8x512xf32>
    %cst_128 = arith.constant 0.000000e+00 : f32
    %270 = vector.broadcast %cst_128 : f32 to vector<2x1x512xf32>
    %271 = vector.extract_strided_slice %266 {offsets = [0, 0, 0], sizes = [2, 7, 512], strides = [1, 1, 1]} : vector<2x8x512xf32> to vector<2x7x512xf32>
    %272 = tpu.concatenate %270, %271 in 1 : vector<2x1x512xf32>, vector<2x7x512xf32> -> vector<2x8x512xf32>
    %273 = arith.mulf %264, %272 : vector<2x8x512xf32>
    %274 = arith.addf %273, %266 : vector<2x8x512xf32>
    %275 = arith.mulf %264, %269 : vector<2x8x512xf32>
    %cst_129 = arith.constant 1.000000e+00 : f32
    %276 = vector.broadcast %cst_129 : f32 to vector<2x2x512xf32>
    %277 = vector.extract_strided_slice %275 {offsets = [0, 0, 0], sizes = [2, 6, 512], strides = [1, 1, 1]} : vector<2x8x512xf32> to vector<2x6x512xf32>
    %278 = tpu.concatenate %276, %277 in 1 : vector<2x2x512xf32>, vector<2x6x512xf32> -> vector<2x8x512xf32>
    %cst_130 = arith.constant 0.000000e+00 : f32
    %279 = vector.broadcast %cst_130 : f32 to vector<2x2x512xf32>
    %280 = vector.extract_strided_slice %274 {offsets = [0, 0, 0], sizes = [2, 6, 512], strides = [1, 1, 1]} : vector<2x8x512xf32> to vector<2x6x512xf32>
    %281 = tpu.concatenate %279, %280 in 1 : vector<2x2x512xf32>, vector<2x6x512xf32> -> vector<2x8x512xf32>
    %282 = arith.mulf %275, %281 : vector<2x8x512xf32>
    %283 = arith.addf %282, %274 : vector<2x8x512xf32>
    %284 = arith.mulf %275, %278 : vector<2x8x512xf32>
    %cst_131 = arith.constant 0.000000e+00 : f32
    %285 = vector.broadcast %cst_131 : f32 to vector<2x4x512xf32>
    %286 = vector.extract_strided_slice %283 {offsets = [0, 0, 0], sizes = [2, 4, 512], strides = [1, 1, 1]} : vector<2x8x512xf32> to vector<2x4x512xf32>
    %287 = tpu.concatenate %285, %286 in 1 : vector<2x4x512xf32>, vector<2x4x512xf32> -> vector<2x8x512xf32>
    %288 = arith.mulf %284, %287 : vector<2x8x512xf32>
    %289 = arith.addf %288, %283 : vector<2x8x512xf32>
    %290 = vector.shape_cast %289 : vector<2x8x512xf32> to vector<16x512xf32>
    %291 = arith.mulf %290, %242 : vector<16x512xf32>
    %292 = arith.truncf %291 : vector<16x512xf32> to vector<16x512xbf16>
    %cst_132 = arith.constant dense<0.000000e+00> : vector<16x64xf32>
    %293 = tpu.matmul %292, %34, %cst_132 {dimension_numbers = #tpu.dot_dimension_numbers<[1], [0], [0], [1], [0, 0, 1, 1], [], []>} : vector<16x512xbf16>, vector<512x64xbf16>, vector<16x64xf32> -> vector<16x64xf32>
    %294 = vector.broadcast %186 : vector<1x64xf32> to vector<16x64xf32>
    %295 = arith.mulf %238, %294 : vector<16x64xf32>
    %296 = arith.addf %293, %295 : vector<16x64xf32>
    %297 = arith.negf %205 : vector<16x64xf32>
    %298 = math.exp %297 : vector<16x64xf32>
    %cst_133 = arith.constant 1.000000e+00 : f32
    %299 = vector.broadcast %cst_133 : f32 to vector<16x64xf32>
    %300 = arith.addf %299, %298 : vector<16x64xf32>
    %301 = arith.divf %299, %300 : vector<16x64xf32>
    %302 = arith.mulf %205, %301 : vector<16x64xf32>
    %303 = arith.mulf %296, %302 : vector<16x64xf32>
    %304 = arith.truncf %303 : vector<16x64xf32> to vector<16x64xbf16>
    %cst_134 = arith.constant dense<0.000000e+00> : vector<16x32xf32>
    %305 = tpu.matmul %304, %188, %cst_134 {dimension_numbers = #tpu.dot_dimension_numbers<[1], [0], [0], [1], [0, 0, 1, 1], [], []>} : vector<16x64xbf16>, vector<64x32xbf16>, vector<16x32xf32> -> vector<16x32xf32>
    %306 = arith.addf %170, %305 : vector<16x32xf32>
    %c2_135 = arith.constant 2 : index
    %c0_136 = arith.constant 0 : index
    %c0_137 = arith.constant 0 : index
    %307 = vector.load %arg3[%c2_135, %c0_136, %c0_137] : memref<4x1x32xf32, #tpu.memory_space<vmem>>, vector<1x1x32xf32>
    %308 = vector.shape_cast %307 : vector<1x1x32xf32> to vector<1x32xf32>
    %c2_138 = arith.constant 2 : index
    %c0_139 = arith.constant 0 : index
    %c0_140 = arith.constant 0 : index
    %309 = vector.load %arg4[%c2_138, %c0_139, %c0_140] : memref<4x32x128xbf16, #tpu.memory_space<vmem>>, vector<1x32x128xbf16>
    %310 = vector.shape_cast %309 : vector<1x32x128xbf16> to vector<32x128xbf16>
    %c2_141 = arith.constant 2 : index
    %c0_142 = arith.constant 0 : index
    %c0_143 = arith.constant 0 : index
    %311 = vector.load %arg5[%c2_141, %c0_142, %c0_143] : memref<4x4x64xf32, #tpu.memory_space<vmem>>, vector<1x4x64xf32>
    %312 = vector.shape_cast %311 : vector<1x4x64xf32> to vector<4x64xf32>
    %c2_144 = arith.constant 2 : index
    %c0_145 = arith.constant 0 : index
    %c0_146 = arith.constant 0 : index
    %313 = vector.load %arg6[%c2_144, %c0_145, %c0_146] : memref<4x1x64xf32, #tpu.memory_space<vmem>>, vector<1x1x64xf32>
    %314 = vector.shape_cast %313 : vector<1x1x64xf32> to vector<1x64xf32>
    %c2_147 = arith.constant 2 : index
    %c0_148 = arith.constant 0 : index
    %c0_149 = arith.constant 0 : index
    %315 = vector.load %arg7[%c2_147, %c0_148, %c0_149] : memref<4x64x1088xbf16, #tpu.memory_space<vmem>>, vector<1x64x1088xbf16>
    %316 = vector.shape_cast %315 : vector<1x64x1088xbf16> to vector<64x1088xbf16>
    %c2_150 = arith.constant 2 : index
    %c0_151 = arith.constant 0 : index
    %c0_152 = arith.constant 0 : index
    %317 = vector.load %arg8[%c2_150, %c0_151, %c0_152] : memref<4x1x64xf32, #tpu.memory_space<vmem>>, vector<1x1x64xf32>
    %318 = vector.shape_cast %317 : vector<1x1x64xf32> to vector<1x64xf32>
    %c2_153 = arith.constant 2 : index
    %c0_154 = arith.constant 0 : index
    %c0_155 = arith.constant 0 : index
    %319 = vector.load %arg9[%c2_153, %c0_154, %c0_155] : memref<4x1x512xf32, #tpu.memory_space<vmem>>, vector<1x1x512xf32>
    %320 = vector.shape_cast %319 : vector<1x1x512xf32> to vector<1x512xf32>
    %c2_156 = arith.constant 2 : index
    %c0_157 = arith.constant 0 : index
    %c0_158 = arith.constant 0 : index
    %321 = vector.load %arg10[%c2_156, %c0_157, %c0_158] : memref<4x1x64xf32, #tpu.memory_space<vmem>>, vector<1x1x64xf32>
    %322 = vector.shape_cast %321 : vector<1x1x64xf32> to vector<1x64xf32>
    %c2_159 = arith.constant 2 : index
    %c0_160 = arith.constant 0 : index
    %c0_161 = arith.constant 0 : index
    %323 = vector.load %arg11[%c2_159, %c0_160, %c0_161] : memref<4x64x32xbf16, #tpu.memory_space<vmem>>, vector<1x64x32xbf16>
    %324 = vector.shape_cast %323 : vector<1x64x32xbf16> to vector<64x32xbf16>
    %325 = arith.mulf %306, %306 : vector<16x32xf32>
    %cst_162 = arith.constant dense<0.000000e+00> : vector<16xf32>
    %326 = vector.multi_reduction <add>, %325, %cst_162 [1] : vector<16x32xf32> to vector<16xf32>
    %327 = vector.shape_cast %326 : vector<16xf32> to vector<16x1xf32>
    %cst_163 = arith.constant 3.200000e+01 : f32
    %328 = vector.broadcast %cst_163 : f32 to vector<16x1xf32>
    %329 = arith.divf %327, %328 : vector<16x1xf32>
    %cst_164 = arith.constant 9.99999974E-6 : f32
    %330 = vector.broadcast %cst_164 : f32 to vector<16x1xf32>
    %331 = arith.addf %329, %330 : vector<16x1xf32>
    %332 = math.rsqrt %331 : vector<16x1xf32>
    %333 = vector.broadcast %332 : vector<16x1xf32> to vector<16x32xf32>
    %334 = arith.mulf %306, %333 : vector<16x32xf32>
    %335 = vector.broadcast %308 : vector<1x32xf32> to vector<16x32xf32>
    %336 = arith.mulf %334, %335 : vector<16x32xf32>
    %337 = arith.truncf %336 : vector<16x32xf32> to vector<16x32xbf16>
    %cst_165 = arith.constant dense<0.000000e+00> : vector<16x128xf32>
    %338 = tpu.matmul %337, %310, %cst_165 {dimension_numbers = #tpu.dot_dimension_numbers<[1], [0], [0], [1], [0, 0, 1, 1], [], []>} : vector<16x32xbf16>, vector<32x128xbf16>, vector<16x128xf32> -> vector<16x128xf32>
    %339 = vector.extract_strided_slice %338 {offsets = [0, 0], sizes = [16, 64], strides = [1, 1]} : vector<16x128xf32> to vector<16x64xf32>
    %340 = vector.shape_cast %339 : vector<16x64xf32> to vector<2x8x64xf32>
    %341 = vector.extract_strided_slice %338 {offsets = [0, 64], sizes = [16, 64], strides = [1, 1]} : vector<16x128xf32> to vector<16x64xf32>
    %c0_166 = arith.constant 0 : index
    %c3_167 = arith.constant 3 : index
    %c0_168 = arith.constant 0 : index
    %342 = vector.load %arg18[%c0_166, %c3_167, %c0_168] : memref<2x11x64xf32, #tpu.memory_space<vmem>>, vector<2x8x64xf32>
    tpu.vector_store %arg18[%c0_166, %c3_167, %c0_168], %340 {strides = array<i32>} : memref<2x11x64xf32, #tpu.memory_space<vmem>>, vector<2x8x64xf32>,
    %343 = vector.extract_strided_slice %312 {offsets = [3, 0], sizes = [1, 64], strides = [1, 1]} : vector<4x64xf32> to vector<1x64xf32>
    %344 = vector.shape_cast %343 : vector<1x64xf32> to vector<1x1x64xf32>
    %345 = vector.broadcast %344 : vector<1x1x64xf32> to vector<2x8x64xf32>
    %346 = arith.mulf %340, %345 : vector<2x8x64xf32>
    %c0_169 = arith.constant 0 : index
    %c2_170 = arith.constant 2 : index
    %c0_171 = arith.constant 0 : index
    %347 = vector.load %arg18[%c0_169, %c2_170, %c0_171] : memref<2x11x64xf32, #tpu.memory_space<vmem>>, vector<2x8x64xf32>
    %348 = vector.extract_strided_slice %312 {offsets = [2, 0], sizes = [1, 64], strides = [1, 1]} : vector<4x64xf32> to vector<1x64xf32>
    %349 = vector.shape_cast %348 : vector<1x64xf32> to vector<1x1x64xf32>
    %350 = vector.broadcast %349 : vector<1x1x64xf32> to vector<2x8x64xf32>
    %351 = arith.mulf %347, %350 : vector<2x8x64xf32>
    %352 = arith.addf %346, %351 : vector<2x8x64xf32>
    %c0_172 = arith.constant 0 : index
    %c1_173 = arith.constant 1 : index
    %c0_174 = arith.constant 0 : index
    %353 = vector.load %arg18[%c0_172, %c1_173, %c0_174] : memref<2x11x64xf32, #tpu.memory_space<vmem>>, vector<2x8x64xf32>
    %354 = vector.extract_strided_slice %312 {offsets = [1, 0], sizes = [1, 64], strides = [1, 1]} : vector<4x64xf32> to vector<1x64xf32>
    %355 = vector.shape_cast %354 : vector<1x64xf32> to vector<1x1x64xf32>
    %356 = vector.broadcast %355 : vector<1x1x64xf32> to vector<2x8x64xf32>
    %357 = arith.mulf %353, %356 : vector<2x8x64xf32>
    %358 = arith.addf %352, %357 : vector<2x8x64xf32>
    %c0_175 = arith.constant 0 : index
    %c0_176 = arith.constant 0 : index
    %c0_177 = arith.constant 0 : index
    %359 = vector.load %arg18[%c0_175, %c0_176, %c0_177] : memref<2x11x64xf32, #tpu.memory_space<vmem>>, vector<2x8x64xf32>
    %360 = vector.extract_strided_slice %312 {offsets = [0, 0], sizes = [1, 64], strides = [1, 1]} : vector<4x64xf32> to vector<1x64xf32>
    %361 = vector.shape_cast %360 : vector<1x64xf32> to vector<1x1x64xf32>
    %362 = vector.broadcast %361 : vector<1x1x64xf32> to vector<2x8x64xf32>
    %363 = arith.mulf %359, %362 : vector<2x8x64xf32>
    %364 = arith.addf %358, %363 : vector<2x8x64xf32>
    %365 = vector.shape_cast %314 : vector<1x64xf32> to vector<1x1x64xf32>
    %366 = vector.broadcast %365 : vector<1x1x64xf32> to vector<2x8x64xf32>
    %367 = arith.addf %364, %366 : vector<2x8x64xf32>
    %368 = arith.negf %367 : vector<2x8x64xf32>
    %369 = math.exp %368 : vector<2x8x64xf32>
    %cst_178 = arith.constant 1.000000e+00 : f32
    %370 = vector.broadcast %cst_178 : f32 to vector<2x8x64xf32>
    %371 = arith.addf %370, %369 : vector<2x8x64xf32>
    %372 = arith.divf %370, %371 : vector<2x8x64xf32>
    %373 = arith.mulf %367, %372 : vector<2x8x64xf32>
    %374 = vector.shape_cast %373 : vector<2x8x64xf32> to vector<16x64xf32>
    %375 = arith.truncf %374 : vector<16x64xf32> to vector<16x64xbf16>
    %cst_179 = arith.constant dense<0.000000e+00> : vector<16x1088xf32>
    %376 = tpu.matmul %375, %316, %cst_179 {dimension_numbers = #tpu.dot_dimension_numbers<[1], [0], [0], [1], [0, 0, 1, 1], [], []>} : vector<16x64xbf16>, vector<64x1088xbf16>, vector<16x1088xf32> -> vector<16x1088xf32>
    %377 = vector.extract_strided_slice %376 {offsets = [0, 0], sizes = [16, 512], strides = [1, 1]} : vector<16x1088xf32> to vector<16x512xf32>
    %378 = vector.extract_strided_slice %376 {offsets = [0, 512], sizes = [16, 512], strides = [1, 1]} : vector<16x1088xf32> to vector<16x512xf32>
    %379 = vector.extract_strided_slice %376 {offsets = [0, 1024], sizes = [16, 64], strides = [1, 1]} : vector<16x1088xf32> to vector<16x64xf32>
    %380 = vector.broadcast %318 : vector<1x64xf32> to vector<16x64xf32>
    %381 = arith.addf %379, %380 : vector<16x64xf32>
    %cst_180 = arith.constant 0.000000e+00 : f32
    %382 = vector.broadcast %cst_180 : f32 to vector<16x64xf32>
    %383 = arith.maximumf %381, %382 : vector<16x64xf32>
    %384 = math.absf %381 : vector<16x64xf32>
    %cst_181 = arith.constant 0.000000e+00 : f32
    %385 = vector.broadcast %cst_181 : f32 to vector<16x64xf32>
    %386 = arith.subf %385, %384 : vector<16x64xf32>
    %387 = math.exp %386 : vector<16x64xf32>
    %cst_182 = arith.constant 1.000000e+00 : f32
    %388 = vector.broadcast %cst_182 : f32 to vector<16x64xf32>
    %389 = arith.addf %388, %387 : vector<16x64xf32>
    %390 = math.log %389 : vector<16x64xf32>
    %391 = arith.addf %383, %390 : vector<16x64xf32>
    %392 = arith.truncf %391 : vector<16x64xf32> to vector<16x64xbf16>
    %cst_183 = arith.constant dense<0.000000e+00> : vector<16x512xf32>
    %393 = tpu.matmul %392, %33, %cst_183 {dimension_numbers = #tpu.dot_dimension_numbers<[1], [0], [0], [1], [0, 0, 1, 1], [], []>} : vector<16x64xbf16>, vector<64x512xbf16>, vector<16x512xf32> -> vector<16x512xf32>
    %394 = arith.mulf %391, %374 : vector<16x64xf32>
    %395 = arith.truncf %394 : vector<16x64xf32> to vector<16x64xbf16>
    %cst_184 = arith.constant dense<0.000000e+00> : vector<16x512xf32>
    %396 = tpu.matmul %395, %33, %cst_184 {dimension_numbers = #tpu.dot_dimension_numbers<[1], [0], [0], [1], [0, 0, 1, 1], [], []>} : vector<16x64xbf16>, vector<64x512xbf16>, vector<16x512xf32> -> vector<16x512xf32>
    %397 = vector.broadcast %320 : vector<1x512xf32> to vector<16x512xf32>
    %398 = arith.mulf %393, %397 : vector<16x512xf32>
    %399 = math.exp %398 : vector<16x512xf32>
    %400 = vector.shape_cast %399 : vector<16x512xf32> to vector<2x8x512xf32>
    %401 = arith.mulf %396, %377 : vector<16x512xf32>
    %402 = vector.shape_cast %401 : vector<16x512xf32> to vector<2x8x512xf32>
    %cst_185 = arith.constant 1.000000e+00 : f32
    %403 = vector.broadcast %cst_185 : f32 to vector<2x1x512xf32>
    %404 = vector.extract_strided_slice %400 {offsets = [0, 0, 0], sizes = [2, 7, 512], strides = [1, 1, 1]} : vector<2x8x512xf32> to vector<2x7x512xf32>
    %405 = tpu.concatenate %403, %404 in 1 : vector<2x1x512xf32>, vector<2x7x512xf32> -> vector<2x8x512xf32>
    %cst_186 = arith.constant 0.000000e+00 : f32
    %406 = vector.broadcast %cst_186 : f32 to vector<2x1x512xf32>
    %407 = vector.extract_strided_slice %402 {offsets = [0, 0, 0], sizes = [2, 7, 512], strides = [1, 1, 1]} : vector<2x8x512xf32> to vector<2x7x512xf32>
    %408 = tpu.concatenate %406, %407 in 1 : vector<2x1x512xf32>, vector<2x7x512xf32> -> vector<2x8x512xf32>
    %409 = arith.mulf %400, %408 : vector<2x8x512xf32>
    %410 = arith.addf %409, %402 : vector<2x8x512xf32>
    %411 = arith.mulf %400, %405 : vector<2x8x512xf32>
    %cst_187 = arith.constant 1.000000e+00 : f32
    %412 = vector.broadcast %cst_187 : f32 to vector<2x2x512xf32>
    %413 = vector.extract_strided_slice %411 {offsets = [0, 0, 0], sizes = [2, 6, 512], strides = [1, 1, 1]} : vector<2x8x512xf32> to vector<2x6x512xf32>
    %414 = tpu.concatenate %412, %413 in 1 : vector<2x2x512xf32>, vector<2x6x512xf32> -> vector<2x8x512xf32>
    %cst_188 = arith.constant 0.000000e+00 : f32
    %415 = vector.broadcast %cst_188 : f32 to vector<2x2x512xf32>
    %416 = vector.extract_strided_slice %410 {offsets = [0, 0, 0], sizes = [2, 6, 512], strides = [1, 1, 1]} : vector<2x8x512xf32> to vector<2x6x512xf32>
    %417 = tpu.concatenate %415, %416 in 1 : vector<2x2x512xf32>, vector<2x6x512xf32> -> vector<2x8x512xf32>
    %418 = arith.mulf %411, %417 : vector<2x8x512xf32>
    %419 = arith.addf %418, %410 : vector<2x8x512xf32>
    %420 = arith.mulf %411, %414 : vector<2x8x512xf32>
    %cst_189 = arith.constant 0.000000e+00 : f32
    %421 = vector.broadcast %cst_189 : f32 to vector<2x4x512xf32>
    %422 = vector.extract_strided_slice %419 {offsets = [0, 0, 0], sizes = [2, 4, 512], strides = [1, 1, 1]} : vector<2x8x512xf32> to vector<2x4x512xf32>
    %423 = tpu.concatenate %421, %422 in 1 : vector<2x4x512xf32>, vector<2x4x512xf32> -> vector<2x8x512xf32>
    %424 = arith.mulf %420, %423 : vector<2x8x512xf32>
    %425 = arith.addf %424, %419 : vector<2x8x512xf32>
    %426 = vector.shape_cast %425 : vector<2x8x512xf32> to vector<16x512xf32>
    %427 = arith.mulf %426, %378 : vector<16x512xf32>
    %428 = arith.truncf %427 : vector<16x512xf32> to vector<16x512xbf16>
    %cst_190 = arith.constant dense<0.000000e+00> : vector<16x64xf32>
    %429 = tpu.matmul %428, %34, %cst_190 {dimension_numbers = #tpu.dot_dimension_numbers<[1], [0], [0], [1], [0, 0, 1, 1], [], []>} : vector<16x512xbf16>, vector<512x64xbf16>, vector<16x64xf32> -> vector<16x64xf32>
    %430 = vector.broadcast %322 : vector<1x64xf32> to vector<16x64xf32>
    %431 = arith.mulf %374, %430 : vector<16x64xf32>
    %432 = arith.addf %429, %431 : vector<16x64xf32>
    %433 = arith.negf %341 : vector<16x64xf32>
    %434 = math.exp %433 : vector<16x64xf32>
    %cst_191 = arith.constant 1.000000e+00 : f32
    %435 = vector.broadcast %cst_191 : f32 to vector<16x64xf32>
    %436 = arith.addf %435, %434 : vector<16x64xf32>
    %437 = arith.divf %435, %436 : vector<16x64xf32>
    %438 = arith.mulf %341, %437 : vector<16x64xf32>
    %439 = arith.mulf %432, %438 : vector<16x64xf32>
    %440 = arith.truncf %439 : vector<16x64xf32> to vector<16x64xbf16>
    %cst_192 = arith.constant dense<0.000000e+00> : vector<16x32xf32>
    %441 = tpu.matmul %440, %324, %cst_192 {dimension_numbers = #tpu.dot_dimension_numbers<[1], [0], [0], [1], [0, 0, 1, 1], [], []>} : vector<16x64xbf16>, vector<64x32xbf16>, vector<16x32xf32> -> vector<16x32xf32>
    %442 = arith.addf %306, %441 : vector<16x32xf32>
    %c3_193 = arith.constant 3 : index
    %c0_194 = arith.constant 0 : index
    %c0_195 = arith.constant 0 : index
    %443 = vector.load %arg3[%c3_193, %c0_194, %c0_195] : memref<4x1x32xf32, #tpu.memory_space<vmem>>, vector<1x1x32xf32>
    %444 = vector.shape_cast %443 : vector<1x1x32xf32> to vector<1x32xf32>
    %c3_196 = arith.constant 3 : index
    %c0_197 = arith.constant 0 : index
    %c0_198 = arith.constant 0 : index
    %445 = vector.load %arg4[%c3_196, %c0_197, %c0_198] : memref<4x32x128xbf16, #tpu.memory_space<vmem>>, vector<1x32x128xbf16>
    %446 = vector.shape_cast %445 : vector<1x32x128xbf16> to vector<32x128xbf16>
    %c3_199 = arith.constant 3 : index
    %c0_200 = arith.constant 0 : index
    %c0_201 = arith.constant 0 : index
    %447 = vector.load %arg5[%c3_199, %c0_200, %c0_201] : memref<4x4x64xf32, #tpu.memory_space<vmem>>, vector<1x4x64xf32>
    %448 = vector.shape_cast %447 : vector<1x4x64xf32> to vector<4x64xf32>
    %c3_202 = arith.constant 3 : index
    %c0_203 = arith.constant 0 : index
    %c0_204 = arith.constant 0 : index
    %449 = vector.load %arg6[%c3_202, %c0_203, %c0_204] : memref<4x1x64xf32, #tpu.memory_space<vmem>>, vector<1x1x64xf32>
    %450 = vector.shape_cast %449 : vector<1x1x64xf32> to vector<1x64xf32>
    %c3_205 = arith.constant 3 : index
    %c0_206 = arith.constant 0 : index
    %c0_207 = arith.constant 0 : index
    %451 = vector.load %arg7[%c3_205, %c0_206, %c0_207] : memref<4x64x1088xbf16, #tpu.memory_space<vmem>>, vector<1x64x1088xbf16>
    %452 = vector.shape_cast %451 : vector<1x64x1088xbf16> to vector<64x1088xbf16>
    %c3_208 = arith.constant 3 : index
    %c0_209 = arith.constant 0 : index
    %c0_210 = arith.constant 0 : index
    %453 = vector.load %arg8[%c3_208, %c0_209, %c0_210] : memref<4x1x64xf32, #tpu.memory_space<vmem>>, vector<1x1x64xf32>
    %454 = vector.shape_cast %453 : vector<1x1x64xf32> to vector<1x64xf32>
    %c3_211 = arith.constant 3 : index
    %c0_212 = arith.constant 0 : index
    %c0_213 = arith.constant 0 : index
    %455 = vector.load %arg9[%c3_211, %c0_212, %c0_213] : memref<4x1x512xf32, #tpu.memory_space<vmem>>, vector<1x1x512xf32>
    %456 = vector.shape_cast %455 : vector<1x1x512xf32> to vector<1x512xf32>
    %c3_214 = arith.constant 3 : index
    %c0_215 = arith.constant 0 : index
    %c0_216 = arith.constant 0 : index
    %457 = vector.load %arg10[%c3_214, %c0_215, %c0_216] : memref<4x1x64xf32, #tpu.memory_space<vmem>>, vector<1x1x64xf32>
    %458 = vector.shape_cast %457 : vector<1x1x64xf32> to vector<1x64xf32>
    %c3_217 = arith.constant 3 : index
    %c0_218 = arith.constant 0 : index
    %c0_219 = arith.constant 0 : index
    %459 = vector.load %arg11[%c3_217, %c0_218, %c0_219] : memref<4x64x32xbf16, #tpu.memory_space<vmem>>, vector<1x64x32xbf16>
    %460 = vector.shape_cast %459 : vector<1x64x32xbf16> to vector<64x32xbf16>
    %461 = arith.mulf %442, %442 : vector<16x32xf32>
    %cst_220 = arith.constant dense<0.000000e+00> : vector<16xf32>
    %462 = vector.multi_reduction <add>, %461, %cst_220 [1] : vector<16x32xf32> to vector<16xf32>
    %463 = vector.shape_cast %462 : vector<16xf32> to vector<16x1xf32>
    %cst_221 = arith.constant 3.200000e+01 : f32
    %464 = vector.broadcast %cst_221 : f32 to vector<16x1xf32>
    %465 = arith.divf %463, %464 : vector<16x1xf32>
    %cst_222 = arith.constant 9.99999974E-6 : f32
    %466 = vector.broadcast %cst_222 : f32 to vector<16x1xf32>
    %467 = arith.addf %465, %466 : vector<16x1xf32>
    %468 = math.rsqrt %467 : vector<16x1xf32>
    %469 = vector.broadcast %468 : vector<16x1xf32> to vector<16x32xf32>
    %470 = arith.mulf %442, %469 : vector<16x32xf32>
    %471 = vector.broadcast %444 : vector<1x32xf32> to vector<16x32xf32>
    %472 = arith.mulf %470, %471 : vector<16x32xf32>
    %473 = arith.truncf %472 : vector<16x32xf32> to vector<16x32xbf16>
    %cst_223 = arith.constant dense<0.000000e+00> : vector<16x128xf32>
    %474 = tpu.matmul %473, %446, %cst_223 {dimension_numbers = #tpu.dot_dimension_numbers<[1], [0], [0], [1], [0, 0, 1, 1], [], []>} : vector<16x32xbf16>, vector<32x128xbf16>, vector<16x128xf32> -> vector<16x128xf32>
    %475 = vector.extract_strided_slice %474 {offsets = [0, 0], sizes = [16, 64], strides = [1, 1]} : vector<16x128xf32> to vector<16x64xf32>
    %476 = vector.shape_cast %475 : vector<16x64xf32> to vector<2x8x64xf32>
    %477 = vector.extract_strided_slice %474 {offsets = [0, 64], sizes = [16, 64], strides = [1, 1]} : vector<16x128xf32> to vector<16x64xf32>
    %c0_224 = arith.constant 0 : index
    %c3_225 = arith.constant 3 : index
    %c0_226 = arith.constant 0 : index
    %478 = vector.load %arg18[%c0_224, %c3_225, %c0_226] : memref<2x11x64xf32, #tpu.memory_space<vmem>>, vector<2x8x64xf32>
    tpu.vector_store %arg18[%c0_224, %c3_225, %c0_226], %476 {strides = array<i32>} : memref<2x11x64xf32, #tpu.memory_space<vmem>>, vector<2x8x64xf32>,
    %479 = vector.extract_strided_slice %448 {offsets = [3, 0], sizes = [1, 64], strides = [1, 1]} : vector<4x64xf32> to vector<1x64xf32>
    %480 = vector.shape_cast %479 : vector<1x64xf32> to vector<1x1x64xf32>
    %481 = vector.broadcast %480 : vector<1x1x64xf32> to vector<2x8x64xf32>
    %482 = arith.mulf %476, %481 : vector<2x8x64xf32>
    %c0_227 = arith.constant 0 : index
    %c2_228 = arith.constant 2 : index
    %c0_229 = arith.constant 0 : index
    %483 = vector.load %arg18[%c0_227, %c2_228, %c0_229] : memref<2x11x64xf32, #tpu.memory_space<vmem>>, vector<2x8x64xf32>
    %484 = vector.extract_strided_slice %448 {offsets = [2, 0], sizes = [1, 64], strides = [1, 1]} : vector<4x64xf32> to vector<1x64xf32>
    %485 = vector.shape_cast %484 : vector<1x64xf32> to vector<1x1x64xf32>
    %486 = vector.broadcast %485 : vector<1x1x64xf32> to vector<2x8x64xf32>
    %487 = arith.mulf %483, %486 : vector<2x8x64xf32>
    %488 = arith.addf %482, %487 : vector<2x8x64xf32>
    %c0_230 = arith.constant 0 : index
    %c1_231 = arith.constant 1 : index
    %c0_232 = arith.constant 0 : index
    %489 = vector.load %arg18[%c0_230, %c1_231, %c0_232] : memref<2x11x64xf32, #tpu.memory_space<vmem>>, vector<2x8x64xf32>
    %490 = vector.extract_strided_slice %448 {offsets = [1, 0], sizes = [1, 64], strides = [1, 1]} : vector<4x64xf32> to vector<1x64xf32>
    %491 = vector.shape_cast %490 : vector<1x64xf32> to vector<1x1x64xf32>
    %492 = vector.broadcast %491 : vector<1x1x64xf32> to vector<2x8x64xf32>
    %493 = arith.mulf %489, %492 : vector<2x8x64xf32>
    %494 = arith.addf %488, %493 : vector<2x8x64xf32>
    %c0_233 = arith.constant 0 : index
    %c0_234 = arith.constant 0 : index
    %c0_235 = arith.constant 0 : index
    %495 = vector.load %arg18[%c0_233, %c0_234, %c0_235] : memref<2x11x64xf32, #tpu.memory_space<vmem>>, vector<2x8x64xf32>
    %496 = vector.extract_strided_slice %448 {offsets = [0, 0], sizes = [1, 64], strides = [1, 1]} : vector<4x64xf32> to vector<1x64xf32>
    %497 = vector.shape_cast %496 : vector<1x64xf32> to vector<1x1x64xf32>
    %498 = vector.broadcast %497 : vector<1x1x64xf32> to vector<2x8x64xf32>
    %499 = arith.mulf %495, %498 : vector<2x8x64xf32>
    %500 = arith.addf %494, %499 : vector<2x8x64xf32>
    %501 = vector.shape_cast %450 : vector<1x64xf32> to vector<1x1x64xf32>
    %502 = vector.broadcast %501 : vector<1x1x64xf32> to vector<2x8x64xf32>
    %503 = arith.addf %500, %502 : vector<2x8x64xf32>
    %504 = arith.negf %503 : vector<2x8x64xf32>
    %505 = math.exp %504 : vector<2x8x64xf32>
    %cst_236 = arith.constant 1.000000e+00 : f32
    %506 = vector.broadcast %cst_236 : f32 to vector<2x8x64xf32>
    %507 = arith.addf %506, %505 : vector<2x8x64xf32>
    %508 = arith.divf %506, %507 : vector<2x8x64xf32>
    %509 = arith.mulf %503, %508 : vector<2x8x64xf32>
    %510 = vector.shape_cast %509 : vector<2x8x64xf32> to vector<16x64xf32>
    %511 = arith.truncf %510 : vector<16x64xf32> to vector<16x64xbf16>
    %cst_237 = arith.constant dense<0.000000e+00> : vector<16x1088xf32>
    %512 = tpu.matmul %511, %452, %cst_237 {dimension_numbers = #tpu.dot_dimension_numbers<[1], [0], [0], [1], [0, 0, 1, 1], [], []>} : vector<16x64xbf16>, vector<64x1088xbf16>, vector<16x1088xf32> -> vector<16x1088xf32>
    %513 = vector.extract_strided_slice %512 {offsets = [0, 0], sizes = [16, 512], strides = [1, 1]} : vector<16x1088xf32> to vector<16x512xf32>
    %514 = vector.extract_strided_slice %512 {offsets = [0, 512], sizes = [16, 512], strides = [1, 1]} : vector<16x1088xf32> to vector<16x512xf32>
    %515 = vector.extract_strided_slice %512 {offsets = [0, 1024], sizes = [16, 64], strides = [1, 1]} : vector<16x1088xf32> to vector<16x64xf32>
    %516 = vector.broadcast %454 : vector<1x64xf32> to vector<16x64xf32>
    %517 = arith.addf %515, %516 : vector<16x64xf32>
    %cst_238 = arith.constant 0.000000e+00 : f32
    %518 = vector.broadcast %cst_238 : f32 to vector<16x64xf32>
    %519 = arith.maximumf %517, %518 : vector<16x64xf32>
    %520 = math.absf %517 : vector<16x64xf32>
    %cst_239 = arith.constant 0.000000e+00 : f32
    %521 = vector.broadcast %cst_239 : f32 to vector<16x64xf32>
    %522 = arith.subf %521, %520 : vector<16x64xf32>
    %523 = math.exp %522 : vector<16x64xf32>
    %cst_240 = arith.constant 1.000000e+00 : f32
    %524 = vector.broadcast %cst_240 : f32 to vector<16x64xf32>
    %525 = arith.addf %524, %523 : vector<16x64xf32>
    %526 = math.log %525 : vector<16x64xf32>
    %527 = arith.addf %519, %526 : vector<16x64xf32>
    %528 = arith.truncf %527 : vector<16x64xf32> to vector<16x64xbf16>
    %cst_241 = arith.constant dense<0.000000e+00> : vector<16x512xf32>
    %529 = tpu.matmul %528, %33, %cst_241 {dimension_numbers = #tpu.dot_dimension_numbers<[1], [0], [0], [1], [0, 0, 1, 1], [], []>} : vector<16x64xbf16>, vector<64x512xbf16>, vector<16x512xf32> -> vector<16x512xf32>
    %530 = arith.mulf %527, %510 : vector<16x64xf32>
    %531 = arith.truncf %530 : vector<16x64xf32> to vector<16x64xbf16>
    %cst_242 = arith.constant dense<0.000000e+00> : vector<16x512xf32>
    %532 = tpu.matmul %531, %33, %cst_242 {dimension_numbers = #tpu.dot_dimension_numbers<[1], [0], [0], [1], [0, 0, 1, 1], [], []>} : vector<16x64xbf16>, vector<64x512xbf16>, vector<16x512xf32> -> vector<16x512xf32>
    %533 = vector.broadcast %456 : vector<1x512xf32> to vector<16x512xf32>
    %534 = arith.mulf %529, %533 : vector<16x512xf32>
    %535 = math.exp %534 : vector<16x512xf32>
    %536 = vector.shape_cast %535 : vector<16x512xf32> to vector<2x8x512xf32>
    %537 = arith.mulf %532, %513 : vector<16x512xf32>
    %538 = vector.shape_cast %537 : vector<16x512xf32> to vector<2x8x512xf32>
    %cst_243 = arith.constant 1.000000e+00 : f32
    %539 = vector.broadcast %cst_243 : f32 to vector<2x1x512xf32>
    %540 = vector.extract_strided_slice %536 {offsets = [0, 0, 0], sizes = [2, 7, 512], strides = [1, 1, 1]} : vector<2x8x512xf32> to vector<2x7x512xf32>
    %541 = tpu.concatenate %539, %540 in 1 : vector<2x1x512xf32>, vector<2x7x512xf32> -> vector<2x8x512xf32>
    %cst_244 = arith.constant 0.000000e+00 : f32
    %542 = vector.broadcast %cst_244 : f32 to vector<2x1x512xf32>
    %543 = vector.extract_strided_slice %538 {offsets = [0, 0, 0], sizes = [2, 7, 512], strides = [1, 1, 1]} : vector<2x8x512xf32> to vector<2x7x512xf32>
    %544 = tpu.concatenate %542, %543 in 1 : vector<2x1x512xf32>, vector<2x7x512xf32> -> vector<2x8x512xf32>
    %545 = arith.mulf %536, %544 : vector<2x8x512xf32>
    %546 = arith.addf %545, %538 : vector<2x8x512xf32>
    %547 = arith.mulf %536, %541 : vector<2x8x512xf32>
    %cst_245 = arith.constant 1.000000e+00 : f32
    %548 = vector.broadcast %cst_245 : f32 to vector<2x2x512xf32>
    %549 = vector.extract_strided_slice %547 {offsets = [0, 0, 0], sizes = [2, 6, 512], strides = [1, 1, 1]} : vector<2x8x512xf32> to vector<2x6x512xf32>
    %550 = tpu.concatenate %548, %549 in 1 : vector<2x2x512xf32>, vector<2x6x512xf32> -> vector<2x8x512xf32>
    %cst_246 = arith.constant 0.000000e+00 : f32
    %551 = vector.broadcast %cst_246 : f32 to vector<2x2x512xf32>
    %552 = vector.extract_strided_slice %546 {offsets = [0, 0, 0], sizes = [2, 6, 512], strides = [1, 1, 1]} : vector<2x8x512xf32> to vector<2x6x512xf32>
    %553 = tpu.concatenate %551, %552 in 1 : vector<2x2x512xf32>, vector<2x6x512xf32> -> vector<2x8x512xf32>
    %554 = arith.mulf %547, %553 : vector<2x8x512xf32>
    %555 = arith.addf %554, %546 : vector<2x8x512xf32>
    %556 = arith.mulf %547, %550 : vector<2x8x512xf32>
    %cst_247 = arith.constant 0.000000e+00 : f32
    %557 = vector.broadcast %cst_247 : f32 to vector<2x4x512xf32>
    %558 = vector.extract_strided_slice %555 {offsets = [0, 0, 0], sizes = [2, 4, 512], strides = [1, 1, 1]} : vector<2x8x512xf32> to vector<2x4x512xf32>
    %559 = tpu.concatenate %557, %558 in 1 : vector<2x4x512xf32>, vector<2x4x512xf32> -> vector<2x8x512xf32>
    %560 = arith.mulf %556, %559 : vector<2x8x512xf32>
    %561 = arith.addf %560, %555 : vector<2x8x512xf32>
    %562 = vector.shape_cast %561 : vector<2x8x512xf32> to vector<16x512xf32>
    %563 = arith.mulf %562, %514 : vector<16x512xf32>
    %564 = arith.truncf %563 : vector<16x512xf32> to vector<16x512xbf16>
    %cst_248 = arith.constant dense<0.000000e+00> : vector<16x64xf32>
    %565 = tpu.matmul %564, %34, %cst_248 {dimension_numbers = #tpu.dot_dimension_numbers<[1], [0], [0], [1], [0, 0, 1, 1], [], []>} : vector<16x512xbf16>, vector<512x64xbf16>, vector<16x64xf32> -> vector<16x64xf32>
    %566 = vector.broadcast %458 : vector<1x64xf32> to vector<16x64xf32>
    %567 = arith.mulf %510, %566 : vector<16x64xf32>
    %568 = arith.addf %565, %567 : vector<16x64xf32>
    %569 = arith.negf %477 : vector<16x64xf32>
    %570 = math.exp %569 : vector<16x64xf32>
    %cst_249 = arith.constant 1.000000e+00 : f32
    %571 = vector.broadcast %cst_249 : f32 to vector<16x64xf32>
    %572 = arith.addf %571, %570 : vector<16x64xf32>
    %573 = arith.divf %571, %572 : vector<16x64xf32>
    %574 = arith.mulf %477, %573 : vector<16x64xf32>
    %575 = arith.mulf %568, %574 : vector<16x64xf32>
    %576 = arith.truncf %575 : vector<16x64xf32> to vector<16x64xbf16>
    %cst_250 = arith.constant dense<0.000000e+00> : vector<16x32xf32>
    %577 = tpu.matmul %576, %460, %cst_250 {dimension_numbers = #tpu.dot_dimension_numbers<[1], [0], [0], [1], [0, 0, 1, 1], [], []>} : vector<16x64xbf16>, vector<64x32xbf16>, vector<16x32xf32> -> vector<16x32xf32>
    %578 = arith.addf %442, %577 : vector<16x32xf32>
    %c0_251 = arith.constant 0 : index
    %c0_252 = arith.constant 0 : index
    %579 = vector.load %arg14[%c0_251, %c0_252] : memref<1x32xf32, #tpu.memory_space<vmem>>, vector<1x32xf32>
    %580 = arith.mulf %578, %578 : vector<16x32xf32>
    %cst_253 = arith.constant dense<0.000000e+00> : vector<16xf32>
    %581 = vector.multi_reduction <add>, %580, %cst_253 [1] : vector<16x32xf32> to vector<16xf32>
    %582 = vector.shape_cast %581 : vector<16xf32> to vector<16x1xf32>
    %cst_254 = arith.constant 3.200000e+01 : f32
    %583 = vector.broadcast %cst_254 : f32 to vector<16x1xf32>
    %584 = arith.divf %582, %583 : vector<16x1xf32>
    %cst_255 = arith.constant 9.99999974E-6 : f32
    %585 = vector.broadcast %cst_255 : f32 to vector<16x1xf32>
    %586 = arith.addf %584, %585 : vector<16x1xf32>
    %587 = math.rsqrt %586 : vector<16x1xf32>
    %588 = vector.broadcast %587 : vector<16x1xf32> to vector<16x32xf32>
    %589 = arith.mulf %578, %588 : vector<16x32xf32>
    %590 = vector.broadcast %579 : vector<1x32xf32> to vector<16x32xf32>
    %591 = arith.mulf %589, %590 : vector<16x32xf32>
    %592 = arith.truncf %591 : vector<16x32xf32> to vector<16x32xbf16>
    %c0_256 = arith.constant 0 : index
    %c0_257 = arith.constant 0 : index
    %593 = vector.load %arg15[%c0_256, %c0_257] : memref<32x128xbf16, #tpu.memory_space<vmem>>, vector<32x128xbf16>
    %cst_258 = arith.constant dense<0.000000e+00> : vector<16x128xf32>
    %594 = tpu.matmul %592, %593, %cst_258 {dimension_numbers = #tpu.dot_dimension_numbers<[1], [0], [0], [1], [0, 0, 1, 1], [], []>} : vector<16x32xbf16>, vector<32x128xbf16>, vector<16x128xf32> -> vector<16x128xf32>
    %c0_259 = arith.constant 0 : index
    %c0_260 = arith.constant 0 : index
    %595 = vector.load %arg16[%c0_259, %c0_260] : memref<1x128xf32, #tpu.memory_space<vmem>>, vector<1x128xf32>
    %596 = vector.broadcast %595 : vector<1x128xf32> to vector<16x128xf32>
    %597 = arith.addf %594, %596 : vector<16x128xf32>
    %598 = vector.shape_cast %597 : vector<16x128xf32> to vector<2x8x128xf32>
    %c0_261 = arith.constant 0 : index
    %c0_262 = arith.constant 0 : index
    %c0_263 = arith.constant 0 : index
    %599 = vector.load %arg17[%c0_261, %c0_262, %c0_263] : memref<2x8x128xf32, #tpu.memory_space<vmem>>, vector<2x8x128xf32>
    tpu.vector_store %arg17[%c0_261, %c0_262, %c0_263], %598 {strides = array<i32>} : memref<2x8x128xf32, #tpu.memory_space<vmem>>, vector<2x8x128xf32>,
    return
  }
  func.func @transform_0(%arg0: i32) -> (i32, i32, i32) {
    %c0_i32 = arith.constant 0 : i32
    %c0_i32_0 = arith.constant 0 : i32
    %c0_i32_1 = arith.constant 0 : i32
    return %arg0, %c0_i32, %c0_i32_0 : i32, i32, i32
  }
  func.func @transform_1(%arg0: i32) -> (i32, i32, i32) {
    %c0_i32 = arith.constant 0 : i32
    %c0_i32_0 = arith.constant 0 : i32
    %c0_i32_1 = arith.constant 0 : i32
    %c0_i32_2 = arith.constant 0 : i32
    return %c0_i32, %c0_i32_0, %c0_i32_1 : i32, i32, i32
  }
  func.func @transform_2(%arg0: i32) -> (i32, i32, i32) {
    %c0_i32 = arith.constant 0 : i32
    %c0_i32_0 = arith.constant 0 : i32
    %c0_i32_1 = arith.constant 0 : i32
    %c0_i32_2 = arith.constant 0 : i32
    return %c0_i32, %c0_i32_0, %c0_i32_1 : i32, i32, i32
  }
  func.func @transform_3(%arg0: i32) -> (i32, i32, i32) {
    %c0_i32 = arith.constant 0 : i32
    %c0_i32_0 = arith.constant 0 : i32
    %c0_i32_1 = arith.constant 0 : i32
    %c0_i32_2 = arith.constant 0 : i32
    return %c0_i32, %c0_i32_0, %c0_i32_1 : i32, i32, i32
  }
  func.func @transform_4(%arg0: i32) -> (i32, i32, i32) {
    %c0_i32 = arith.constant 0 : i32
    %c0_i32_0 = arith.constant 0 : i32
    %c0_i32_1 = arith.constant 0 : i32
    %c0_i32_2 = arith.constant 0 : i32
    return %c0_i32, %c0_i32_0, %c0_i32_1 : i32, i32, i32
  }
  func.func @transform_5(%arg0: i32) -> (i32, i32, i32) {
    %c0_i32 = arith.constant 0 : i32
    %c0_i32_0 = arith.constant 0 : i32
    %c0_i32_1 = arith.constant 0 : i32
    %c0_i32_2 = arith.constant 0 : i32
    return %c0_i32, %c0_i32_0, %c0_i32_1 : i32, i32, i32
  }
  func.func @transform_6(%arg0: i32) -> (i32, i32, i32) {
    %c0_i32 = arith.constant 0 : i32
    %c0_i32_0 = arith.constant 0 : i32
    %c0_i32_1 = arith.constant 0 : i32
    %c0_i32_2 = arith.constant 0 : i32
    return %c0_i32, %c0_i32_0, %c0_i32_1 : i32, i32, i32
  }
  func.func @transform_7(%arg0: i32) -> (i32, i32, i32) {
    %c0_i32 = arith.constant 0 : i32
    %c0_i32_0 = arith.constant 0 : i32
    %c0_i32_1 = arith.constant 0 : i32
    %c0_i32_2 = arith.constant 0 : i32
    return %c0_i32, %c0_i32_0, %c0_i32_1 : i32, i32, i32
  }
  func.func @transform_8(%arg0: i32) -> (i32, i32, i32) {
    %c0_i32 = arith.constant 0 : i32
    %c0_i32_0 = arith.constant 0 : i32
    %c0_i32_1 = arith.constant 0 : i32
    %c0_i32_2 = arith.constant 0 : i32
    return %c0_i32, %c0_i32_0, %c0_i32_1 : i32, i32, i32
  }
  func.func @transform_9(%arg0: i32) -> (i32, i32, i32) {
    %c0_i32 = arith.constant 0 : i32
    %c0_i32_0 = arith.constant 0 : i32
    %c0_i32_1 = arith.constant 0 : i32
    %c0_i32_2 = arith.constant 0 : i32
    return %c0_i32, %c0_i32_0, %c0_i32_1 : i32, i32, i32
  }
  func.func @transform_10(%arg0: i32) -> (i32, i32, i32) {
    %c0_i32 = arith.constant 0 : i32
    %c0_i32_0 = arith.constant 0 : i32
    %c0_i32_1 = arith.constant 0 : i32
    %c0_i32_2 = arith.constant 0 : i32
    return %c0_i32, %c0_i32_0, %c0_i32_1 : i32, i32, i32
  }
  func.func @transform_11(%arg0: i32) -> (i32, i32) {
    %c0_i32 = arith.constant 0 : i32
    %c0_i32_0 = arith.constant 0 : i32
    %c0_i32_1 = arith.constant 0 : i32
    return %c0_i32, %c0_i32_0 : i32, i32
  }
  func.func @transform_12(%arg0: i32) -> (i32, i32) {
    %c0_i32 = arith.constant 0 : i32
    %c0_i32_0 = arith.constant 0 : i32
    %c0_i32_1 = arith.constant 0 : i32
    return %c0_i32, %c0_i32_0 : i32, i32
  }
  func.func @transform_13(%arg0: i32) -> (i32, i32) {
    %c0_i32 = arith.constant 0 : i32
    %c0_i32_0 = arith.constant 0 : i32
    %c0_i32_1 = arith.constant 0 : i32
    return %c0_i32, %c0_i32_0 : i32, i32
  }
  func.func @transform_14(%arg0: i32) -> (i32, i32) {
    %c0_i32 = arith.constant 0 : i32
    %c0_i32_0 = arith.constant 0 : i32
    %c0_i32_1 = arith.constant 0 : i32
    return %c0_i32, %c0_i32_0 : i32, i32
  }
  func.func @transform_15(%arg0: i32) -> (i32, i32) {
    %c0_i32 = arith.constant 0 : i32
    %c0_i32_0 = arith.constant 0 : i32
    %c0_i32_1 = arith.constant 0 : i32
    return %c0_i32, %c0_i32_0 : i32, i32
  }
  func.func @transform_16(%arg0: i32) -> (i32, i32, i32) {
    %c0_i32 = arith.constant 0 : i32
    %c0_i32_0 = arith.constant 0 : i32
    %c0_i32_1 = arith.constant 0 : i32
    return %arg0, %c0_i32, %c0_i32_0 : i32, i32, i32
  }
}

</mosaic_0001>

<bundles_post_ra>
// kernel: mamba_sequence_model.1
= control target key start
LH: loop header
LB: loop body
LE: loop exit
PB: predicated region body
PF: predicated region fallthrough
CT: control target
= control target key end

     0   :  { %s9970_s0 = inlined_call_operand.vmem [shape: s32[2,8,3], index: 0, kind: input, shape index: {}]   ;;  %s9971_s1 = inlined_call_operand.vmem [shape: f32[3,56,32], index: 1, kind: input, shape index: {}]   ;;  %s9972_s2 = inlined_call_operand.vmem [shape: f32[4,1,32], index: 2, kind: input, shape index: {}]   ;;  %s9973_s3 = inlined_call_operand.vmem [shape: bf16[4,32,128], index: 3, kind: input, shape index: {}]   ;;  %s9974_s4 = inlined_call_operand.vmem [shape: f32[4,4,64], index: 4, kind: input, shape index: {}]   ;;  %s9975_s5 = inlined_call_operand.vmem [shape: f32[4,1,64], index: 5, kind: input, shape index: {}]   ;;  %s9976_s6 = inlined_call_operand.vmem [shape: bf16[4,64,1088], index: 6, kind: input, shape index: {}]   ;;  %s9977_s7 = inlined_call_operand.vmem [shape: f32[4,1,64], index: 7, kind: input, shape index: {}]   ;;  %s9978_s8 = inlined_call_operand.vmem [shape: f32[4,1,512], index: 8, kind: input, shape index: {}]   ;;  %s9979_s9 = inlined_call_operand.vmem [shape: f32[4,1,64], index: 9, kind: input, shape index: {}]   ;;  %s9980_s10 = inlined_call_operand.vmem [shape: bf16[4,64,32], index: 10, kind: input, shape index: {}]   ;;  %s9981_s11 = inlined_call_operand.vmem [shape: bf16[64,512], index: 11, kind: input, shape index: {}]   ;;  %s9982_s12 = inlined_call_operand.vmem [shape: bf16[512,64], index: 12, kind: input, shape index: {}]   ;;  %s9983_s13 = inlined_call_operand.vmem [shape: f32[1,32], index: 13, kind: input, shape index: {}]   ;;  %s9984_s14 = inlined_call_operand.vmem [shape: bf16[32,128], index: 14, kind: input, shape index: {}]   ;;  %s9985_s15 = inlined_call_operand.vmem [shape: f32[1,128], index: 15, kind: input, shape index: {}]   ;;  %s9986_s16 = inlined_call_operand.hbm [shape: f32[2,8,128], index: 16, kind: output, shape index: {}]  }
   0x1   :  { %9988 = sst [smem:[#allocation6_spill]] %s9970_s0 }
   0x2   :  { %s9989_s23 = sld [smem:[#allocation6_spill]]  ;;  %v5997_v1 = vld [vmem:[%s9971_s1 + $0x38] sm:$0xff]  ;;  %v7626_v2 = vmov 1   ;;  %v7627_v3 = vmov 0   ;;  %v5998_v4 = vld [vmem:[%s9971_s1 + $0x40] sm:$0xff]  ;;  %v5999_v5 = vld [vmem:[%s9971_s1 + $0x48] sm:$0xff] }
   0x3   :  { %6984 = vset.pattern.permute.xlu0 %v7626_v2  ;;  %6985 = vset.pattern.permute.xlu1 %v7627_v3  ;;  %v6000_v6 = vld [vmem:[%s9971_s1 + $0x50] sm:$0xff]  ;;  %v6935_v7 = vpack.c.bf16 %v5998_v4, %v5997_v1  ;;  %v6001_v10 = vld [vmem:[%s9971_s1 + $0x58] sm:$0xff]  ;;  %v7628_v11 = vmov 0.0   ;;  %v6002_v12 = vld [vmem:[%s9971_s1 + $0x60] sm:$0xff]  ;;  %v7629_v17 = vmov 2  }
   0x4   :  { %v6939_v9 = vpack.c.bf16 %v6000_v6, %v5999_v5  ;;  %6799 = vmatprep.subr.bf16.mxu1 %v7628_v11  ;;  %v6943_v13 = vpack.c.bf16 %v6002_v12, %v6001_v10  ;;  %v6003_v14 = vld [vmem:[%s9971_s1 + $0x68] sm:$0xff]  ;;  %v71_v15 = vld [vmem:[%s9971_s1] sm:$0xff] }
   0x5   :  { %6936 = vmatprep.subr.bf16.mxu0 %v6935_v7  ;;  %v72_v16 = vld [vmem:[%s9971_s1 + $0x8] sm:$0xff] }
   0x6   :  { %6938 = vmatpush3.bf16.msra.mxu0 %v6935_v7  ;;  %v6947_v18 = vpack.c.bf16 %v72_v16, %v71_v15 }
   0x7   :  { %6940 = vmatprep.subr.bf16.mxu0 %v6939_v9 }
   0x8   :  { %v55_v0 = vld [vmem:[%s9989_s23] sm:$0xff]  ;;  %v56_v8 = vld [vmem:[%s9989_s23 + $0x8] sm:$0xff] }
   0x9   :  { %79 = vperm.xlu0 %6984, %v55_v0   ;;  %60 = vperm.xlu1 %6985, %v55_v0  }
   0xa   :  { %6942 = vmatpush3.bf16.msra.mxu0 %v6939_v9 }
   0xb   :  { %6944 = vmatprep.subr.bf16.mxu0 %v6943_v13 }
   0xd   :  { %82 = vperm.xlu0 %6984, %v56_v8   ;;  %63 = vperm.xlu1 %6985, %v56_v8  }
   0xe   :  { %6946 = vmatpush3.bf16.msra.mxu0 %v6943_v13 }
   0xf   :  { %6760 = vmatprep.subr.mxu0 %v6003_v14 }
  0x11   :  { %6986 = vset.pattern.permute.xlu0 %v7629_v17  ;;  %6987 = vset.pattern.permute.xlu1 %v7629_v17 }
  0x12   :  { %262 = vperm.xlu0 %6986, %v55_v0   ;;  %265 = vperm.xlu1 %6987, %v56_v8  }
  0x13   :  { %6761 = vmatpush3.msra.mxu0 %v6003_v14 }
  0x14   :  { %6948 = vmatprep.subr.bf16.mxu0 %v6947_v18 }
  0x15   :  { %21 = vsyncpa [#allocation4], 0  ;;  %v57_v19 = vlaneseq  ;;  %vm98_vm0 = vcmask 457728   ;;  %v73_v24 = vld [vmem:[%s9971_s1 + $0x10] sm:$0xff]  ;;  %v74_v25 = vld [vmem:[%s9971_s1 + $0x18] sm:$0xff]  ;;  %vm510_vm7 = vcmask 261120  }
  0x16   :  { %v6951_v28 = vpack.c.bf16 %v74_v25, %v73_v24  ;;  %v75_v30 = vld [vmem:[%s9971_s1 + $0x20] sm:$0xff]  ;;  %v76_v31 = vld [vmem:[%s9971_s1 + $0x28] sm:$0xff]  ;;  %v77_v35 = vld [vmem:[%s9971_s1 + $0x30] sm:$0xff]  ;;  %vm7630_vm8 = vmmov 0   ;;  %vm364_vm9 = vcmask 523264   ;;  %vm366_vm10 = vcmask 518144  }
  0x17   :  { %v58_v20 = vand.u32 127, %v57_v19  ;;  %v6955_v32 = vpack.c.bf16 %v76_v31, %v75_v30  ;;  %v6010_v36 = vld [vmem:[%s9971_s1 + $0x70] sm:$0xff]  ;;  %v6011_v37 = vld [vmem:[%s9971_s1 + $0x78] sm:$0xff]  ;;  %v6012_v38 = vld [vmem:[%s9971_s1 + $0x80] sm:$0xff]  ;;  %6803 = vmatprep.mubr.msk.bf16.mxu1 %vm7630_vm8, %v7628_v11  ;;  %365 = vst.msk [vmem:[#allocation2] sm:$0xff] %vm364_vm9, %v7628_v11  ;;  %s7631_s19 = smov 64  }
  0x18   :  { %v6013_v39 = vld [vmem:[%s9971_s1 + $0x88] sm:$0xff]  ;;  %v6959_v40 = vpack.c.bf16 %v6011_v37, %v6010_v36  ;;  %v6014_v44 = vld [vmem:[%s9971_s1 + $0x90] sm:$0xff]  ;;  %v6015_v45 = vld [vmem:[%s9971_s1 + $0x98] sm:$0xff]  ;;  %367 = vst.msk [vmem:[#allocation2 + $0x8] sm:$0x7] %vm366_vm10, %v7628_v11  ;;  %vm1417_vm11 = vcmask 1040384  }
  0x19   :  { %v6963_v41 = vpack.c.bf16 %v6013_v39, %v6012_v38  ;;  %v6967_v46 = vpack.c.bf16 %v6015_v45, %v6014_v44  ;;  %v6016_v48 = vld [vmem:[%s9971_s1 + $0xa0] sm:$0xff]  ;;  %v6989_v57 = vld [vmem:[%s9973_s3 + $0x8] sm:$0xff]   ;;  %368 = vst.msk [vmem:[#allocation2 + $0x10] sm:$0xff] %vm364_vm9, %v7628_v11  ;;  %v6993_v13 = vld [vmem:[%s9976_s6 + $0x18] ss:$36 sps:$4 sm:$0xff]   ;;  %vm1506_vm12 = vcmask 1041408  }
  0x1a   :  { %v6988_v56 = vld [vmem:[%s9973_s3] sm:$0xff]   ;;  %369 = vst.msk [vmem:[#allocation2 + $0x18] sm:$0x7] %vm366_vm10, %v7628_v11  ;;  %v6998_v14 = vld [vmem:[%s9976_s6 + $0x4c] ss:$36 sps:$4 sm:$0xff]   ;;  %vm1595_vm13 = vcmask 1043456  }
  0x1b   :  { %6800 = vmatpush3.bf16.msra.mxu1 %v6988_v56  ;;  %v6019_v1 = vld [vmem:[%s9972_s2] ss:$0 sm:$0xff]  ;;  %v6992_v9 = vld [vmem:[%s9976_s6 + $0x4] ss:$36 sps:$4 sm:$0xff]   ;;  %v7008_v24 = vld [vmem:[%s9976_s6 + $0xd8] ss:$36 sps:$4 sm:$0xff]  }
  0x1c   :  { %6801 = vmatprep.subr.bf16.mxu1 %v7628_v11  ;;  %v6990_v10 = vld [vmem:[%s9976_s6] ss:$36 sps:$4 sm:$0xff]   ;;  %v6996_v15 = vld [vmem:[%s9976_s6 + $0x48] ss:$36 sps:$4 sm:$0xff]   ;;  %v7013_v25 = vld [vmem:[%s9976_s6 + $0xf4] ss:$36 sps:$4 sm:$0xff]  }
  0x1d   :  { %v6995_v12 = vld [vmem:[%s9976_s6 + $0x1c] ss:$36 sps:$4 sm:$0xff]   ;;  %v7001_v16 = vld [vmem:[%s9976_s6 + $0x64] ss:$36 sps:$4 sm:$0xff]   ;;  %s7632_s18 = smov [#allocation3]  }
  0x1e   :  { %v6999_v17 = vld [vmem:[%s9976_s6 + $0x60] ss:$36 sps:$4 sm:$0xff]   ;;  %s5982_s20 = sshll.u32 %s7632_s18, 4  ;;  %s5983_s20 = int_to_ptr.vmem [resolvable:$true] %s5982_s20 }
  0x1f   :  { %6802 = vmatpush3.bf16.msra.mxu1 %v6989_v57  ;;  %p7607_p1 = scmp.lt.s32.totalorder %s5983_s20, %s5983_s20 }
  0x20   :  { %839 = vmatprep.subr.bf16.mxu1 %v6992_v9 }
  0x88   :  { %v80_v21 = vpop.permute.xlu0 %79  ;;  %v61_v22 = vpop.permute.xlu1 %60 }
  0x89   :  { %vm84_vm1 = vcmp.eq.s32.totalorder %v80_v21, %v58_v20  ;;  %vm65_vm2 = vcmp.eq.s32.totalorder %v61_v22, %v58_v20  ;;  %v7007_v21 = vld [vmem:[%s9976_s6 + $0xac] ss:$36 sps:$4 sm:$0xff]  }
  0x8a   :  { %v5995_v23 = vsel %vm84_vm1, 1.0, %v7628_v11  ;;  %v5993_v27 = vsel %vm65_vm2, 1.0, %v7628_v11  ;;  %v7005_v22 = vld [vmem:[%s9976_s6 + $0xa8] ss:$36 sps:$4 sm:$0xff]  }
  0x8b   :  { %6762 = vmatprep.mubr.msk.f32.mxu0 %vm98_vm0, %v5995_v23  ;;  %v7010_v23 = vld [vmem:[%s9976_s6 + $0xdc] ss:$36 sps:$4 sm:$0xff]  }
  0x8c   :  { %v83_v26 = vpop.permute.xlu0 %82  ;;  %v64_v34 = vpop.permute.xlu1 %63 }
  0x8d   :  { %vm85_vm3 = vcmp.eq.s32.totalorder %v83_v26, %v58_v20  ;;  %vm66_vm5 = vcmp.eq.s32.totalorder %v64_v34, %v58_v20  ;;  %v7011_v26 = vld [vmem:[%s9976_s6 + $0xf0] ss:$36 sps:$4 sm:$0xff]   ;;  %v455_v34 = vld [vmem:[%s9974_s4] sm:$0xf] }
  0x8e   :  { %v5996_v29 = vsel %vm85_vm3, 1.0, %v7628_v11  ;;  %v5994_v43 = vsel %vm66_vm5, 1.0, %v7628_v11 }
  0x8f   :  { %6763 = vmatmul.mubr.msk.f32.vlgmr.msra.gmra.mrb[0].mxu0 %vm98_vm0, %v5996_v29 }
  0x90   :  { %6950 = vmatpush3.bf16.msra.mxu0 %v6947_v18  ;;  %6779 = vmatprep.mubr.msk.f32.mxu0 %vm98_vm0, %v5993_v27  ;;  %v7004_v18 = vld [vmem:[%s9976_s6 + $0x94] ss:$36 sps:$4 sm:$0xff]   ;;  %v7016_v27 = vld [vmem:[%s9976_s6 + $0xc] ss:$36 sps:$4 sm:$0xff]  }
  0x91   :  { %6952 = vmatprep.subr.bf16.mxu0 %v6951_v28  ;;  %v263_v33 = vpop.permute.xlu0 %262  ;;  %v266_v47 = vpop.permute.xlu1 %265 }
  0x92   :  { %vm267_vm4 = vcmp.eq.s32.totalorder %v263_v33, %v58_v20  ;;  %vm268_vm6 = vcmp.eq.s32.totalorder %v266_v47, %v58_v20  ;;  %v7002_v20 = vld [vmem:[%s9976_s6 + $0x90] ss:$36 sps:$4 sm:$0xff]  }
  0x93   :  { %v6008_v42 = vsel %vm267_vm4, 1.0, %v7628_v11  ;;  %v6009_v49 = vsel %vm268_vm6, 1.0, %v7628_v11 }
  0x94   :  { %6954 = vmatpush3.bf16.msra.mxu0 %v6951_v28  ;;  %v594_v28 = vshrl.u32 %v57_v19, 7 }
  0x95   :  { %6956 = vmatprep.subr.bf16.mxu0 %v6955_v32 }
  0x96   :  { %v7889_v30 = vsub.s32 3, %v594_v28  ;;  %v7891_v31 = vsub.s32 2, %v594_v28  ;;  %v7897_v36 = vsub.s32 1, %v594_v28  ;;  %v7900_v38 = vsub.s32 0, %v594_v28  ;;  %v7017_v28 = vld [vmem:[%s9976_s6 + $0x50] ss:$36 sps:$4 sm:$0xff]  }
  0x98   :  { %6958 = vmatpush3.bf16.msra.mxu0 %v6955_v32  ;;  %v596_v39 = vrot.slane %v455_v34, %v7889_v30 }
  0x99   :  { %6777 = vmatprep.subr.mxu0 %v77_v35 }
  0x9c   :  { %6778 = vmatpush3.msra.mxu0 %v77_v35 }
  0x9d   :  { %6780 = vmatmul.mubr.msk.f32.vlgmr.msra.gmra.mrb[0].mxu0 %vm98_vm0, %v5994_v43  ;;  %6960 = vmatprep.subr.bf16.mxu0 %v6959_v40 }
  0x9e   :  { %6962 = vmatpush3.bf16.msra.mxu0 %v6959_v40  ;;  %6796 = vmatprep.mubr.msk.f32.mxu0 %vm98_vm0, %v6008_v42  ;;  %v604_v40 = vrot.slane %v455_v34, %v7891_v31 }
  0x9f   :  { %6964 = vmatprep.subr.bf16.mxu0 %v6963_v41 }
  0xa2   :  { %6966 = vmatpush3.bf16.msra.mxu0 %v6963_v41  ;;  %v614_v41 = vrot.slane %v455_v34, %v7897_v36 }
  0xa3   :  { %6968 = vmatprep.subr.bf16.mxu0 %v6967_v46 }
  0xa6   :  { %6970 = vmatpush3.bf16.msra.mxu0 %v6967_v46  ;;  %v624_v46 = vrot.slane %v455_v34, %v7900_v38  ;;  %v7023_v34 = vld [vmem:[%s9976_s6 + $0xe0] ss:$36 sps:$4 sm:$0xff]  }
  0xa7   :  { %6794 = vmatprep.subr.mxu0 %v6016_v48 }
  0xaa   :  { %6795 = vmatpush3.msra.mxu0 %v6016_v48 }
  0xab   :  { %6797 = vmatmul.mubr.msk.f32.vlgmr.msra.gmra.mrb[0].mxu0 %vm98_vm0, %v6009_v49  ;;  %968 = vmatprep.subr.bf16.mxu0 %v6995_v12 }
  0xac   :  { %1000 = vmatprep.mubr.bf16.mxu0 %v7627_v3  ;;  %969 = vmatpush1.bf16.msra.mxu0 %v6993_v13 }
  0xad   :  { %970 = vmatprep.subr.bf16.mxu0 %v7001_v16 }
  0xb0   :  { %971 = vmatpush1.bf16.msra.mxu0 %v6999_v17 }
  0xb1   :  { %972 = vmatprep.subr.bf16.mxu0 %v7007_v21 }
  0xb4   :  { %973 = vmatpush1.bf16.msra.mxu0 %v7005_v22 }
  0xb5   :  { %974 = vmatprep.subr.bf16.mxu0 %v7013_v25  ;;  %v7014_v25 = vld [vmem:[%s9976_s6 + $0x8] ss:$36 sps:$4 sm:$0xff]  }
  0xb8   :  { %975 = vmatpush1.bf16.msra.mxu0 %v7011_v26 }
 0x17e   :  { %v7805_v50 = vpop.f32.mrb[0].mxu0 }
 0x17f   :  { %v7807_v51 = vpop.f32.mrb[1].mxu0  ;;  %v509_v52 = vmul.f32 %v7805_v50, %v7805_v50 }
 0x180   :  { %v508_v53 = vmul.f32 %v7807_v51, %v7807_v51 }
 0x181   :  { %v514_v54 = vsel %vm510_vm7, %v509_v52, 0.0 }
 0x182   :  { %515 = vadd.xlane.f32.xlu0 %v514_v54  ;;  %v511_v55 = vsel %vm510_vm7, %v508_v53, 0.0 }
 0x183   :  { %512 = vadd.xlane.f32.xlu1 %v511_v55 }
 0x20f   :  { %v516_v58 = vpop.xlane.xlu0 %515 }
 0x210   :  { %v519_v59 = vmul.f32 0.03125, %v516_v58  ;;  %v513_v60 = vpop.xlane.xlu1 %512 }
 0x211   :  { %v518_v61 = vmul.f32 0.03125, %v513_v60 }
 0x212   :  { %v521_v62 = vadd.f32 1e-05, %v519_v59 }
 0x213   :  { %v520_v63 = vadd.f32 1e-05, %v518_v61 }
 0x214   :  { %7278 = vrsqrt.f32 %v521_v62  ;;  %v6023_v62 = vld [vmem:[%s9975_s5] ss:$0 sm:$0xff] }
 0x215   :  { %7280 = vrsqrt.f32 %v520_v63 }
 0x21e   :  { %v7279_v0 = vpop.eup %7278 }
 0x21f   :  { %v7281_v2 = vpop.eup %7280  ;;  %v525_v4 = vmul.f32 %v7279_v0, %v7805_v50 }
 0x220   :  { %v524_v5 = vmul.f32 %v7281_v2, %v7807_v51 }
 0x221   :  { %v533_v6 = vmul.f32 %v6019_v1, %v525_v4 }
 0x222   :  { %v532_v7 = vmul.f32 %v6019_v1, %v524_v5 }
 0x224   :  { %v534_v8 = vpack.c.bf16 %v533_v6, %v532_v7 }
 0x226   :  { %6804 = vmatmul.mubr.msk.bf16.vlgmr.msra.gmra.mrb[0].mxu1 %vm510_vm7, %v534_v8 }
 0x227   :  { %871 = vmatprep.mubr.bf16.mxu1 %v7627_v3  ;;  %840 = vmatpush1.bf16.msra.mxu1 %v6990_v10 }
 0x228   :  { %841 = vmatprep.subr.bf16.mxu1 %v6998_v14 }
 0x22b   :  { %842 = vmatpush1.bf16.msra.mxu1 %v6996_v15 }
 0x22c   :  { %843 = vmatprep.subr.bf16.mxu1 %v7004_v18 }
 0x22f   :  { %844 = vmatpush1.bf16.msra.mxu1 %v7002_v20 }
 0x230   :  { %845 = vmatprep.subr.bf16.mxu1 %v7010_v23 }
 0x233   :  { %846 = vmatpush1.bf16.msra.mxu1 %v7008_v24 }
 0x234   :  { %882 = vmatprep.subr.bf16.mxu1 %v7016_v27  ;;  %v7019_v27 = vld [vmem:[%s9976_s6 + $0x54] ss:$36 sps:$4 sm:$0xff]  }
 0x2f9   :  { %v584_v29 = vpop.f32.mrb[0].mxu1 }
 0x2fa   :  { %591 = vst.msk [vmem:[#allocation2 + $0x3] sm:$0xff] %vm364_vm9, %v584_v29  ;;  %v6121_v32 = vmul.f32 -1.442695, %v584_v29  ;;  %v6805_v33 = vpop.f32.mrb[1].mxu1  ;;  %v597_v44 = vmul.f32 %v596_v39, %v584_v29 }
 0x2fb   :  { %v587_v35 = vpop.f32.mrb[2].mxu1  ;;  %v7025_v33 = vld [vmem:[%s9976_s6 + $0xe4] ss:$36 sps:$4 sm:$0xff]  }
 0x2fc   :  { %7282 = vpow2.f32 %v6121_v32  ;;  %592 = vst.msk [vmem:[#allocation2 + $0x13] sm:$0xff] %vm364_vm9, %v587_v35  ;;  %v6122_v19 = vmul.f32 -1.442695, %v587_v35  ;;  %v6806_v37 = vpop.f32.mrb[3].mxu1  ;;  %v598_v54 = vmul.f32 %v596_v39, %v587_v35  ;;  %v7020_v32 = vld [vmem:[%s9976_s6 + $0x98] ss:$36 sps:$4 sm:$0xff]  }
 0x2fd   :  { %v7031_v37 = vld [vmem:[%s9976_s6 + $0x5c] ss:$36 sps:$4 sm:$0xff]  }
 0x2fe   :  { %7284 = vpow2.f32 %v6122_v19  ;;  %v7026_v19 = vld [vmem:[%s9976_s6 + $0x10] ss:$36 sps:$4 sm:$0xff]   ;;  %v7029_v39 = vld [vmem:[%s9976_s6 + $0x58] ss:$36 sps:$4 sm:$0xff]  }
 0x301   :  { %v599_v42 = vld [vmem:[#allocation2 + $0x2] sm:$0xff] }
 0x302   :  { %v609_v43 = vld [vmem:[#allocation2 + $0x1] sm:$0xff]  ;;  %v605_v45 = vmul.f32 %v604_v40, %v599_v42  ;;  %v7037_v42 = vld [vmem:[%s9976_s6 + $0xec] ss:$36 sps:$4 sm:$0xff]  }
 0x303   :  { %v619_v47 = vld [vmem:[#allocation2] sm:$0xff]  ;;  %v600_v48 = vld [vmem:[#allocation2 + $0x12] sm:$0xff]  ;;  %v615_v53 = vmul.f32 %v614_v41, %v609_v43  ;;  %v7035_v43 = vld [vmem:[%s9976_s6 + $0xe8] ss:$36 sps:$4 sm:$0xff]  }
 0x304   :  { %v610_v49 = vld [vmem:[#allocation2 + $0x11] sm:$0xff]  ;;  %v607_v52 = vadd.f32 %v605_v45, %v597_v44  ;;  %v606_v55 = vmul.f32 %v604_v40, %v600_v48  ;;  %v625_v59 = vmul.f32 %v624_v46, %v619_v47  ;;  %v7034_v40 = vld [vmem:[%s9976_s6 + $0xa4] ss:$36 sps:$4 sm:$0xff]  }
 0x305   :  { %v620_v56 = vld [vmem:[#allocation2 + $0x10] sm:$0xff]  ;;  %v616_v61 = vmul.f32 %v614_v41, %v610_v49  ;;  %v7032_v41 = vld [vmem:[%s9976_s6 + $0xa0] ss:$36 sps:$4 sm:$0xff]   ;;  %v7039_v45 = vld [vmem:[%s9976_s6 + $0x68] ss:$36 sps:$4 sm:$0xff]  }
 0x306   :  { %v7283_v57 = vpop.eup %7282  ;;  %v617_v58 = vadd.f32 %v615_v53, %v607_v52  ;;  %v608_v60 = vadd.f32 %v606_v55, %v598_v54  ;;  %v626_v4 = vmul.f32 %v624_v46, %v620_v56  ;;  %v7038_v44 = vld [vmem:[%s9976_s6 + $0x20] ss:$36 sps:$4 sm:$0xff]   ;;  %v7040_v46 = vld [vmem:[%s9976_s6 + $0xb0] ss:$36 sps:$4 sm:$0xff]   ;;  %v7041_v47 = vld [vmem:[%s9976_s6 + $0xf8] ss:$36 sps:$4 sm:$0xff]  }
 0x307   :  { %v1920_v63 = vadd.f32 1.0, %v7283_v57  ;;  %v7042_v48 = vld [vmem:[%s9981_s11 + $0x4] ss:$16 sps:$4 sm:$0xff]   ;;  %v7044_v49 = vld [vmem:[%s9981_s11 + $0xc] ss:$16 sps:$4 sm:$0xff]  }
 0x308   :  { %v7285_v0 = vpop.eup %7284  ;;  %v627_v1 = vadd.f32 %v625_v59, %v617_v58  ;;  %v618_v2 = vadd.f32 %v616_v61, %v608_v60  ;;  %v7998_v52 = vld [vmem:[%s9981_s11] ss:$16 sps:$4 sm:$0xff]   ;;  %v8003_v53 = vld [vmem:[%s9981_s11 + $0x8] ss:$16 sps:$4 sm:$0xff]   ;;  %1162 = vmatprep.subr.bf16.mxu0 %v7042_v48  ;;  %v8010_v54 = vld [vmem:[%s9981_s11 + $0x24] ss:$16 sps:$4 sm:$0xff]  }
 0x309   :  { %7286 = vrcp.f32 %v1920_v63  ;;  %v1921_v5 = vadd.f32 1.0, %v7285_v0  ;;  %v8015_v55 = vld [vmem:[%s9981_s11 + $0x2c] ss:$16 sps:$4 sm:$0xff]   ;;  %v8020_v56 = vld [vmem:[%s9981_s11 + $0x20] ss:$16 sps:$4 sm:$0xff]  }
 0x30a   :  { %v635_v6 = vadd.f32 %v6023_v62, %v627_v1  ;;  %v628_v7 = vadd.f32 %v626_v4, %v618_v2  ;;  %v8025_v57 = vld [vmem:[%s9981_s11 + $0x28] ss:$16 sps:$4 sm:$0xff]   ;;  %v8034_v58 = vld [vmem:[%s9981_s11 + $0x44] ss:$16 sps:$4 sm:$0xff]   ;;  %v8039_v59 = vld [vmem:[%s9981_s11 + $0x4c] ss:$16 sps:$4 sm:$0xff]  }
 0x30b   :  { %7288 = vrcp.f32 %v1921_v5  ;;  %v8044_v60 = vld [vmem:[%s9981_s11 + $0x40] ss:$16 sps:$4 sm:$0xff]   ;;  %v8049_v61 = vld [vmem:[%s9981_s11 + $0x48] ss:$16 sps:$4 sm:$0xff]   ;;  %v8063_v63 = vld [vmem:[%s9981_s11 + $0x6c] ss:$16 sps:$4 sm:$0xff]  }
 0x30c   :  { %v6024_v8 = vmul.f32 -1.442695, %v635_v6  ;;  %v636_v9 = vadd.f32 %v6023_v62, %v628_v7  ;;  %v8058_v62 = vld [vmem:[%s9981_s11 + $0x64] ss:$16 sps:$4 sm:$0xff]   ;;  %v8068_v0 = vld [vmem:[%s9981_s11 + $0x60] ss:$16 sps:$4 sm:$0xff]  }
 0x30d   :  { %v8073_v1 = vld [vmem:[%s9981_s11 + $0x68] ss:$16 sps:$4 sm:$0xff]  }
 0x30e   :  { %7290 = vpow2.f32 %v6024_v8  ;;  %v6025_v10 = vmul.f32 -1.442695, %v636_v9 }
 0x310   :  { %7292 = vpow2.f32 %v6025_v10 }
 0x313   :  { %v7287_v12 = vpop.eup %7286 }
 0x314   :  { %v1926_v13 = vmul.f32 %v7287_v12, %v584_v29  ;;  %v7022_v29 = vld [vmem:[%s9976_s6 + $0x9c] ss:$36 sps:$4 sm:$0xff]  }
 0x315   :  { %v7289_v14 = vpop.eup %7288 }
 0x316   :  { %1930 = vrot.lane.b32.xlu0 %v1926_v13, %s7631_s19  ;;  %v1927_v15 = vmul.f32 %v7289_v14, %v587_v35  ;;  %v7028_v35 = vld [vmem:[%s9976_s6 + $0x14] ss:$36 sps:$4 sm:$0xff]  }
 0x318   :  { %v7291_v16 = vpop.eup %7290  ;;  %1932 = vrot.lane.b32.xlu1 %v1927_v15, %s7631_s19 }
 0x319   :  { %v643_v17 = vadd.f32 1.0, %v7291_v16 }
 0x31a   :  { %v7293_v18 = vpop.eup %7292 }
 0x31b   :  { %7294 = vrcp.f32 %v643_v17  ;;  %v644_v20 = vadd.f32 1.0, %v7293_v18 }
 0x31d   :  { %7296 = vrcp.f32 %v644_v20 }
 0x325   :  { %v7295_v21 = vpop.eup %7294 }
 0x326   :  { %v7911_v23 = vmul.f32 %v7295_v21, %v635_v6  ;;  %v6067_v21 = vld [vmem:[%s9977_s7] ss:$0 sm:$0xff] }
 0x327   :  { %v7297_v22 = vpop.eup %7296 }
 0x328   :  { %v7913_v24 = vmul.f32 %v7297_v22, %v636_v9 }
 0x32a   :  { %v651_v26 = vpack.c.bf16 %v7913_v24, %v7911_v23 }
 0x32c   :  { %6062 = vmatmul.mubr.msk.bf16.vlgmr.msra.gmra.mrb[4].mxu1 %vm364_vm9, %v651_v26  ;;  %6065 = vmatmul.mubr.msk.bf16.vlgmr.msra.gmra.mrb[4].mxu0 %vm364_vm9, %v651_v26 }
 0x32d   :  { %883 = vmatpush1.bf16.msra.mxu1 %v7014_v25  ;;  %914 = vmatprep.mubr.bf16.mxu1 %v7627_v3 }
 0x32e   :  { %884 = vmatprep.subr.bf16.mxu1 %v7019_v27  ;;  %1194 = vmatprep.mubr.bf16.mxu0 %v7627_v3 }
 0x32f   :  { %1163 = vmatpush1.bf16.msra.mxu0 %v7998_v52 }
 0x330   :  { %1164 = vmatprep.subr.bf16.mxu0 %v8010_v54 }
 0x331   :  { %885 = vmatpush1.bf16.msra.mxu1 %v7017_v28 }
 0x332   :  { %886 = vmatprep.subr.bf16.mxu1 %v7022_v29 }
 0x333   :  { %1165 = vmatpush1.bf16.msra.mxu0 %v8020_v56 }
 0x334   :  { %1166 = vmatprep.subr.bf16.mxu0 %v8034_v58 }
 0x335   :  { %887 = vmatpush1.bf16.msra.mxu1 %v7020_v32 }
 0x336   :  { %888 = vmatprep.subr.bf16.mxu1 %v7025_v33 }
 0x337   :  { %1167 = vmatpush1.bf16.msra.mxu0 %v8044_v60 }
 0x338   :  { %1168 = vmatprep.subr.bf16.mxu0 %v8058_v62 }
 0x339   :  { %889 = vmatpush1.bf16.msra.mxu1 %v7023_v34 }
 0x33a   :  { %925 = vmatprep.subr.bf16.mxu1 %v7028_v35 }
 0x33b   :  { %1169 = vmatpush1.bf16.msra.mxu0 %v8068_v0 }
 0x33c   :  { %6063 = vmatmul.mubr.msk.bf16.vlgmr.msra.gmra.mrb[8].mxu1 %vm364_vm9, %v651_v26  ;;  %1254 = vmatprep.subr.bf16.mxu0 %v7042_v48 }
 0x33d   :  { %926 = vmatpush1.bf16.msra.mxu1 %v7026_v19  ;;  %957 = vmatprep.mubr.bf16.mxu1 %v7627_v3 }
 0x33e   :  { %927 = vmatprep.subr.bf16.mxu1 %v7031_v37 }
 0x341   :  { %928 = vmatpush1.bf16.msra.mxu1 %v7029_v39 }
 0x342   :  { %929 = vmatprep.subr.bf16.mxu1 %v7034_v40 }
 0x345   :  { %930 = vmatpush1.bf16.msra.mxu1 %v7032_v41 }
 0x346   :  { %931 = vmatprep.subr.bf16.mxu1 %v7037_v42 }
 0x349   :  { %932 = vmatpush1.bf16.msra.mxu1 %v7035_v43 }
 0x34a   :  { %6807 = vmatprep.subr.bf16.mxu1 %v7628_v11 }
 0x34c   :  { %6064 = vmatmul.mubr.msk.bf16.vlgmr.msra.gmra.mrb[12].mxu1 %vm364_vm9, %v651_v26 }
 0x34d   :  { %6808 = vmatpush3.bf16.msra.mxu1 %v7038_v44  ;;  %6815 = vmatprep.mubr.msk.bf16.mxu1 %vm7630_vm8, %v7628_v11 }
 0x34e   :  { %6809 = vmatprep.subr.bf16.mxu1 %v7628_v11 }
 0x351   :  { %6810 = vmatpush3.bf16.msra.mxu1 %v7039_v45 }
 0x352   :  { %6811 = vmatprep.subr.bf16.mxu1 %v7628_v11 }
 0x355   :  { %6812 = vmatpush3.bf16.msra.mxu1 %v7040_v46 }
 0x356   :  { %6813 = vmatprep.subr.bf16.mxu1 %v7628_v11 }
 0x359   :  { %6814 = vmatpush3.bf16.msra.mxu1 %v7041_v47 }
 0x35a   :  { %1205 = vmatprep.subr.bf16.mxu1 %v7044_v49 }
 0x35c   :  { %6816 = vmatmul.mubr.msk.bf16.vlgmr.msra.gmra.mrb[16].mxu1 %vm364_vm9, %v651_v26 }
 0x35d   :  { %1237 = vmatprep.mubr.bf16.mxu1 %v7627_v3  ;;  %1206 = vmatpush1.bf16.msra.mxu1 %v8003_v53 }
 0x35e   :  { %1207 = vmatprep.subr.bf16.mxu1 %v8015_v55 }
 0x361   :  { %1208 = vmatpush1.bf16.msra.mxu1 %v8025_v57 }
 0x362   :  { %1209 = vmatprep.subr.bf16.mxu1 %v8039_v59 }
 0x365   :  { %1210 = vmatpush1.bf16.msra.mxu1 %v8049_v61 }
 0x366   :  { %1211 = vmatprep.subr.bf16.mxu1 %v8063_v63 }
 0x369   :  { %1212 = vmatpush1.bf16.msra.mxu1 %v8073_v1 }
 0x36a   :  { %1297 = vmatprep.subr.bf16.mxu1 %v7044_v49 }
 0x3ff   :  { %v8079_v2 = vpop.f32.mrb[4].mxu1  ;;  %v8081_v4 = vpop.f32.mrb[4].mxu0 }
 0x400   :  { %v8083_v5 = vpop.f32.mrb[5].mxu1  ;;  %v8085_v6 = vpop.f32.mrb[5].mxu0 }
 0x401   :  { %v8087_v7 = vpop.f32.mrb[6].mxu1  ;;  %v8089_v8 = vpop.f32.mrb[6].mxu0 }
 0x402   :  { %v8091_v9 = vpop.f32.mrb[7].mxu1  ;;  %v8093_v10 = vpop.f32.mrb[7].mxu0 }
 0x40f   :  { %v8095_v12 = vpop.f32.mrb[8].mxu1 }
 0x410   :  { %v8097_v13 = vpop.f32.mrb[9].mxu1 }
 0x411   :  { %v8099_v14 = vpop.f32.mrb[10].mxu1 }
 0x412   :  { %v8101_v15 = vpop.f32.mrb[11].mxu1 }
 0x41f   :  { %v8103_v16 = vpop.f32.mrb[12].mxu1 }
 0x420   :  { %v8105_v17 = vpop.f32.mrb[13].mxu1 }
 0x421   :  { %v8107_v18 = vpop.f32.mrb[14].mxu1 }
 0x422   :  { %v8109_v20 = vpop.f32.mrb[15].mxu1 }
 0x42f   :  { %v1045_v22 = vpop.f32.mrb[16].mxu1 }
 0x430   :  { %v1058_v25 = vadd.f32 %v6067_v21, %v1045_v22  ;;  %v6817_v26 = vpop.f32.mrb[17].mxu1 }
 0x431   :  { %v1048_v27 = vpop.f32.mrb[18].mxu1 }
 0x432   :  { %v1062_v28 = vand.u32 2147483647, %v1058_v25  ;;  %v1059_v29 = vadd.f32 %v6067_v21, %v1048_v27  ;;  %v6818_v32 = vpop.f32.mrb[19].mxu1  ;;  %v1060_v44 = vmax.f32 %v1058_v25, 0.0  ;;  %v7080_v25 = vld [vmem:[%s9982_s12 + $0x18] sm:$0xff]  }
 0x433   :  { %v7082_v32 = vld [vmem:[%s9982_s12 + $0x60] sm:$0xff]  }
 0x434   :  { %v1064_v33 = vsub.f32 0.0, %v1062_v28  ;;  %v1063_v34 = vand.u32 2147483647, %v1059_v29  ;;  %v1061_v48 = vmax.f32 %v1059_v29, 0.0  ;;  %v7081_v29 = vld [vmem:[%s9982_s12 + $0x98] sm:$0xff]  }
 0x436   :  { %v1066_v35 = vmul.f32 1.442695, %v1064_v33  ;;  %v1065_v19 = vsub.f32 0.0, %v1063_v34  ;;  %v7083_v33 = vld [vmem:[%s9982_s12 + $0xe0] sm:$0xff]  }
 0x437   :  { %v7084_v34 = vld [vmem:[%s9982_s12 + $0x20] sm:$0xff]  }
 0x438   :  { %7298 = vpow2.f32 %v1066_v35  ;;  %v1068_v37 = vmul.f32 1.442695, %v1065_v19  ;;  %v7085_v35 = vld [vmem:[%s9982_s12 + $0xa0] sm:$0xff]   ;;  %v7086_v19 = vld [vmem:[%s9982_s12 + $0x68] sm:$0xff]  }
 0x43a   :  { %7300 = vpow2.f32 %v1068_v37  ;;  %v7087_v37 = vld [vmem:[%s9982_s12 + $0xe8] sm:$0xff]  }
 0x442   :  { %v7299_v39 = vpop.eup %7298 }
 0x443   :  { %v1070_v40 = vadd.f32 1.0, %v7299_v39  ;;  %v7088_v39 = vld [vmem:[%s9982_s12 + $0x28] sm:$0xff]  }
 0x444   :  { %v7301_v41 = vpop.eup %7300 }
 0x445   :  { %7302 = vlog2.f32 %v1070_v40  ;;  %v1071_v42 = vadd.f32 1.0, %v7301_v41  ;;  %v7089_v40 = vld [vmem:[%s9982_s12 + $0xa8] sm:$0xff]   ;;  %v7090_v41 = vld [vmem:[%s9982_s12 + $0x70] sm:$0xff]  }
 0x447   :  { %7304 = vlog2.f32 %v1071_v42  ;;  %v7091_v42 = vld [vmem:[%s9982_s12 + $0xf0] sm:$0xff]  }
 0x44f   :  { %v7303_v43 = vpop.eup %7302 }
 0x450   :  { %v1073_v45 = vmul.f32 0.6931472, %v7303_v43  ;;  %v7092_v43 = vld [vmem:[%s9982_s12 + $0x30] sm:$0xff]  }
 0x451   :  { %v7305_v46 = vpop.eup %7304 }
 0x452   :  { %v1076_v47 = vadd.f32 %v1073_v45, %v1060_v44  ;;  %v1075_v49 = vmul.f32 0.6931472, %v7305_v46  ;;  %v7093_v44 = vld [vmem:[%s9982_s12 + $0xb0] sm:$0xff]   ;;  %v7094_v45 = vld [vmem:[%s9982_s12 + $0x78] sm:$0xff]  }
 0x453   :  { %v7095_v46 = vld [vmem:[%s9982_s12 + $0xf8] sm:$0xff]  }
 0x454   :  { %v1077_v21 = vadd.f32 %v1075_v49, %v1061_v48  ;;  %v1248_v22 = vmul.f32 %v1076_v47, %v7911_v23  ;;  %v7097_v48 = vld [vmem:[%s9982_s12 + $0xb8] sm:$0xff]   ;;  %v498_v49 = vld [vmem:[%s9978_s8] sm:$0xf] }
 0x456   :  { %v1078_v26 = vpack.c.bf16 %v1077_v21, %v1076_v47  ;;  %v1249_v27 = vmul.f32 %v1077_v21, %v7913_v24  ;;  %v7096_v47 = vld [vmem:[%s9982_s12 + $0x38] sm:$0xff]   ;;  %v1344_v21 = vrot.slane %v498_v49, %v7900_v38 }
 0x458   :  { %v1250_v28 = vpack.c.bf16 %v1249_v27, %v1248_v22  ;;  %6084 = vmatmul.mubr.msk.bf16.vlgmr.msra.gmra.mrb[8].mxu0 %vm364_vm9, %v1078_v26  ;;  %6085 = vmatmul.mubr.msk.bf16.vlgmr.msra.gmra.mrb[20].mxu1 %vm364_vm9, %v1078_v26  ;;  %v1352_v22 = vrot.slane %v498_v49, %v7891_v31  ;;  %v1348_v26 = vrot.slane %v498_v49, %v7897_v36 }
 0x459   :  { %1255 = vmatpush1.bf16.msra.mxu0 %v7998_v52  ;;  %1298 = vmatpush1.bf16.msra.mxu1 %v8003_v53  ;;  %v7066_v52 = vld [vmem:[%s9982_s12 + $0x40] sm:$0xff]   ;;  %v1356_v27 = vrot.slane %v498_v49, %v7889_v30 }
 0x45a   :  { %1256 = vmatprep.subr.bf16.mxu0 %v8010_v54  ;;  %1299 = vmatprep.subr.bf16.mxu1 %v8015_v55  ;;  %v7067_v53 = vld [vmem:[%s9982_s12 + $0xc0] sm:$0xff]  }
 0x45b   :  { %1286 = vmatprep.mubr.bf16.mxu0 %v7627_v3  ;;  %1329 = vmatprep.mubr.bf16.mxu1 %v7627_v3  ;;  %v7068_v54 = vld [vmem:[%s9982_s12] sm:$0xff]  }
 0x45c   :  { %v7069_v55 = vld [vmem:[%s9982_s12 + $0x80] sm:$0xff]  }
 0x45d   :  { %1257 = vmatpush1.bf16.msra.mxu0 %v8020_v56  ;;  %1300 = vmatpush1.bf16.msra.mxu1 %v8025_v57  ;;  %v7070_v56 = vld [vmem:[%s9982_s12 + $0x48] sm:$0xff]  }
 0x45e   :  { %1258 = vmatprep.subr.bf16.mxu0 %v8034_v58  ;;  %1301 = vmatprep.subr.bf16.mxu1 %v8039_v59  ;;  %v7071_v57 = vld [vmem:[%s9982_s12 + $0xc8] sm:$0xff]  }
 0x45f   :  { %v7072_v58 = vld [vmem:[%s9982_s12 + $0x8] sm:$0xff]  }
 0x460   :  { %v7073_v59 = vld [vmem:[%s9982_s12 + $0x88] sm:$0xff]  }
 0x461   :  { %1259 = vmatpush1.bf16.msra.mxu0 %v8044_v60  ;;  %1302 = vmatpush1.bf16.msra.mxu1 %v8049_v61  ;;  %v7074_v60 = vld [vmem:[%s9982_s12 + $0x50] sm:$0xff]  }
 0x462   :  { %1260 = vmatprep.subr.bf16.mxu0 %v8058_v62  ;;  %1303 = vmatprep.subr.bf16.mxu1 %v8063_v63  ;;  %v7075_v61 = vld [vmem:[%s9982_s12 + $0xd0] sm:$0xff]  }
 0x463   :  { %v7076_v62 = vld [vmem:[%s9982_s12 + $0x10] sm:$0xff]  }
 0x464   :  { %v7077_v63 = vld [vmem:[%s9982_s12 + $0x90] sm:$0xff]  }
 0x465   :  { %1261 = vmatpush1.bf16.msra.mxu0 %v8068_v0  ;;  %1304 = vmatpush1.bf16.msra.mxu1 %v8073_v1  ;;  %v7078_v0 = vld [vmem:[%s9982_s12 + $0x58] sm:$0xff]  }
 0x466   :  { %6525 = vmatprep.subr.bf16.mxu0 %v7066_v52  ;;  %6547 = vmatprep.subr.bf16.mxu1 %v7067_v53  ;;  %v7079_v1 = vld [vmem:[%s9982_s12 + $0xd8] sm:$0xff]  }
 0x468   :  { %6086 = vmatmul.mubr.msk.bf16.vlgmr.msra.gmra.mrb[12].mxu0 %vm364_vm9, %v1250_v28  ;;  %6087 = vmatmul.mubr.msk.bf16.vlgmr.msra.gmra.mrb[24].mxu1 %vm364_vm9, %v1250_v28 }
 0x469   :  { %6526 = vmatpush3.bf16.msra.mxu0 %v7068_v54  ;;  %6548 = vmatpush3.bf16.msra.mxu1 %v7069_v55 }
 0x46a   :  { %6527 = vmatprep.subr.bf16.mxu0 %v7070_v56  ;;  %6549 = vmatprep.subr.bf16.mxu1 %v7071_v57 }
 0x46d   :  { %6528 = vmatpush3.bf16.msra.mxu0 %v7072_v58  ;;  %6550 = vmatpush3.bf16.msra.mxu1 %v7073_v59 }
 0x46e   :  { %6529 = vmatprep.subr.bf16.mxu0 %v7074_v60  ;;  %6551 = vmatprep.subr.bf16.mxu1 %v7075_v61 }
 0x471   :  { %6530 = vmatpush3.bf16.msra.mxu0 %v7076_v62  ;;  %6552 = vmatpush3.bf16.msra.mxu1 %v7077_v63 }
 0x472   :  { %6531 = vmatprep.subr.bf16.mxu0 %v7078_v0  ;;  %6553 = vmatprep.subr.bf16.mxu1 %v7079_v1 }
 0x475   :  { %6532 = vmatpush3.bf16.msra.mxu0 %v7080_v25  ;;  %6554 = vmatpush3.bf16.msra.mxu1 %v7081_v29 }
 0x476   :  { %6533 = vmatprep.subr.bf16.mxu0 %v7082_v32  ;;  %6555 = vmatprep.subr.bf16.mxu1 %v7083_v33 }
 0x479   :  { %6534 = vmatpush3.bf16.msra.mxu0 %v7084_v34  ;;  %6556 = vmatpush3.bf16.msra.mxu1 %v7085_v35 }
 0x47a   :  { %6535 = vmatprep.subr.bf16.mxu0 %v7086_v19  ;;  %6557 = vmatprep.subr.bf16.mxu1 %v7087_v37 }
 0x47d   :  { %6536 = vmatpush3.bf16.msra.mxu0 %v7088_v39  ;;  %6558 = vmatpush3.bf16.msra.mxu1 %v7089_v40 }
 0x47e   :  { %6537 = vmatprep.subr.bf16.mxu0 %v7090_v41  ;;  %6559 = vmatprep.subr.bf16.mxu1 %v7091_v42 }
 0x481   :  { %6538 = vmatpush3.bf16.msra.mxu0 %v7092_v43  ;;  %6560 = vmatpush3.bf16.msra.mxu1 %v7093_v44 }
 0x482   :  { %6539 = vmatprep.subr.bf16.mxu0 %v7094_v45  ;;  %6561 = vmatprep.subr.bf16.mxu1 %v7095_v46 }
 0x485   :  { %6540 = vmatpush3.bf16.msra.mxu0 %v7096_v47  ;;  %6562 = vmatpush3.bf16.msra.mxu1 %v7097_v48 }
 0x486   :  { %6819 = vmatprep.subr.bf16.mxu0 %v7628_v11  ;;  %6831 = vmatprep.subr.bf16.mxu1 %v7628_v11 }
 0x52b   :  { %v1196_v28 = vpop.f32.mrb[8].mxu0  ;;  %v1239_v52 = vpop.f32.mrb[20].mxu1 }
 0x52c   :  { %v1361_v53 = vmul.f32 %v1344_v21, %v1196_v28  ;;  %v1363_v54 = vmul.f32 %v1352_v22, %v1239_v52  ;;  %v1198_v55 = vpop.f32.mrb[9].mxu0  ;;  %v1241_v56 = vpop.f32.mrb[21].mxu1 }
 0x52d   :  { %v1362_v57 = vmul.f32 %v1348_v26, %v1198_v55  ;;  %v1364_v58 = vmul.f32 %v1356_v27, %v1241_v56  ;;  %v1200_v59 = vpop.f32.mrb[10].mxu0  ;;  %v1243_v60 = vpop.f32.mrb[22].mxu1 }
 0x52e   :  { %v1369_v61 = vmul.f32 1.442695, %v1361_v53  ;;  %v1373_v62 = vmul.f32 1.442695, %v1363_v54  ;;  %v1202_v63 = vpop.f32.mrb[11].mxu0  ;;  %v1245_v0 = vpop.f32.mrb[23].mxu1  ;;  %v1365_v29 = vmul.f32 %v1344_v21, %v1200_v59  ;;  %v1367_v32 = vmul.f32 %v1352_v22, %v1243_v60 }
 0x52f   :  { %v1371_v1 = vmul.f32 1.442695, %v1362_v57  ;;  %v1375_v25 = vmul.f32 1.442695, %v1364_v58  ;;  %v1366_v33 = vmul.f32 %v1348_v26, %v1202_v63  ;;  %v1368_v19 = vmul.f32 %v1356_v27, %v1245_v0 }
 0x530   :  { %7306 = vpow2.f32 %v1369_v61  ;;  %v1377_v34 = vmul.f32 1.442695, %v1365_v29  ;;  %v1381_v35 = vmul.f32 1.442695, %v1367_v32 }
 0x531   :  { %7308 = vpow2.f32 %v1373_v62  ;;  %v1379_v37 = vmul.f32 1.442695, %v1366_v33  ;;  %v1383_v41 = vmul.f32 1.442695, %v1368_v19 }
 0x532   :  { %7310 = vpow2.f32 %v1371_v1 }
 0x533   :  { %7312 = vpow2.f32 %v1375_v25 }
 0x534   :  { %7314 = vpow2.f32 %v1377_v34 }
 0x535   :  { %7316 = vpow2.f32 %v1381_v35 }
 0x536   :  { %7318 = vpow2.f32 %v1379_v37 }
 0x537   :  { %7320 = vpow2.f32 %v1383_v41 }
 0x53a   :  { %v7307_v39 = vpop.eup %7306 }
 0x53b   :  { %v7309_v40 = vpop.eup %7308  ;;  %v1288_v42 = vpop.f32.mrb[12].mxu0  ;;  %v1401_v43 = vrot.slane %v7307_v39, 7 }
 0x53c   :  { %v1331_v44 = vpop.f32.mrb[24].mxu1  ;;  %v7311_v45 = vpop.eup %7310  ;;  %v1385_v46 = vmul.f32 %v1288_v42, %v8079_v2  ;;  %v1403_v48 = vrot.slane %v7309_v40, 7 }
 0x53d   :  { %v1387_v47 = vmul.f32 %v1331_v44, %v8095_v12  ;;  %v1290_v49 = vpop.f32.mrb[13].mxu0  ;;  %v1333_v21 = vpop.f32.mrb[25].mxu1  ;;  %v1418_v26 = vsel %vm1417_vm11, 1.0, %v1401_v43  ;;  %v1402_v28 = vrot.slane %v7311_v45, 7 }
 0x53e   :  { %v7313_v22 = vpop.eup %7312  ;;  %v1386_v27 = vmul.f32 %v1290_v49, %v8083_v5  ;;  %v1388_v52 = vmul.f32 %v1333_v21, %v8097_v13  ;;  %v1292_v53 = vpop.f32.mrb[14].mxu0  ;;  %v1434_v55 = vrot.slane %v1385_v46, 7  ;;  %v1474_v56 = vmul.f32 %v7307_v39, %v1418_v26 }
 0x53f   :  { %v1335_v54 = vpop.f32.mrb[26].mxu1  ;;  %v1420_v57 = vsel %vm1417_vm11, 1.0, %v1403_v48  ;;  %v1436_v2 = vrot.slane %v1387_v47, 7  ;;  %v8247_v58 = vpop.f32.mrb[15].mxu0  ;;  %v1419_v60 = vsel %vm1417_vm11, 1.0, %v1402_v28  ;;  %v1404_v62 = vrot.slane %v7313_v22, 7 }
 0x540   :  { %v8249_v12 = vpop.f32.mrb[27].mxu1  ;;  %v1476_v59 = vmul.f32 %v7309_v40, %v1420_v57  ;;  %v1435_v61 = vrot.slane %v1386_v27, 7  ;;  %v1450_v5 = vsel %vm1417_vm11, 0.0, %v1434_v55  ;;  %v1490_v63 = vrot.slane %v1474_v56, 6  ;;  %v7315_v37 = vpop.eup %7314 }
 0x541   :  { %v1452_v13 = vsel %vm1417_vm11, 0.0, %v1436_v2  ;;  %v1475_v0 = vmul.f32 %v7311_v45, %v1419_v60  ;;  %v1458_v1 = vmul.f32 %v7307_v39, %v1450_v5  ;;  %v1421_v19 = vsel %vm1417_vm11, 1.0, %v1404_v62  ;;  %v7317_v21 = vpop.eup %7316 }
 0x542   :  { %v1460_v25 = vmul.f32 %v7309_v40, %v1452_v13  ;;  %v1492_v29 = vrot.slane %v1476_v59, 6  ;;  %v1451_v32 = vsel %vm1417_vm11, 0.0, %v1435_v61  ;;  %v1507_v33 = vsel %vm1506_vm12, 1.0, %v1490_v63  ;;  %v8259_v57 = vpop.eup %7318 }
 0x543   :  { %v1459_v34 = vmul.f32 %v7311_v45, %v1451_v32  ;;  %v1491_v35 = vrot.slane %v1475_v0, 6  ;;  %v1466_v42 = vadd.f32 %v1458_v1, %v1385_v46  ;;  %v1563_v48 = vmul.f32 %v1507_v33, %v1474_v56 }
 0x544   :  { %v1468_v43 = vadd.f32 %v1460_v25, %v1387_v47  ;;  %v1509_v44 = vsel %vm1506_vm12, 1.0, %v1492_v29  ;;  %v1437_v40 = vrot.slane %v1388_v52, 7  ;;  %v1477_v45 = vmul.f32 %v7313_v22, %v1421_v19 }
 0x545   :  { %v1565_v49 = vmul.f32 %v1509_v44, %v1476_v59  ;;  %v1467_v39 = vadd.f32 %v1459_v34, %v1386_v27  ;;  %v1523_v26 = vrot.slane %v1466_v42, 6  ;;  %v1508_v55 = vsel %vm1506_vm12, 1.0, %v1491_v35 }
 0x546   :  { %v1525_v28 = vrot.slane %v1468_v43, 6  ;;  %v1453_v41 = vsel %vm1417_vm11, 0.0, %v1437_v40  ;;  %v1389_v46 = vmul.f32 %v1292_v53, %v8087_v7  ;;  %v1405_v47 = vrot.slane %v7315_v37, 7 }
 0x547   :  { %v1524_v2 = vrot.slane %v1467_v39, 6  ;;  %v1539_v60 = vsel %vm1506_vm12, 0.0, %v1523_v26  ;;  %v1461_v27 = vmul.f32 %v7313_v22, %v1453_v41  ;;  %v1493_v62 = vrot.slane %v1477_v45, 6 }
 0x548   :  { %v1541_v61 = vsel %vm1506_vm12, 0.0, %v1525_v28  ;;  %v1547_v5 = vmul.f32 %v1539_v60, %v1474_v56  ;;  %v1422_v1 = vsel %vm1417_vm11, 1.0, %v1405_v47  ;;  %v1564_v29 = vmul.f32 %v1508_v55, %v1475_v0 }
 0x549   :  { %v1549_v63 = vmul.f32 %v1541_v61, %v1476_v59  ;;  %v1540_v13 = vsel %vm1506_vm12, 0.0, %v1524_v2  ;;  %v1469_v32 = vadd.f32 %v1461_v27, %v1388_v52  ;;  %v1438_v33 = vrot.slane %v1389_v46, 7  ;;  %v8270_v2 = vpop.eup %7320 }
 0x54a   :  { %v1548_v25 = vmul.f32 %v1540_v13, %v1475_v0  ;;  %v1555_v34 = vadd.f32 %v1547_v5, %v1466_v42  ;;  %v1510_v7 = vsel %vm1506_vm12, 1.0, %v1493_v62  ;;  %v1478_v53 = vmul.f32 %v7315_v37, %v1422_v1 }
 0x54b   :  { %v1557_v35 = vadd.f32 %v1549_v63, %v1468_v43  ;;  %v1526_v44 = vrot.slane %v1469_v32, 6  ;;  %v1454_v22 = vsel %vm1417_vm11, 0.0, %v1438_v33  ;;  %v1391_v56 = vmul.f32 %v1335_v54, %v8099_v14 }
 0x54c   :  { %v1556_v19 = vadd.f32 %v1548_v25, %v1467_v39  ;;  %v1579_v59 = vrot.slane %v1555_v34, 4  ;;  %v1462_v26 = vmul.f32 %v7315_v37, %v1454_v22  ;;  %v1494_v28 = vrot.slane %v1478_v53, 6 }
 0x54d   :  { %v1581_v40 = vrot.slane %v1557_v35, 4  ;;  %v1542_v52 = vsel %vm1506_vm12, 0.0, %v1526_v44  ;;  %v1407_v42 = vrot.slane %v7317_v21, 7  ;;  %v1440_v43 = vrot.slane %v1391_v56, 7 }
 0x54e   :  { %v1580_v0 = vrot.slane %v1556_v19, 4  ;;  %v1596_v55 = vsel %vm1595_vm13, 0.0, %v1579_v59  ;;  %v1550_v41 = vmul.f32 %v1542_v52, %v1477_v45  ;;  %v1470_v47 = vadd.f32 %v1462_v26, %v1389_v46 }
 0x54f   :  { %v1598_v39 = vsel %vm1595_vm13, 0.0, %v1581_v40  ;;  %v1604_v60 = vmul.f32 %v1596_v55, %v1563_v48  ;;  %v1566_v54 = vmul.f32 %v1510_v7, %v1477_v45  ;;  %v1511_v62 = vsel %vm1506_vm12, 1.0, %v1494_v28 }
 0x550   :  { %v1606_v61 = vmul.f32 %v1598_v39, %v1565_v49  ;;  %v1597_v14 = vsel %vm1595_vm13, 0.0, %v1580_v0  ;;  %v1558_v27 = vadd.f32 %v1550_v41, %v1469_v32  ;;  %v1527_v5 = vrot.slane %v1470_v47, 6 }
 0x551   :  { %v1605_v37 = vmul.f32 %v1597_v14, %v1564_v29  ;;  %v1612_v63 = vadd.f32 %v1604_v60, %v1555_v34  ;;  %v1424_v1 = vsel %vm1417_vm11, 1.0, %v1407_v42  ;;  %v1456_v25 = vsel %vm1417_vm11, 0.0, %v1440_v43 }
 0x552   :  { %v1614_v13 = vadd.f32 %v1606_v61, %v1557_v35  ;;  %v1582_v44 = vrot.slane %v1558_v27, 4  ;;  %v1543_v46 = vsel %vm1506_vm12, 0.0, %v1527_v5  ;;  %v1464_v48 = vmul.f32 %v7317_v21, %v1456_v25 }
 0x553   :  { %v1613_v33 = vadd.f32 %v1605_v37, %v1556_v19  ;;  %v8281_v49 = vmul.f32 %v1612_v63, %v8103_v16  ;;  %v1551_v29 = vmul.f32 %v1543_v46, %v1478_v53  ;;  %v1480_v32 = vmul.f32 %v7317_v21, %v1424_v1 }
 0x554   :  { %v8284_v45 = vmul.f32 %v1614_v13, %v8081_v4  ;;  %v1599_v34 = vsel %vm1595_vm13, 0.0, %v1582_v44  ;;  %v1472_v35 = vadd.f32 %v1464_v48, %v1391_v56  ;;  %v1390_v7 = vmul.f32 %v8247_v58, %v8091_v9 }
 0x555   :  { %v1406_v19 = vrot.slane %v8259_v57, 7  ;;  %v1607_v22 = vmul.f32 %v1599_v34, %v1566_v54  ;;  %v1559_v59 = vadd.f32 %v1551_v29, %v1470_v47  ;;  %v1496_v40 = vrot.slane %v1480_v32, 6 }
 0x556   :  { %v1392_v16 = vmul.f32 %v8249_v12, %v8101_v15  ;;  %v1529_v26 = vrot.slane %v1472_v35, 6  ;;  %v1439_v28 = vrot.slane %v1390_v7, 7  ;;  %v1408_v52 = vrot.slane %v8270_v2, 7 }
 0x557   :  { %v1615_v4 = vadd.f32 %v1607_v22, %v1558_v27  ;;  %v1583_v0 = vrot.slane %v1559_v59, 4  ;;  %v1423_v21 = vsel %vm1417_vm11, 1.0, %v1406_v19  ;;  %v1567_v56 = vmul.f32 %v1511_v62, %v1478_v53 }
 0x558   :  { %v1545_v42 = vsel %vm1506_vm12, 0.0, %v1529_v26  ;;  %v1455_v9 = vsel %vm1417_vm11, 0.0, %v1439_v28  ;;  %v1513_v43 = vsel %vm1506_vm12, 1.0, %v1496_v40  ;;  %v1479_v39 = vmul.f32 %v8259_v57, %v1423_v21 }
 0x559   :  { %v1600_v58 = vsel %vm1595_vm13, 0.0, %v1583_v0  ;;  %v1553_v55 = vmul.f32 %v1545_v42, %v1480_v32  ;;  %v1463_v15 = vmul.f32 %v8259_v57, %v1455_v9  ;;  %v1441_v41 = vrot.slane %v1392_v16, 7  ;;  %v7098_v9 = vld [vmem:[%s9980_s10] sm:$0xff]  }
 0x55a   :  { %v1608_v12 = vmul.f32 %v1600_v58, %v1567_v56  ;;  %v1621_v47 = vmul.f32 %v1613_v33, %v8105_v17  ;;  %v1425_v53 = vsel %vm1417_vm11, 1.0, %v1408_v52  ;;  %v1623_v14 = vmul.f32 %v1615_v4, %v8085_v6 }
 0x55b   :  { %v1561_v60 = vadd.f32 %v1553_v55, %v1472_v35  ;;  %v1471_v61 = vadd.f32 %v1463_v15, %v1390_v7  ;;  %v1457_v37 = vsel %vm1417_vm11, 0.0, %v1441_v41  ;;  %v1569_v13 = vmul.f32 %v1513_v43, %v1480_v32  ;;  %v7101_v43 = vld [vmem:[%s9980_s10 + $0x18] sm:$0xff]   ;;  %v6088_v55 = vld [vmem:[%s9979_s9] ss:$0 sm:$0xff] }
 0x55c   :  { %v1616_v54 = vadd.f32 %v1608_v12, %v1559_v59  ;;  %v1465_v5 = vmul.f32 %v8270_v2, %v1457_v37  ;;  %v1495_v57 = vrot.slane %v1479_v39, 6  ;;  %v1481_v1 = vmul.f32 %v8270_v2, %v1425_v53 }
 0x55d   :  { %v1585_v27 = vrot.slane %v1561_v60, 4  ;;  %v1528_v62 = vrot.slane %v1471_v61, 6 }
 0x55e   :  { %v1624_v63 = vmul.f32 %v1616_v54, %v8107_v18  ;;  %v1473_v33 = vadd.f32 %v1465_v5, %v1392_v16  ;;  %v1512_v34 = vsel %vm1506_vm12, 1.0, %v1495_v57  ;;  %v1497_v7 = vrot.slane %v1481_v1, 6 }
 0x55f   :  { %v1602_v17 = vsel %vm1595_vm13, 0.0, %v1585_v27  ;;  %v1544_v25 = vsel %vm1506_vm12, 0.0, %v1528_v62  ;;  %v1568_v22 = vmul.f32 %v1512_v34, %v1479_v39 }
 0x560   :  { %v1610_v44 = vmul.f32 %v1602_v17, %v1569_v13  ;;  %v1552_v6 = vmul.f32 %v1544_v25, %v1479_v39  ;;  %v1628_v46 = vpack.c.bf16 %v1624_v63, %v8281_v49  ;;  %v1530_v48 = vrot.slane %v1473_v33, 6  ;;  %v1931_v17 = vpop.permute.xlu0 %1930  ;;  %v1933_v25 = vpop.permute.xlu1 %1932 }
 0x561   :  { %v1514_v40 = vsel %vm1506_vm12, 1.0, %v1497_v7  ;;  %v1638_v39 = vmul.f32 %v6088_v55, %v7911_v23 }
 0x562   :  { %v1618_v29 = vadd.f32 %v1610_v44, %v1561_v60  ;;  %v1560_v35 = vadd.f32 %v1552_v6, %v1471_v61  ;;  %v1546_v18 = vsel %vm1506_vm12, 0.0, %v1530_v48  ;;  %v1570_v0 = vmul.f32 %v1514_v40, %v1481_v1 }
 0x563   :  { %v1554_v19 = vmul.f32 %v1546_v18, %v1481_v1 }
 0x564   :  { %v1626_v32 = vmul.f32 %v1618_v29, %v8089_v8  ;;  %v1584_v2 = vrot.slane %v1560_v35, 4 }
 0x565   :  { %v1562_v16 = vadd.f32 %v1554_v19, %v1473_v33 }
 0x566   :  { %v1601_v59 = vsel %vm1595_vm13, 0.0, %v1584_v2  ;;  %v1630_v49 = vpack.c.bf16 %v1626_v32, %v8284_v45 }
 0x567   :  { %v1609_v26 = vmul.f32 %v1601_v59, %v1568_v22  ;;  %v1586_v28 = vrot.slane %v1562_v16, 4 }
 0x569   :  { %v1617_v4 = vadd.f32 %v1609_v26, %v1560_v35  ;;  %v1603_v21 = vsel %vm1595_vm13, 0.0, %v1586_v28 }
 0x56a   :  { %v1611_v52 = vmul.f32 %v1603_v21, %v1570_v0 }
 0x56b   :  { %v1625_v56 = vmul.f32 %v1617_v4, %v8109_v20  ;;  %v7099_v20 = vld [vmem:[%s9980_s10 + $0x8] sm:$0xff]   ;;  %v6186_v4 = vld [vmem:[%s9972_s2 + $0x1] ss:$0 sm:$0xff] }
 0x56c   :  { %v1619_v8 = vadd.f32 %v1611_v52, %v1562_v16 }
 0x56d   :  { %v1629_v42 = vpack.c.bf16 %v1625_v56, %v1621_v47 }
 0x56e   :  { %v1627_v58 = vmul.f32 %v1619_v8, %v8093_v10  ;;  %v7100_v10 = vld [vmem:[%s9980_s10 + $0x10] sm:$0xff]   ;;  %v7106_v8 = vld [vmem:[%s9976_s6 + $0x124] ss:$36 sps:$4 sm:$0xff]  }
 0x56f   :  { %1864 = vmatprep.mubr.bf16.mxu0 %v1629_v42  ;;  %v7109_v42 = vld [vmem:[%s9976_s6 + $0x12c] ss:$36 sps:$4 sm:$0xff]  }
 0x570   :  { %1865 = vmatmul.mubr.bf16.vlgmr.msra.gmra.mrb[16].mxu0 %v1628_v46  ;;  %v1631_v45 = vpack.c.bf16 %v1627_v58, %v1623_v14  ;;  %v1639_v14 = vmul.f32 %v6088_v55, %v7913_v24  ;;  %v7107_v58 = vld [vmem:[%s9976_s6 + $0x128] ss:$36 sps:$4 sm:$0xff]   ;;  %v7118_v55 = vld [vmem:[%s9976_s6 + $0x1b4] ss:$36 sps:$4 sm:$0xff]  }
 0x571   :  { %6820 = vmatpush3.bf16.msra.mxu0 %v7098_v9  ;;  %6827 = vmatprep.mubr.msk.bf16.mxu0 %vm7630_vm8, %v7628_v11  ;;  %v7104_v9 = vld [vmem:[%s9976_s6 + $0x120] ss:$36 sps:$4 sm:$0xff]  }
 0x572   :  { %6821 = vmatprep.subr.bf16.mxu0 %v7628_v11  ;;  %1905 = vmatprep.mubr.bf16.mxu1 %v1631_v45  ;;  %v7112_v45 = vld [vmem:[%s9976_s6 + $0x16c] ss:$36 sps:$4 sm:$0xff]  }
 0x573   :  { %1906 = vmatmul.mubr.bf16.vlgmr.msra.gmra.mrb[28].mxu1 %v1630_v49 }
 0x574   :  { %6835 = vmatprep.mubr.msk.bf16.mxu1 %vm7630_vm8, %v7628_v11 }
 0x575   :  { %6822 = vmatpush3.bf16.msra.mxu0 %v7099_v20  ;;  %v7115_v20 = vld [vmem:[%s9976_s6 + $0x174] ss:$36 sps:$4 sm:$0xff]  }
 0x576   :  { %6823 = vmatprep.subr.bf16.mxu0 %v7628_v11 }
 0x579   :  { %6824 = vmatpush3.bf16.msra.mxu0 %v7100_v10  ;;  %v7110_v10 = vld [vmem:[%s9976_s6 + $0x168] ss:$36 sps:$4 sm:$0xff]  }
 0x57a   :  { %6825 = vmatprep.subr.bf16.mxu0 %v7628_v11 }
 0x57d   :  { %6826 = vmatpush3.bf16.msra.mxu0 %v7101_v43  ;;  %v7113_v43 = vld [vmem:[%s9976_s6 + $0x170] ss:$36 sps:$4 sm:$0xff]  }
 0x57e   :  { %2405 = vmatprep.subr.bf16.mxu0 %v7106_v8 }
 0x643   :  { %v6541_v15 = vpop.f32.mrb[16].mxu0 }
 0x644   :  { %v6542_v12 = vpop.f32.mrb[17].mxu0 }
 0x645   :  { %v6543_v41 = vadd.f32 %v6542_v12, %v6541_v15  ;;  %v6544_v47 = vpop.f32.mrb[18].mxu0  ;;  %v7121_v15 = vld [vmem:[%s9976_s6 + $0x1bc] ss:$36 sps:$4 sm:$0xff]   ;;  %v7116_v12 = vld [vmem:[%s9976_s6 + $0x1b0] ss:$36 sps:$4 sm:$0xff]  }
 0x646   :  { %v6545_v60 = vpop.f32.mrb[19].mxu0  ;;  %v6563_v61 = vpop.f32.mrb[28].mxu1 }
 0x647   :  { %v1867_v53 = vadd.f32 %v6543_v41, %v1638_v39  ;;  %v6546_v54 = vadd.f32 %v6545_v60, %v6544_v47  ;;  %v6564_v37 = vpop.f32.mrb[29].mxu1  ;;  %v7119_v39 = vld [vmem:[%s9976_s6 + $0x1b8] ss:$36 sps:$4 sm:$0xff]   ;;  %v7127_v47 = vld [vmem:[%s9976_s6 + $0x204] ss:$36 sps:$4 sm:$0xff]  }
 0x648   :  { %v6565_v27 = vadd.f32 %v6564_v37, %v6563_v61  ;;  %v6566_v62 = vpop.f32.mrb[30].mxu1  ;;  %v7124_v41 = vld [vmem:[%s9976_s6 + $0x1fc] ss:$36 sps:$4 sm:$0xff]  }
 0x649   :  { %v1870_v5 = vadd.f32 %v6546_v54, %v1639_v14  ;;  %v6567_v63 = vpop.f32.mrb[31].mxu1  ;;  %v7122_v60 = vld [vmem:[%s9976_s6 + $0x1f8] ss:$36 sps:$4 sm:$0xff]   ;;  %v7125_v61 = vld [vmem:[%s9976_s6 + $0x200] ss:$36 sps:$4 sm:$0xff]  }
 0x64a   :  { %v1908_v13 = vadd.f32 %v6565_v27, %v1867_v53  ;;  %v6568_v57 = vadd.f32 %v6567_v63, %v6566_v62  ;;  %v7130_v53 = vld [vmem:[%s9976_s6 + $0x134] ss:$36 sps:$4 sm:$0xff]   ;;  %v7133_v14 = vld [vmem:[%s9976_s6 + $0x13c] ss:$36 sps:$4 sm:$0xff]   ;;  %v6133_v62 = vld [vmem:[%s9974_s4 + $0x4] sm:$0xf] }
 0x64c   :  { %v1911_v1 = vadd.f32 %v6568_v57, %v1870_v5  ;;  %v1936_v33 = vmul.f32 %v1931_v17, %v1908_v13  ;;  %v2162_v57 = vrot.slane %v6133_v62, %v7889_v30  ;;  %v2180_v17 = vrot.slane %v6133_v62, %v7897_v36 }
 0x64e   :  { %v1937_v23 = vmul.f32 %v1933_v25, %v1911_v1  ;;  %v2170_v1 = vrot.slane %v6133_v62, %v7891_v31 }
 0x650   :  { %v1938_v44 = vpack.c.bf16 %v1937_v23, %v1936_v33 }
 0x652   :  { %6828 = vmatmul.mubr.msk.bf16.vlgmr.msra.gmra.mrb[20].mxu0 %vm364_vm9, %v1938_v44 }
 0x653   :  { %2437 = vmatprep.mubr.bf16.mxu0 %v7627_v3  ;;  %2406 = vmatpush1.bf16.msra.mxu0 %v7104_v9 }
 0x654   :  { %2407 = vmatprep.subr.bf16.mxu0 %v7112_v45 }
 0x657   :  { %2408 = vmatpush1.bf16.msra.mxu0 %v7110_v10 }
 0x658   :  { %2409 = vmatprep.subr.bf16.mxu0 %v7118_v55 }
 0x65b   :  { %2410 = vmatpush1.bf16.msra.mxu0 %v7116_v12 }
 0x65c   :  { %2411 = vmatprep.subr.bf16.mxu0 %v7124_v41 }
 0x65f   :  { %2412 = vmatpush1.bf16.msra.mxu0 %v7122_v60  ;;  %v7128_v60 = vld [vmem:[%s9976_s6 + $0x130] ss:$36 sps:$4 sm:$0xff]  }
 0x660   :  { %2491 = vmatprep.subr.bf16.mxu0 %v7130_v53 }
 0x725   :  { %v2000_v6 = vpop.f32.mrb[20].mxu0 }
 0x726   :  { %v8346_v24 = vadd.f32 %v2000_v6, %v7807_v51  ;;  %v6829_v46 = vpop.f32.mrb[21].mxu0  ;;  %v7102_v51 = vld [vmem:[%s9973_s3 + $0x10] sm:$0xff]   ;;  %v2190_v6 = vrot.slane %v6133_v62, %v7900_v38  ;;  %v7142_v62 = vld [vmem:[%s9976_s6 + $0x1c4] ss:$36 sps:$4 sm:$0xff]  }
 0x727   :  { %v2003_v48 = vpop.f32.mrb[22].mxu0  ;;  %6832 = vmatpush3.bf16.msra.mxu1 %v7102_v51 }
 0x728   :  { %v8349_v29 = vadd.f32 %v7805_v50, %v2003_v48  ;;  %v6830_v34 = vpop.f32.mrb[23].mxu0  ;;  %v2076_v35 = vmul.f32 %v8346_v24, %v8346_v24  ;;  %v7103_v50 = vld [vmem:[%s9973_s3 + $0x18] sm:$0xff]   ;;  %6833 = vmatprep.subr.bf16.mxu1 %v7628_v11 }
 0x72a   :  { %v2078_v7 = vsel %vm510_vm7, %v2076_v35, 0.0  ;;  %v2077_v18 = vmul.f32 %v8349_v29, %v8349_v29 }
 0x72b   :  { %2079 = vadd.xlane.f32.xlu1 %v2078_v7  ;;  %6834 = vmatpush3.bf16.msra.mxu1 %v7103_v50 }
 0x72c   :  { %v2081_v32 = vsel %vm510_vm7, %v2077_v18, 0.0  ;;  %2448 = vmatprep.subr.bf16.mxu1 %v7109_v42 }
 0x72d   :  { %2082 = vadd.xlane.f32.xlu0 %v2081_v32 }
 0x7b8   :  { %v2080_v2 = vpop.xlane.xlu1 %2079 }
 0x7b9   :  { %v2084_v19 = vmul.f32 0.03125, %v2080_v2 }
 0x7ba   :  { %v2083_v22 = vpop.xlane.xlu0 %2082 }
 0x7bb   :  { %v2086_v59 = vadd.f32 1e-05, %v2084_v19  ;;  %v2085_v40 = vmul.f32 0.03125, %v2083_v22 }
 0x7bd   :  { %7322 = vrsqrt.f32 %v2086_v59  ;;  %v2087_v16 = vadd.f32 1e-05, %v2085_v40  ;;  %v6190_v40 = vld [vmem:[%s9975_s5 + $0x1] ss:$0 sm:$0xff] }
 0x7bf   :  { %7324 = vrsqrt.f32 %v2087_v16 }
 0x7c7   :  { %v7323_v49 = vpop.eup %7322 }
 0x7c8   :  { %v2090_v26 = vmul.f32 %v7323_v49, %v8346_v24 }
 0x7c9   :  { %v7325_v28 = vpop.eup %7324 }
 0x7ca   :  { %v2091_v0 = vmul.f32 %v7325_v28, %v8349_v29  ;;  %v2098_v21 = vmul.f32 %v6186_v4, %v2090_v26 }
 0x7cc   :  { %v2099_v52 = vmul.f32 %v6186_v4, %v2091_v0 }
 0x7ce   :  { %v2100_v56 = vpack.c.bf16 %v2099_v52, %v2098_v21 }
 0x7d0   :  { %6836 = vmatmul.mubr.msk.bf16.vlgmr.msra.gmra.mrb[32].mxu1 %vm510_vm7, %v2100_v56 }
 0x7d1   :  { %2480 = vmatprep.mubr.bf16.mxu1 %v7627_v3  ;;  %2449 = vmatpush1.bf16.msra.mxu1 %v7107_v58 }
 0x7d2   :  { %2450 = vmatprep.subr.bf16.mxu1 %v7115_v20 }
 0x7d5   :  { %2451 = vmatpush1.bf16.msra.mxu1 %v7113_v43 }
 0x7d6   :  { %2452 = vmatprep.subr.bf16.mxu1 %v7121_v15 }
 0x7d9   :  { %2453 = vmatpush1.bf16.msra.mxu1 %v7119_v39 }
 0x7da   :  { %2454 = vmatprep.subr.bf16.mxu1 %v7127_v47 }
 0x7dd   :  { %2455 = vmatpush1.bf16.msra.mxu1 %v7125_v61  ;;  %v7131_v61 = vld [vmem:[%s9976_s6 + $0x138] ss:$36 sps:$4 sm:$0xff]  }
 0x7de   :  { %2534 = vmatprep.subr.bf16.mxu1 %v7133_v14  ;;  %v7136_v14 = vld [vmem:[%s9976_s6 + $0x17c] ss:$36 sps:$4 sm:$0xff]  }
 0x8a3   :  { %v2150_v54 = vpop.f32.mrb[32].mxu1 }
 0x8a4   :  { %2157 = vst.msk [vmem:[#allocation2 + $0x3] sm:$0xff] %vm364_vm9, %v2150_v54  ;;  %v6240_v37 = vmul.f32 -1.442695, %v2150_v54  ;;  %v6837_v27 = vpop.f32.mrb[33].mxu1  ;;  %v2163_v23 = vmul.f32 %v2162_v57, %v2150_v54 }
 0x8a5   :  { %v2153_v5 = vpop.f32.mrb[34].mxu1  ;;  %v7137_v27 = vld [vmem:[%s9976_s6 + $0x180] ss:$36 sps:$4 sm:$0xff]  }
 0x8a6   :  { %7326 = vpow2.f32 %v6240_v37  ;;  %2158 = vst.msk [vmem:[#allocation2 + $0x13] sm:$0xff] %vm364_vm9, %v2153_v5  ;;  %v6241_v63 = vmul.f32 -1.442695, %v2153_v5  ;;  %v6838_v13 = vpop.f32.mrb[35].mxu1  ;;  %v2164_v18 = vmul.f32 %v2162_v57, %v2153_v5  ;;  %v7134_v37 = vld [vmem:[%s9976_s6 + $0x178] ss:$36 sps:$4 sm:$0xff]  }
 0x8a7   :  { %v7143_v13 = vld [vmem:[%s9976_s6 + $0x1c8] ss:$36 sps:$4 sm:$0xff]  }
 0x8a8   :  { %7328 = vpow2.f32 %v6241_v63  ;;  %v7140_v63 = vld [vmem:[%s9976_s6 + $0x1c0] ss:$36 sps:$4 sm:$0xff]   ;;  %v7148_v57 = vld [vmem:[%s9976_s6 + $0x20c] ss:$36 sps:$4 sm:$0xff]  }
 0x8ab   :  { %v2165_v25 = vld [vmem:[#allocation2 + $0x2] sm:$0xff] }
 0x8ac   :  { %v2175_v33 = vld [vmem:[#allocation2 + $0x1] sm:$0xff]  ;;  %v2171_v44 = vmul.f32 %v2170_v1, %v2165_v25  ;;  %v7149_v25 = vld [vmem:[%s9976_s6 + $0x210] ss:$36 sps:$4 sm:$0xff]  }
 0x8ad   :  { %v2185_v46 = vld [vmem:[#allocation2] sm:$0xff]  ;;  %v2166_v48 = vld [vmem:[#allocation2 + $0x12] sm:$0xff]  ;;  %v2181_v7 = vmul.f32 %v2180_v17, %v2175_v33 }
 0x8ae   :  { %v2176_v34 = vld [vmem:[#allocation2 + $0x11] sm:$0xff]  ;;  %v2173_v35 = vadd.f32 %v2171_v44, %v2163_v23  ;;  %v2172_v32 = vmul.f32 %v2170_v1, %v2166_v48  ;;  %v2191_v19 = vmul.f32 %v2190_v6, %v2185_v46  ;;  %v7152_v33 = vld [vmem:[%s9976_s6 + $0x140] ss:$36 sps:$4 sm:$0xff]   ;;  %v7153_v44 = vld [vmem:[%s9976_s6 + $0x188] ss:$36 sps:$4 sm:$0xff]  }
 0x8af   :  { %v2186_v51 = vld [vmem:[#allocation2 + $0x10] sm:$0xff]  ;;  %v2182_v59 = vmul.f32 %v2180_v17, %v2176_v34  ;;  %v7146_v17 = vld [vmem:[%s9976_s6 + $0x208] ss:$36 sps:$4 sm:$0xff]  }
 0x8b0   :  { %v7327_v50 = vpop.eup %7326  ;;  %v2183_v2 = vadd.f32 %v2181_v7, %v2173_v35  ;;  %v2174_v22 = vadd.f32 %v2172_v32, %v2164_v18  ;;  %v2192_v4 = vmul.f32 %v2190_v6, %v2186_v51  ;;  %v7151_v1 = vld [vmem:[%s9976_s6 + $0x214] ss:$36 sps:$4 sm:$0xff]   ;;  %v8515_v6 = vld [vmem:[%s9981_s11] ss:$16 sps:$4 sm:$0xff]   ;;  %v7465_v51 = vld [vmem:[%s9981_s11 + $0xc] ss:$16 sps:$4 sm:$0xff]  }
 0x8b1   :  { %v3211_v16 = vadd.f32 1.0, %v7327_v50  ;;  %v7458_v23 = vld [vmem:[%s9981_s11 + $0x4] ss:$16 sps:$4 sm:$0xff]   ;;  %v8532_v34 = vld [vmem:[%s9981_s11 + $0x20] ss:$16 sps:$4 sm:$0xff]  }
 0x8b2   :  { %v7329_v49 = vpop.eup %7328  ;;  %v2193_v26 = vadd.f32 %v2191_v19, %v2183_v2  ;;  %v2184_v28 = vadd.f32 %v2182_v59, %v2174_v22  ;;  %v8521_v46 = vld [vmem:[%s9981_s11 + $0x24] ss:$16 sps:$4 sm:$0xff]   ;;  %v7155_v7 = vld [vmem:[%s9976_s6 + $0x218] ss:$36 sps:$4 sm:$0xff]   ;;  %v8548_v18 = vld [vmem:[%s9981_s11 + $0x40] ss:$16 sps:$4 sm:$0xff]  }
 0x8b3   :  { %7330 = vrcp.f32 %v3211_v16  ;;  %v3212_v0 = vadd.f32 1.0, %v7329_v49  ;;  %v7154_v48 = vld [vmem:[%s9976_s6 + $0x1d0] ss:$36 sps:$4 sm:$0xff]   ;;  %v8571_v2 = vld [vmem:[%s9981_s11 + $0x8] ss:$16 sps:$4 sm:$0xff]  }
 0x8b4   :  { %v2201_v21 = vadd.f32 %v6190_v40, %v2193_v26  ;;  %v2194_v52 = vadd.f32 %v2192_v4, %v2184_v28  ;;  %v8538_v35 = vld [vmem:[%s9981_s11 + $0x44] ss:$16 sps:$4 sm:$0xff]   ;;  %v8563_v50 = vld [vmem:[%s9981_s11 + $0x60] ss:$16 sps:$4 sm:$0xff]   ;;  %v8578_v19 = vld [vmem:[%s9981_s11 + $0x2c] ss:$16 sps:$4 sm:$0xff]  }
 0x8b5   :  { %7332 = vrcp.f32 %v3212_v0  ;;  %v8554_v32 = vld [vmem:[%s9981_s11 + $0x64] ss:$16 sps:$4 sm:$0xff]   ;;  %v8584_v22 = vld [vmem:[%s9981_s11 + $0x28] ss:$16 sps:$4 sm:$0xff]   ;;  %v8590_v59 = vld [vmem:[%s9981_s11 + $0x4c] ss:$16 sps:$4 sm:$0xff]  }
 0x8b6   :  { %v6191_v56 = vmul.f32 -1.442695, %v2201_v21  ;;  %v2202_v8 = vadd.f32 %v6190_v40, %v2194_v52  ;;  %v8596_v40 = vld [vmem:[%s9981_s11 + $0x48] ss:$16 sps:$4 sm:$0xff]   ;;  %v8602_v16 = vld [vmem:[%s9981_s11 + $0x6c] ss:$16 sps:$4 sm:$0xff]  }
 0x8b7   :  { %v8608_v49 = vld [vmem:[%s9981_s11 + $0x68] ss:$16 sps:$4 sm:$0xff]  }
 0x8b8   :  { %7334 = vpow2.f32 %v6191_v56  ;;  %v6192_v42 = vmul.f32 -1.442695, %v2202_v8 }
 0x8ba   :  { %7336 = vpow2.f32 %v6192_v42 }
 0x8bd   :  { %v7331_v9 = vpop.eup %7330 }
 0x8be   :  { %v3217_v58 = vmul.f32 %v7331_v9, %v2150_v54  ;;  %v7139_v54 = vld [vmem:[%s9976_s6 + $0x184] ss:$36 sps:$4 sm:$0xff]  }
 0x8bf   :  { %v7333_v45 = vpop.eup %7332 }
 0x8c0   :  { %3221 = vrot.lane.b32.xlu0 %v3217_v58, %s7631_s19  ;;  %v3218_v20 = vmul.f32 %v7333_v45, %v2153_v5  ;;  %v7145_v5 = vld [vmem:[%s9976_s6 + $0x1cc] ss:$36 sps:$4 sm:$0xff]  }
 0x8c2   :  { %v7335_v10 = vpop.eup %7334  ;;  %3223 = vrot.lane.b32.xlu1 %v3218_v20, %s7631_s19 }
 0x8c3   :  { %v2209_v43 = vadd.f32 1.0, %v7335_v10 }
 0x8c4   :  { %v7337_v55 = vpop.eup %7336 }
 0x8c5   :  { %7338 = vrcp.f32 %v2209_v43  ;;  %v2210_v15 = vadd.f32 1.0, %v7337_v55 }
 0x8c7   :  { %7340 = vrcp.f32 %v2210_v15  ;;  %v6234_v15 = vld [vmem:[%s9977_s7 + $0x1] ss:$0 sm:$0xff] }
 0x8cf   :  { %v7339_v12 = vpop.eup %7338 }
 0x8d0   :  { %v8439_v41 = vmul.f32 %v7339_v12, %v2201_v21 }
 0x8d1   :  { %v7341_v39 = vpop.eup %7340 }
 0x8d2   :  { %v8441_v47 = vmul.f32 %v7341_v39, %v2202_v8 }
 0x8d4   :  { %v8451_v53 = vpack.c.bf16 %v8441_v47, %v8439_v41 }
 0x8d6   :  { %6229 = vmatmul.mubr.msk.bf16.vlgmr.msra.gmra.mrb[24].mxu0 %vm364_vm9, %v8451_v53  ;;  %6230 = vmatmul.mubr.msk.bf16.vlgmr.msra.gmra.mrb[36].mxu1 %vm364_vm9, %v8451_v53 }
 0x8d7   :  { %2492 = vmatpush1.bf16.msra.mxu0 %v7128_v60  ;;  %2535 = vmatpush1.bf16.msra.mxu1 %v7131_v61 }
 0x8d8   :  { %2493 = vmatprep.subr.bf16.mxu0 %v7136_v14  ;;  %2536 = vmatprep.subr.bf16.mxu1 %v7139_v54 }
 0x8d9   :  { %2523 = vmatprep.mubr.bf16.mxu0 %v7627_v3  ;;  %2566 = vmatprep.mubr.bf16.mxu1 %v7627_v3 }
 0x8db   :  { %2494 = vmatpush1.bf16.msra.mxu0 %v7134_v37  ;;  %2537 = vmatpush1.bf16.msra.mxu1 %v7137_v27 }
 0x8dc   :  { %2495 = vmatprep.subr.bf16.mxu0 %v7142_v62  ;;  %2538 = vmatprep.subr.bf16.mxu1 %v7145_v5 }
 0x8df   :  { %2496 = vmatpush1.bf16.msra.mxu0 %v7140_v63  ;;  %2539 = vmatpush1.bf16.msra.mxu1 %v7143_v13 }
 0x8e0   :  { %2497 = vmatprep.subr.bf16.mxu0 %v7148_v57  ;;  %2540 = vmatprep.subr.bf16.mxu1 %v7151_v1 }
 0x8e3   :  { %2498 = vmatpush1.bf16.msra.mxu0 %v7146_v17  ;;  %2541 = vmatpush1.bf16.msra.mxu1 %v7149_v25 }
 0x8e4   :  { %6839 = vmatprep.subr.bf16.mxu0 %v7628_v11  ;;  %2648 = vmatprep.subr.bf16.mxu1 %v7458_v23 }
 0x8e6   :  { %6231 = vmatmul.mubr.msk.bf16.vlgmr.msra.gmra.mrb[28].mxu0 %vm364_vm9, %v8451_v53  ;;  %6232 = vmatmul.mubr.msk.bf16.vlgmr.msra.gmra.mrb[40].mxu1 %vm364_vm9, %v8451_v53 }
 0x8e7   :  { %6840 = vmatpush3.bf16.msra.mxu0 %v7152_v33  ;;  %6847 = vmatprep.mubr.msk.bf16.mxu0 %vm7630_vm8, %v7628_v11 }
 0x8e8   :  { %6841 = vmatprep.subr.bf16.mxu0 %v7628_v11  ;;  %2649 = vmatpush1.bf16.msra.mxu1 %v8515_v6 }
 0x8e9   :  { %2650 = vmatprep.subr.bf16.mxu1 %v8521_v46  ;;  %2680 = vmatprep.mubr.bf16.mxu1 %v7627_v3 }
 0x8eb   :  { %6842 = vmatpush3.bf16.msra.mxu0 %v7153_v44 }
 0x8ec   :  { %6843 = vmatprep.subr.bf16.mxu0 %v7628_v11  ;;  %2651 = vmatpush1.bf16.msra.mxu1 %v8532_v34 }
 0x8ed   :  { %2652 = vmatprep.subr.bf16.mxu1 %v8538_v35 }
 0x8ef   :  { %6844 = vmatpush3.bf16.msra.mxu0 %v7154_v48 }
 0x8f0   :  { %6845 = vmatprep.subr.bf16.mxu0 %v7628_v11  ;;  %2653 = vmatpush1.bf16.msra.mxu1 %v8548_v18 }
 0x8f1   :  { %2654 = vmatprep.subr.bf16.mxu1 %v8554_v32 }
 0x8f3   :  { %6846 = vmatpush3.bf16.msra.mxu0 %v7155_v7 }
 0x8f4   :  { %2691 = vmatprep.subr.bf16.mxu0 %v7465_v51  ;;  %2655 = vmatpush1.bf16.msra.mxu1 %v8563_v50 }
 0x8f5   :  { %2740 = vmatprep.subr.bf16.mxu1 %v7458_v23 }
 0x8f6   :  { %6848 = vmatmul.mubr.msk.bf16.vlgmr.msra.gmra.mrb[32].mxu0 %vm364_vm9, %v8451_v53 }
 0x8f7   :  { %2692 = vmatpush1.bf16.msra.mxu0 %v8571_v2  ;;  %2723 = vmatprep.mubr.bf16.mxu0 %v7627_v3 }
 0x8f8   :  { %2693 = vmatprep.subr.bf16.mxu0 %v8578_v19 }
 0x8fb   :  { %2694 = vmatpush1.bf16.msra.mxu0 %v8584_v22 }
 0x8fc   :  { %2695 = vmatprep.subr.bf16.mxu0 %v8590_v59 }
 0x8ff   :  { %2696 = vmatpush1.bf16.msra.mxu0 %v8596_v40 }
 0x900   :  { %2697 = vmatprep.subr.bf16.mxu0 %v8602_v16 }
 0x903   :  { %2698 = vmatpush1.bf16.msra.mxu0 %v8608_v49 }
 0x904   :  { %2783 = vmatprep.subr.bf16.mxu0 %v7465_v51 }
 0x9a9   :  { %v8611_v26 = vpop.f32.mrb[24].mxu0  ;;  %v8613_v28 = vpop.f32.mrb[36].mxu1 }
 0x9aa   :  { %v8615_v4 = vpop.f32.mrb[25].mxu0  ;;  %v8617_v0 = vpop.f32.mrb[37].mxu1 }
 0x9ab   :  { %v8619_v21 = vpop.f32.mrb[26].mxu0  ;;  %v8621_v52 = vpop.f32.mrb[38].mxu1 }
 0x9ac   :  { %v8623_v56 = vpop.f32.mrb[27].mxu0  ;;  %v8625_v8 = vpop.f32.mrb[39].mxu1 }
 0x9b9   :  { %v8627_v42 = vpop.f32.mrb[28].mxu0  ;;  %v8629_v9 = vpop.f32.mrb[40].mxu1 }
 0x9ba   :  { %v8631_v58 = vpop.f32.mrb[29].mxu0  ;;  %v8633_v45 = vpop.f32.mrb[41].mxu1 }
 0x9bb   :  { %v8635_v20 = vpop.f32.mrb[30].mxu0  ;;  %v8637_v10 = vpop.f32.mrb[42].mxu1 }
 0x9bc   :  { %v8639_v43 = vpop.f32.mrb[31].mxu0  ;;  %v8641_v55 = vpop.f32.mrb[43].mxu1 }
 0x9c9   :  { %v2611_v12 = vpop.f32.mrb[32].mxu0 }
 0x9ca   :  { %v2624_v39 = vadd.f32 %v6234_v15, %v2611_v12  ;;  %v6849_v60 = vpop.f32.mrb[33].mxu0 }
 0x9cb   :  { %v2614_v61 = vpop.f32.mrb[34].mxu0 }
 0x9cc   :  { %v2628_v53 = vand.u32 2147483647, %v2624_v39  ;;  %v2625_v14 = vadd.f32 %v6234_v15, %v2614_v61  ;;  %v6850_v54 = vpop.f32.mrb[35].mxu0  ;;  %v2626_v33 = vmax.f32 %v2624_v39, 0.0  ;;  %v7488_v39 = vld [vmem:[%s9982_s12 + $0x18] sm:$0xff]  }
 0x9cd   :  { %v7490_v54 = vld [vmem:[%s9982_s12 + $0x60] sm:$0xff]  }
 0x9ce   :  { %v2630_v37 = vsub.f32 0.0, %v2628_v53  ;;  %v2629_v27 = vand.u32 2147483647, %v2625_v14  ;;  %v2627_v7 = vmax.f32 %v2625_v14, 0.0  ;;  %v7489_v14 = vld [vmem:[%s9982_s12 + $0x98] sm:$0xff]  }
 0x9d0   :  { %v2632_v62 = vmul.f32 1.442695, %v2630_v37  ;;  %v2631_v5 = vsub.f32 0.0, %v2629_v27  ;;  %v7491_v37 = vld [vmem:[%s9982_s12 + $0xe0] sm:$0xff]  }
 0x9d1   :  { %v7492_v27 = vld [vmem:[%s9982_s12 + $0x20] sm:$0xff]  }
 0x9d2   :  { %7342 = vpow2.f32 %v2632_v62  ;;  %v2634_v63 = vmul.f32 1.442695, %v2631_v5  ;;  %v7493_v62 = vld [vmem:[%s9982_s12 + $0xa0] sm:$0xff]   ;;  %v7494_v5 = vld [vmem:[%s9982_s12 + $0x68] sm:$0xff]  }
 0x9d4   :  { %7344 = vpow2.f32 %v2634_v63  ;;  %v7495_v63 = vld [vmem:[%s9982_s12 + $0xe8] sm:$0xff]  }
 0x9dc   :  { %v7343_v13 = vpop.eup %7342 }
 0x9dd   :  { %v2636_v57 = vadd.f32 1.0, %v7343_v13  ;;  %v7496_v13 = vld [vmem:[%s9982_s12 + $0x28] sm:$0xff]  }
 0x9de   :  { %v7345_v1 = vpop.eup %7344 }
 0x9df   :  { %7346 = vlog2.f32 %v2636_v57  ;;  %v2637_v17 = vadd.f32 1.0, %v7345_v1  ;;  %v7497_v57 = vld [vmem:[%s9982_s12 + $0xa8] sm:$0xff]   ;;  %v7498_v1 = vld [vmem:[%s9982_s12 + $0x70] sm:$0xff]  }
 0x9e1   :  { %7348 = vlog2.f32 %v2637_v17  ;;  %v7499_v17 = vld [vmem:[%s9982_s12 + $0xf0] sm:$0xff]  }
 0x9e9   :  { %v7347_v25 = vpop.eup %7346 }
 0x9ea   :  { %v2639_v23 = vmul.f32 0.6931472, %v7347_v25  ;;  %v7500_v25 = vld [vmem:[%s9982_s12 + $0x30] sm:$0xff]  }
 0x9eb   :  { %v7349_v44 = vpop.eup %7348 }
 0x9ec   :  { %v2642_v48 = vadd.f32 %v2639_v23, %v2626_v33  ;;  %v2641_v51 = vmul.f32 0.6931472, %v7349_v44  ;;  %v7501_v33 = vld [vmem:[%s9982_s12 + $0xb0] sm:$0xff]   ;;  %v7502_v23 = vld [vmem:[%s9982_s12 + $0x78] sm:$0xff]  }
 0x9ed   :  { %v7503_v44 = vld [vmem:[%s9982_s12 + $0xf8] sm:$0xff]  }
 0x9ee   :  { %v2643_v15 = vadd.f32 %v2641_v51, %v2627_v7  ;;  %v2734_v12 = vmul.f32 %v2642_v48, %v8439_v41  ;;  %v7505_v7 = vld [vmem:[%s9982_s12 + $0xb8] sm:$0xff]   ;;  %v6176_v51 = vld [vmem:[%s9978_s8 + $0x4] sm:$0xf] }
 0x9f0   :  { %v2644_v60 = vpack.c.bf16 %v2643_v15, %v2642_v48  ;;  %v2735_v61 = vmul.f32 %v2643_v15, %v8441_v47  ;;  %v7504_v48 = vld [vmem:[%s9982_s12 + $0x38] sm:$0xff]   ;;  %v2830_v15 = vrot.slane %v6176_v51, %v7900_v38 }
 0x9f2   :  { %v2736_v53 = vpack.c.bf16 %v2735_v61, %v2734_v12  ;;  %6235 = vmatmul.mubr.msk.bf16.vlgmr.msra.gmra.mrb[44].mxu1 %vm364_vm9, %v2644_v60  ;;  %6236 = vmatmul.mubr.msk.bf16.vlgmr.msra.gmra.mrb[36].mxu0 %vm364_vm9, %v2644_v60  ;;  %v2838_v12 = vrot.slane %v6176_v51, %v7891_v31  ;;  %v2834_v60 = vrot.slane %v6176_v51, %v7897_v36 }
 0x9f3   :  { %2741 = vmatpush1.bf16.msra.mxu1 %v8515_v6  ;;  %2784 = vmatpush1.bf16.msra.mxu0 %v8571_v2  ;;  %v7474_v6 = vld [vmem:[%s9982_s12 + $0x40] sm:$0xff]   ;;  %v7481_v2 = vld [vmem:[%s9982_s12 + $0x88] sm:$0xff]   ;;  %v2842_v61 = vrot.slane %v6176_v51, %v7889_v30 }
 0x9f4   :  { %2742 = vmatprep.subr.bf16.mxu1 %v8521_v46  ;;  %2785 = vmatprep.subr.bf16.mxu0 %v8578_v19  ;;  %v7475_v46 = vld [vmem:[%s9982_s12 + $0xc0] sm:$0xff]   ;;  %v7482_v19 = vld [vmem:[%s9982_s12 + $0x50] sm:$0xff]  }
 0x9f5   :  { %2772 = vmatprep.mubr.bf16.mxu1 %v7627_v3  ;;  %2815 = vmatprep.mubr.bf16.mxu0 %v7627_v3 }
 0x9f7   :  { %2743 = vmatpush1.bf16.msra.mxu1 %v8532_v34  ;;  %2786 = vmatpush1.bf16.msra.mxu0 %v8584_v22  ;;  %v7476_v34 = vld [vmem:[%s9982_s12] sm:$0xff]   ;;  %v7483_v22 = vld [vmem:[%s9982_s12 + $0xd0] sm:$0xff]  }
 0x9f8   :  { %2744 = vmatprep.subr.bf16.mxu1 %v8538_v35  ;;  %2787 = vmatprep.subr.bf16.mxu0 %v8590_v59  ;;  %v7477_v35 = vld [vmem:[%s9982_s12 + $0x80] sm:$0xff]   ;;  %v7484_v59 = vld [vmem:[%s9982_s12 + $0x10] sm:$0xff]  }
 0x9fb   :  { %2745 = vmatpush1.bf16.msra.mxu1 %v8548_v18  ;;  %2788 = vmatpush1.bf16.msra.mxu0 %v8596_v40  ;;  %v7478_v18 = vld [vmem:[%s9982_s12 + $0x48] sm:$0xff]   ;;  %v7485_v40 = vld [vmem:[%s9982_s12 + $0x90] sm:$0xff]  }
 0x9fc   :  { %2746 = vmatprep.subr.bf16.mxu1 %v8554_v32  ;;  %2789 = vmatprep.subr.bf16.mxu0 %v8602_v16  ;;  %v7479_v32 = vld [vmem:[%s9982_s12 + $0xc8] sm:$0xff]   ;;  %v7486_v16 = vld [vmem:[%s9982_s12 + $0x58] sm:$0xff]  }
 0x9ff   :  { %2747 = vmatpush1.bf16.msra.mxu1 %v8563_v50  ;;  %2790 = vmatpush1.bf16.msra.mxu0 %v8608_v49  ;;  %v7480_v50 = vld [vmem:[%s9982_s12 + $0x8] sm:$0xff]   ;;  %v7487_v49 = vld [vmem:[%s9982_s12 + $0xd8] sm:$0xff]  }
 0xa00   :  { %6582 = vmatprep.subr.bf16.mxu1 %v7474_v6  ;;  %6604 = vmatprep.subr.bf16.mxu0 %v7475_v46 }
 0xa02   :  { %6237 = vmatmul.mubr.msk.bf16.vlgmr.msra.gmra.mrb[48].mxu1 %vm364_vm9, %v2736_v53  ;;  %6238 = vmatmul.mubr.msk.bf16.vlgmr.msra.gmra.mrb[40].mxu0 %vm364_vm9, %v2736_v53 }
 0xa03   :  { %6583 = vmatpush3.bf16.msra.mxu1 %v7476_v34  ;;  %6605 = vmatpush3.bf16.msra.mxu0 %v7477_v35 }
 0xa04   :  { %6584 = vmatprep.subr.bf16.mxu1 %v7478_v18  ;;  %6606 = vmatprep.subr.bf16.mxu0 %v7479_v32 }
 0xa07   :  { %6585 = vmatpush3.bf16.msra.mxu1 %v7480_v50  ;;  %6607 = vmatpush3.bf16.msra.mxu0 %v7481_v2 }
 0xa08   :  { %6586 = vmatprep.subr.bf16.mxu1 %v7482_v19  ;;  %6608 = vmatprep.subr.bf16.mxu0 %v7483_v22 }
 0xa0b   :  { %6587 = vmatpush3.bf16.msra.mxu1 %v7484_v59  ;;  %6609 = vmatpush3.bf16.msra.mxu0 %v7485_v40 }
 0xa0c   :  { %6588 = vmatprep.subr.bf16.mxu1 %v7486_v16  ;;  %6610 = vmatprep.subr.bf16.mxu0 %v7487_v49 }
 0xa0f   :  { %6589 = vmatpush3.bf16.msra.mxu1 %v7488_v39  ;;  %6611 = vmatpush3.bf16.msra.mxu0 %v7489_v14 }
 0xa10   :  { %6590 = vmatprep.subr.bf16.mxu1 %v7490_v54  ;;  %6612 = vmatprep.subr.bf16.mxu0 %v7491_v37 }
 0xa13   :  { %6591 = vmatpush3.bf16.msra.mxu1 %v7492_v27  ;;  %6613 = vmatpush3.bf16.msra.mxu0 %v7493_v62 }
 0xa14   :  { %6592 = vmatprep.subr.bf16.mxu1 %v7494_v5  ;;  %6614 = vmatprep.subr.bf16.mxu0 %v7495_v63 }
 0xa17   :  { %6593 = vmatpush3.bf16.msra.mxu1 %v7496_v13  ;;  %6615 = vmatpush3.bf16.msra.mxu0 %v7497_v57 }
 0xa18   :  { %6594 = vmatprep.subr.bf16.mxu1 %v7498_v1  ;;  %6616 = vmatprep.subr.bf16.mxu0 %v7499_v17 }
 0xa1b   :  { %6595 = vmatpush3.bf16.msra.mxu1 %v7500_v25  ;;  %6617 = vmatpush3.bf16.msra.mxu0 %v7501_v33 }
 0xa1c   :  { %6596 = vmatprep.subr.bf16.mxu1 %v7502_v23  ;;  %6618 = vmatprep.subr.bf16.mxu0 %v7503_v44 }
 0xa1f   :  { %6597 = vmatpush3.bf16.msra.mxu1 %v7504_v48  ;;  %6619 = vmatpush3.bf16.msra.mxu0 %v7505_v7 }
 0xa20   :  { %6851 = vmatprep.subr.bf16.mxu1 %v7628_v11  ;;  %6863 = vmatprep.subr.bf16.mxu0 %v7628_v11 }
 0xac5   :  { %v2682_v53 = vpop.f32.mrb[44].mxu1  ;;  %v2725_v6 = vpop.f32.mrb[36].mxu0 }
 0xac6   :  { %v2847_v46 = vmul.f32 %v2830_v15, %v2682_v53  ;;  %v2849_v34 = vmul.f32 %v2838_v12, %v2725_v6  ;;  %v2684_v35 = vpop.f32.mrb[45].mxu1  ;;  %v2727_v18 = vpop.f32.mrb[37].mxu0 }
 0xac7   :  { %v2848_v32 = vmul.f32 %v2834_v60, %v2684_v35  ;;  %v2850_v50 = vmul.f32 %v2842_v61, %v2727_v18  ;;  %v2686_v2 = vpop.f32.mrb[46].mxu1  ;;  %v2729_v19 = vpop.f32.mrb[38].mxu0 }
 0xac8   :  { %v2855_v22 = vmul.f32 1.442695, %v2847_v46  ;;  %v2859_v59 = vmul.f32 1.442695, %v2849_v34  ;;  %v2688_v40 = vpop.f32.mrb[47].mxu1  ;;  %v2731_v16 = vpop.f32.mrb[39].mxu0  ;;  %v2851_v14 = vmul.f32 %v2830_v15, %v2686_v2  ;;  %v2853_v54 = vmul.f32 %v2838_v12, %v2729_v19 }
 0xac9   :  { %v2857_v49 = vmul.f32 1.442695, %v2848_v32  ;;  %v2861_v39 = vmul.f32 1.442695, %v2850_v50  ;;  %v2852_v37 = vmul.f32 %v2834_v60, %v2688_v40  ;;  %v2854_v5 = vmul.f32 %v2842_v61, %v2731_v16 }
 0xaca   :  { %7350 = vpow2.f32 %v2855_v22  ;;  %v2863_v27 = vmul.f32 1.442695, %v2851_v14  ;;  %v2867_v62 = vmul.f32 1.442695, %v2853_v54 }
 0xacb   :  { %7352 = vpow2.f32 %v2859_v59  ;;  %v2865_v63 = vmul.f32 1.442695, %v2852_v37  ;;  %v2869_v1 = vmul.f32 1.442695, %v2854_v5 }
 0xacc   :  { %7354 = vpow2.f32 %v2857_v49 }
 0xacd   :  { %7356 = vpow2.f32 %v2861_v39 }
 0xace   :  { %7358 = vpow2.f32 %v2863_v27 }
 0xacf   :  { %7360 = vpow2.f32 %v2867_v62 }
 0xad0   :  { %7362 = vpow2.f32 %v2865_v63 }
 0xad1   :  { %7364 = vpow2.f32 %v2869_v1 }
 0xad4   :  { %v7351_v13 = vpop.eup %7350 }
 0xad5   :  { %v7353_v57 = vpop.eup %7352  ;;  %v2774_v17 = vpop.f32.mrb[48].mxu1  ;;  %v2887_v25 = vrot.slane %v7351_v13, 7 }
 0xad6   :  { %v2817_v33 = vpop.f32.mrb[40].mxu0  ;;  %v7355_v23 = vpop.eup %7354  ;;  %v2871_v44 = vmul.f32 %v2774_v17, %v8611_v26  ;;  %v2889_v7 = vrot.slane %v7353_v57, 7 }
 0xad7   :  { %v2873_v48 = vmul.f32 %v2817_v33, %v8613_v28  ;;  %v2776_v51 = vpop.f32.mrb[49].mxu1  ;;  %v2819_v15 = vpop.f32.mrb[41].mxu0  ;;  %v2903_v60 = vsel %vm1417_vm11, 1.0, %v2887_v25  ;;  %v2888_v53 = vrot.slane %v7355_v23, 7 }
 0xad8   :  { %v7357_v12 = vpop.eup %7356  ;;  %v2872_v61 = vmul.f32 %v2776_v51, %v8615_v4  ;;  %v2874_v6 = vmul.f32 %v2819_v15, %v8617_v0  ;;  %v2778_v46 = vpop.f32.mrb[50].mxu1  ;;  %v2919_v35 = vrot.slane %v2871_v44, 7  ;;  %v2959_v18 = vmul.f32 %v7351_v13, %v2903_v60 }
 0xad9   :  { %v2821_v34 = vpop.f32.mrb[42].mxu0  ;;  %v2905_v32 = vsel %vm1417_vm11, 1.0, %v2889_v7  ;;  %v2921_v26 = vrot.slane %v2873_v48, 7  ;;  %v8779_v50 = vpop.f32.mrb[51].mxu1  ;;  %v2904_v19 = vsel %vm1417_vm11, 1.0, %v2888_v53  ;;  %v2890_v59 = vrot.slane %v7357_v12, 7 }
 0xada   :  { %v8781_v28 = vpop.f32.mrb[43].mxu0  ;;  %v2961_v2 = vmul.f32 %v7353_v57, %v2905_v32  ;;  %v2920_v22 = vrot.slane %v2872_v61, 7  ;;  %v2935_v4 = vsel %vm1417_vm11, 0.0, %v2919_v35  ;;  %v2975_v40 = vrot.slane %v2959_v18, 6  ;;  %v7359_v63 = vpop.eup %7358 }
 0xadb   :  { %v2937_v0 = vsel %vm1417_vm11, 0.0, %v2921_v26  ;;  %v2960_v16 = vmul.f32 %v7355_v23, %v2904_v19  ;;  %v2943_v49 = vmul.f32 %v7351_v13, %v2935_v4  ;;  %v2906_v5 = vsel %vm1417_vm11, 1.0, %v2890_v59 }
 0xadc   :  { %v2945_v39 = vmul.f32 %v7353_v57, %v2937_v0  ;;  %v2977_v14 = vrot.slane %v2961_v2, 6  ;;  %v2936_v54 = vsel %vm1417_vm11, 0.0, %v2920_v22  ;;  %v2991_v37 = vsel %vm1506_vm12, 1.0, %v2975_v40  ;;  %v7361_v57 = vpop.eup %7360 }
 0xadd   :  { %v2944_v27 = vmul.f32 %v7355_v23, %v2936_v54  ;;  %v2976_v62 = vrot.slane %v2960_v16, 6  ;;  %v2951_v17 = vadd.f32 %v2943_v49, %v2871_v44  ;;  %v3047_v7 = vmul.f32 %v2991_v37, %v2959_v18  ;;  %v8791_v23 = vpop.eup %7362 }
 0xade   :  { %v2953_v25 = vadd.f32 %v2945_v39, %v2873_v48  ;;  %v2993_v33 = vsel %vm1506_vm12, 1.0, %v2977_v14  ;;  %v2922_v13 = vrot.slane %v2874_v6, 7  ;;  %v2962_v32 = vmul.f32 %v7357_v12, %v2906_v5 }
 0xadf   :  { %v3049_v51 = vmul.f32 %v2993_v33, %v2961_v2  ;;  %v2952_v15 = vadd.f32 %v2944_v27, %v2872_v61  ;;  %v3007_v60 = vrot.slane %v2951_v17, 6  ;;  %v2992_v35 = vsel %vm1506_vm12, 1.0, %v2976_v62 }
 0xae0   :  { %v3009_v53 = vrot.slane %v2953_v25, 6  ;;  %v2938_v19 = vsel %vm1417_vm11, 0.0, %v2922_v13  ;;  %v2875_v1 = vmul.f32 %v2778_v46, %v8619_v21  ;;  %v2891_v44 = vrot.slane %v7359_v63, 7 }
 0xae1   :  { %v3008_v26 = vrot.slane %v2952_v15, 6  ;;  %v3023_v48 = vsel %vm1506_vm12, 0.0, %v3007_v60  ;;  %v2946_v61 = vmul.f32 %v7357_v12, %v2938_v19  ;;  %v2978_v59 = vrot.slane %v2962_v32, 6 }
 0xae2   :  { %v3025_v22 = vsel %vm1506_vm12, 0.0, %v3009_v53  ;;  %v3031_v4 = vmul.f32 %v3023_v48, %v2959_v18  ;;  %v2907_v49 = vsel %vm1417_vm11, 1.0, %v2891_v44  ;;  %v3048_v14 = vmul.f32 %v2992_v35, %v2960_v16 }
 0xae3   :  { %v3033_v40 = vmul.f32 %v3025_v22, %v2961_v2  ;;  %v3024_v0 = vsel %vm1506_vm12, 0.0, %v3008_v26  ;;  %v2954_v54 = vadd.f32 %v2946_v61, %v2874_v6  ;;  %v2923_v37 = vrot.slane %v2875_v1, 7  ;;  %v8802_v26 = vpop.eup %7364 }
 0xae4   :  { %v3032_v39 = vmul.f32 %v3024_v0, %v2960_v16  ;;  %v3039_v27 = vadd.f32 %v3031_v4, %v2951_v17  ;;  %v2994_v21 = vsel %vm1506_vm12, 1.0, %v2978_v59  ;;  %v2963_v46 = vmul.f32 %v7359_v63, %v2907_v49 }
 0xae5   :  { %v3041_v62 = vadd.f32 %v3033_v40, %v2953_v25  ;;  %v3010_v33 = vrot.slane %v2954_v54, 6  ;;  %v2939_v12 = vsel %vm1417_vm11, 0.0, %v2923_v37  ;;  %v2877_v18 = vmul.f32 %v2821_v34, %v8621_v52 }
 0xae6   :  { %v3040_v5 = vadd.f32 %v3032_v39, %v2952_v15  ;;  %v3063_v2 = vrot.slane %v3039_v27, 4  ;;  %v2947_v60 = vmul.f32 %v7359_v63, %v2939_v12  ;;  %v2979_v53 = vrot.slane %v2963_v46, 6 }
 0xae7   :  { %v3065_v13 = vrot.slane %v3041_v62, 4  ;;  %v3026_v6 = vsel %vm1506_vm12, 0.0, %v3010_v33  ;;  %v2893_v17 = vrot.slane %v7361_v57, 7  ;;  %v2925_v25 = vrot.slane %v2877_v18, 7 }
 0xae8   :  { %v3064_v16 = vrot.slane %v3040_v5, 4  ;;  %v3079_v35 = vsel %vm1595_vm13, 0.0, %v3063_v2  ;;  %v3034_v19 = vmul.f32 %v3026_v6, %v2962_v32  ;;  %v2955_v44 = vadd.f32 %v2947_v60, %v2875_v1 }
 0xae9   :  { %v3081_v15 = vsel %vm1595_vm13, 0.0, %v3065_v13  ;;  %v3087_v48 = vmul.f32 %v3079_v35, %v3047_v7  ;;  %v3050_v34 = vmul.f32 %v2994_v21, %v2962_v32  ;;  %v2995_v59 = vsel %vm1506_vm12, 1.0, %v2979_v53 }
 0xaea   :  { %v3089_v22 = vmul.f32 %v3081_v15, %v3049_v51  ;;  %v3080_v52 = vsel %vm1595_vm13, 0.0, %v3064_v16  ;;  %v3042_v61 = vadd.f32 %v3034_v19, %v2954_v54  ;;  %v3011_v4 = vrot.slane %v2955_v44, 6 }
 0xaeb   :  { %v3088_v63 = vmul.f32 %v3080_v52, %v3048_v14  ;;  %v3095_v40 = vadd.f32 %v3087_v48, %v3039_v27  ;;  %v2909_v49 = vsel %vm1417_vm11, 1.0, %v2893_v17  ;;  %v2941_v39 = vsel %vm1417_vm11, 0.0, %v2925_v25 }
 0xaec   :  { %v3097_v0 = vadd.f32 %v3089_v22, %v3041_v62  ;;  %v3066_v33 = vrot.slane %v3042_v61, 4  ;;  %v3027_v1 = vsel %vm1506_vm12, 0.0, %v3011_v4  ;;  %v2949_v7 = vmul.f32 %v7361_v57, %v2941_v39 }
 0xaed   :  { %v3096_v37 = vadd.f32 %v3088_v63, %v3040_v5  ;;  %v8813_v51 = vmul.f32 %v3095_v40, %v8627_v42  ;;  %v3035_v14 = vmul.f32 %v3027_v1, %v2963_v46  ;;  %v2965_v54 = vmul.f32 %v7361_v57, %v2909_v49 }
 0xaee   :  { %v8816_v32 = vmul.f32 %v3097_v0, %v8629_v9  ;;  %v3082_v27 = vsel %vm1595_vm13, 0.0, %v3066_v33  ;;  %v2957_v62 = vadd.f32 %v2949_v7, %v2877_v18  ;;  %v2876_v21 = vmul.f32 %v8779_v50, %v8623_v56 }
 0xaef   :  { %v2892_v5 = vrot.slane %v8791_v23, 7  ;;  %v3090_v12 = vmul.f32 %v3082_v27, %v3050_v34  ;;  %v3043_v2 = vadd.f32 %v3035_v14, %v2955_v44  ;;  %v2981_v13 = vrot.slane %v2965_v54, 6 }
 0xaf0   :  { %v2878_v42 = vmul.f32 %v8781_v28, %v8625_v8  ;;  %v3013_v60 = vrot.slane %v2957_v62, 6  ;;  %v2924_v53 = vrot.slane %v2876_v21, 7  ;;  %v2894_v6 = vrot.slane %v8802_v26, 7 }
 0xaf1   :  { %v3098_v9 = vadd.f32 %v3090_v12, %v3042_v61  ;;  %v3067_v16 = vrot.slane %v3043_v2, 4  ;;  %v2908_v57 = vsel %vm1417_vm11, 1.0, %v2892_v5  ;;  %v3051_v18 = vmul.f32 %v2995_v59, %v2963_v46 }
 0xaf2   :  { %v3029_v17 = vsel %vm1506_vm12, 0.0, %v3013_v60  ;;  %v2940_v56 = vsel %vm1417_vm11, 0.0, %v2924_v53  ;;  %v2997_v25 = vsel %vm1506_vm12, 1.0, %v2981_v13  ;;  %v2964_v15 = vmul.f32 %v8791_v23, %v2908_v57 }
 0xaf3   :  { %v3083_v50 = vsel %vm1595_vm13, 0.0, %v3067_v16  ;;  %v3037_v35 = vmul.f32 %v3029_v17, %v2965_v54  ;;  %v2948_v8 = vmul.f32 %v8791_v23, %v2940_v56  ;;  %v2926_v19 = vrot.slane %v2878_v42, 7  ;;  %v7156_v56 = vld [vmem:[%s9980_s10 + $0x20] sm:$0xff]  }
 0xaf4   :  { %v3091_v28 = vmul.f32 %v3083_v50, %v3051_v18  ;;  %v3104_v44 = vmul.f32 %v3096_v37, %v8631_v58  ;;  %v2910_v46 = vsel %vm1417_vm11, 1.0, %v2894_v6  ;;  %v3106_v52 = vmul.f32 %v3098_v9, %v8633_v45 }
 0xaf5   :  { %v3045_v48 = vadd.f32 %v3037_v35, %v2957_v62  ;;  %v2956_v22 = vadd.f32 %v2948_v8, %v2876_v21  ;;  %v2942_v63 = vsel %vm1417_vm11, 0.0, %v2926_v19  ;;  %v3053_v0 = vmul.f32 %v2997_v25, %v2965_v54  ;;  %v7159_v25 = vld [vmem:[%s9980_s10 + $0x38] sm:$0xff]   ;;  %v6239_v35 = vld [vmem:[%s9979_s9 + $0x1] ss:$0 sm:$0xff] }
 0xaf6   :  { %v3099_v34 = vadd.f32 %v3091_v28, %v3043_v2  ;;  %v2950_v4 = vmul.f32 %v8802_v26, %v2942_v63  ;;  %v2980_v23 = vrot.slane %v2964_v15, 6  ;;  %v2966_v49 = vmul.f32 %v8802_v26, %v2910_v46 }
 0xaf7   :  { %v3069_v61 = vrot.slane %v3045_v48, 4  ;;  %v3012_v59 = vrot.slane %v2956_v22, 6 }
 0xaf8   :  { %v3107_v40 = vmul.f32 %v3099_v34, %v8635_v20  ;;  %v2958_v37 = vadd.f32 %v2950_v4, %v2878_v42  ;;  %v2996_v27 = vsel %vm1506_vm12, 1.0, %v2980_v23  ;;  %v2982_v21 = vrot.slane %v2966_v49, 6 }
 0xaf9   :  { %v3085_v58 = vsel %vm1595_vm13, 0.0, %v3069_v61  ;;  %v3028_v39 = vsel %vm1506_vm12, 0.0, %v3012_v59  ;;  %v3052_v12 = vmul.f32 %v2996_v27, %v2964_v15 }
 0xafa   :  { %v3093_v33 = vmul.f32 %v3085_v58, %v3053_v0  ;;  %v3036_v45 = vmul.f32 %v3028_v39, %v2964_v15  ;;  %v3111_v1 = vpack.c.bf16 %v3107_v40, %v8813_v51  ;;  %v3014_v7 = vrot.slane %v2958_v37, 6  ;;  %v3222_v58 = vpop.permute.xlu0 %3221  ;;  %v3224_v39 = vpop.permute.xlu1 %3223 }
 0xafb   :  { %v2998_v13 = vsel %vm1506_vm12, 1.0, %v2982_v21  ;;  %v3121_v15 = vmul.f32 %v6239_v35, %v8439_v41 }
 0xafc   :  { %v3101_v14 = vadd.f32 %v3093_v33, %v3045_v48  ;;  %v3044_v62 = vadd.f32 %v3036_v45, %v2956_v22  ;;  %v3030_v20 = vsel %vm1506_vm12, 0.0, %v3014_v7  ;;  %v3054_v16 = vmul.f32 %v2998_v13, %v2966_v49 }
 0xafd   :  { %v3038_v5 = vmul.f32 %v3030_v20, %v2966_v49 }
 0xafe   :  { %v3109_v54 = vmul.f32 %v3101_v14, %v8637_v10  ;;  %v3068_v26 = vrot.slane %v3044_v62, 4 }
 0xaff   :  { %v3046_v42 = vadd.f32 %v3038_v5, %v2958_v37 }
 0xb00   :  { %v3084_v2 = vsel %vm1595_vm13, 0.0, %v3068_v26  ;;  %v3113_v51 = vpack.c.bf16 %v3109_v54, %v8816_v32 }
 0xb01   :  { %v3092_v60 = vmul.f32 %v3084_v2, %v3052_v12  ;;  %v3070_v53 = vrot.slane %v3046_v42, 4 }
 0xb03   :  { %v3100_v9 = vadd.f32 %v3092_v60, %v3044_v62  ;;  %v3086_v57 = vsel %vm1595_vm13, 0.0, %v3070_v53 }
 0xb04   :  { %v3094_v6 = vmul.f32 %v3086_v57, %v3054_v16 }
 0xb05   :  { %v3108_v18 = vmul.f32 %v3100_v9, %v8639_v43  ;;  %v7157_v43 = vld [vmem:[%s9980_s10 + $0x28] sm:$0xff]   ;;  %v6305_v9 = vld [vmem:[%s9972_s2 + $0x2] ss:$0 sm:$0xff] }
 0xb06   :  { %v3102_v10 = vadd.f32 %v3094_v6, %v3046_v42 }
 0xb07   :  { %v3112_v17 = vpack.c.bf16 %v3108_v18, %v3104_v44 }
 0xb08   :  { %v3110_v50 = vmul.f32 %v3102_v10, %v8641_v55  ;;  %v7158_v55 = vld [vmem:[%s9980_s10 + $0x30] sm:$0xff]   ;;  %v7164_v10 = vld [vmem:[%s9976_s6 + $0x244] ss:$36 sps:$4 sm:$0xff]  }
 0xb09   :  { %3155 = vmatprep.mubr.bf16.mxu1 %v3112_v17  ;;  %v7167_v17 = vld [vmem:[%s9976_s6 + $0x24c] ss:$36 sps:$4 sm:$0xff]  }
 0xb0a   :  { %3156 = vmatmul.mubr.bf16.vlgmr.msra.gmra.mrb[52].mxu1 %v3111_v1  ;;  %v3114_v32 = vpack.c.bf16 %v3110_v50, %v3106_v52  ;;  %v3122_v52 = vmul.f32 %v6239_v35, %v8441_v47  ;;  %v7165_v50 = vld [vmem:[%s9976_s6 + $0x248] ss:$36 sps:$4 sm:$0xff]   ;;  %v7176_v35 = vld [vmem:[%s9976_s6 + $0x2d4] ss:$36 sps:$4 sm:$0xff]  }
 0xb0b   :  { %6852 = vmatpush3.bf16.msra.mxu1 %v7156_v56  ;;  %6859 = vmatprep.mubr.msk.bf16.mxu1 %vm7630_vm8, %v7628_v11  ;;  %v7162_v56 = vld [vmem:[%s9976_s6 + $0x240] ss:$36 sps:$4 sm:$0xff]  }
 0xb0c   :  { %6853 = vmatprep.subr.bf16.mxu1 %v7628_v11  ;;  %3196 = vmatprep.mubr.bf16.mxu0 %v3114_v32  ;;  %v7170_v32 = vld [vmem:[%s9976_s6 + $0x28c] ss:$36 sps:$4 sm:$0xff]  }
 0xb0d   :  { %3197 = vmatmul.mubr.bf16.vlgmr.msra.gmra.mrb[44].mxu0 %v3113_v51 }
 0xb0e   :  { %6867 = vmatprep.mubr.msk.bf16.mxu0 %vm7630_vm8, %v7628_v11 }
 0xb0f   :  { %6854 = vmatpush3.bf16.msra.mxu1 %v7157_v43  ;;  %v7173_v43 = vld [vmem:[%s9976_s6 + $0x294] ss:$36 sps:$4 sm:$0xff]  }
 0xb10   :  { %6855 = vmatprep.subr.bf16.mxu1 %v7628_v11 }
 0xb13   :  { %6856 = vmatpush3.bf16.msra.mxu1 %v7158_v55  ;;  %v7168_v55 = vld [vmem:[%s9976_s6 + $0x288] ss:$36 sps:$4 sm:$0xff]  }
 0xb14   :  { %6857 = vmatprep.subr.bf16.mxu1 %v7628_v11 }
 0xb17   :  { %6858 = vmatpush3.bf16.msra.mxu1 %v7159_v25  ;;  %v7171_v25 = vld [vmem:[%s9976_s6 + $0x290] ss:$36 sps:$4 sm:$0xff]  }
 0xb18   :  { %3696 = vmatprep.subr.bf16.mxu1 %v7164_v10 }
 0xbdd   :  { %v6598_v8 = vpop.f32.mrb[52].mxu1 }
 0xbde   :  { %v6599_v28 = vpop.f32.mrb[53].mxu1 }
 0xbdf   :  { %v6600_v19 = vadd.f32 %v6599_v28, %v6598_v8  ;;  %v6601_v44 = vpop.f32.mrb[54].mxu1  ;;  %v7179_v8 = vld [vmem:[%s9976_s6 + $0x2dc] ss:$36 sps:$4 sm:$0xff]   ;;  %v7174_v28 = vld [vmem:[%s9976_s6 + $0x2d0] ss:$36 sps:$4 sm:$0xff]  }
 0xbe0   :  { %v6602_v48 = vpop.f32.mrb[55].mxu1  ;;  %v6620_v22 = vpop.f32.mrb[44].mxu0 }
 0xbe1   :  { %v3158_v46 = vadd.f32 %v6600_v19, %v3121_v15  ;;  %v6603_v34 = vadd.f32 %v6602_v48, %v6601_v44  ;;  %v6621_v63 = vpop.f32.mrb[45].mxu0  ;;  %v7177_v15 = vld [vmem:[%s9976_s6 + $0x2d8] ss:$36 sps:$4 sm:$0xff]   ;;  %v7185_v44 = vld [vmem:[%s9976_s6 + $0x324] ss:$36 sps:$4 sm:$0xff]  }
 0xbe2   :  { %v6622_v61 = vadd.f32 %v6621_v63, %v6620_v22  ;;  %v6623_v59 = vpop.f32.mrb[46].mxu0  ;;  %v7182_v19 = vld [vmem:[%s9976_s6 + $0x31c] ss:$36 sps:$4 sm:$0xff]  }
 0xbe3   :  { %v3161_v4 = vadd.f32 %v6603_v34, %v3122_v52  ;;  %v6624_v40 = vpop.f32.mrb[47].mxu0  ;;  %v7180_v48 = vld [vmem:[%s9976_s6 + $0x318] ss:$36 sps:$4 sm:$0xff]   ;;  %v7183_v22 = vld [vmem:[%s9976_s6 + $0x320] ss:$36 sps:$4 sm:$0xff]  }
 0xbe4   :  { %v3199_v0 = vadd.f32 %v6622_v61, %v3158_v46  ;;  %v6625_v23 = vadd.f32 %v6624_v40, %v6623_v59  ;;  %v7188_v46 = vld [vmem:[%s9976_s6 + $0x254] ss:$36 sps:$4 sm:$0xff]   ;;  %v7191_v52 = vld [vmem:[%s9976_s6 + $0x25c] ss:$36 sps:$4 sm:$0xff]   ;;  %v6252_v59 = vld [vmem:[%s9974_s4 + $0x8] sm:$0xf] }
 0xbe6   :  { %v3202_v49 = vadd.f32 %v6625_v23, %v3161_v4  ;;  %v3227_v37 = vmul.f32 %v3222_v58, %v3199_v0  ;;  %v3453_v23 = vrot.slane %v6252_v59, %v7889_v30  ;;  %v3471_v58 = vrot.slane %v6252_v59, %v7897_v36 }
 0xbe8   :  { %v3228_v41 = vmul.f32 %v3224_v39, %v3202_v49  ;;  %v3461_v49 = vrot.slane %v6252_v59, %v7891_v31 }
 0xbea   :  { %v3229_v33 = vpack.c.bf16 %v3228_v41, %v3227_v37 }
 0xbec   :  { %6860 = vmatmul.mubr.msk.bf16.vlgmr.msra.gmra.mrb[56].mxu1 %vm364_vm9, %v3229_v33 }
 0xbed   :  { %3728 = vmatprep.mubr.bf16.mxu1 %v7627_v3  ;;  %3697 = vmatpush1.bf16.msra.mxu1 %v7162_v56 }
 0xbee   :  { %3698 = vmatprep.subr.bf16.mxu1 %v7170_v32 }
 0xbf1   :  { %3699 = vmatpush1.bf16.msra.mxu1 %v7168_v55 }
 0xbf2   :  { %3700 = vmatprep.subr.bf16.mxu1 %v7176_v35 }
 0xbf5   :  { %3701 = vmatpush1.bf16.msra.mxu1 %v7174_v28 }
 0xbf6   :  { %3702 = vmatprep.subr.bf16.mxu1 %v7182_v19 }
 0xbf9   :  { %3703 = vmatpush1.bf16.msra.mxu1 %v7180_v48  ;;  %v7186_v48 = vld [vmem:[%s9976_s6 + $0x250] ss:$36 sps:$4 sm:$0xff]  }
 0xbfa   :  { %3782 = vmatprep.subr.bf16.mxu1 %v7188_v46 }
 0xcbf   :  { %v3291_v45 = vpop.f32.mrb[56].mxu1 }
 0xcc0   :  { %v8878_v47 = vadd.f32 %v3291_v45, %v8346_v24  ;;  %v6861_v1 = vpop.f32.mrb[57].mxu1  ;;  %v7160_v24 = vld [vmem:[%s9973_s3 + $0x20] sm:$0xff]   ;;  %v3481_v45 = vrot.slane %v6252_v59, %v7900_v38 }
 0xcc1   :  { %v3294_v7 = vpop.f32.mrb[58].mxu1  ;;  %6864 = vmatpush3.bf16.msra.mxu0 %v7160_v24  ;;  %v7200_v59 = vld [vmem:[%s9976_s6 + $0x2e4] ss:$36 sps:$4 sm:$0xff]  }
 0xcc2   :  { %v8881_v14 = vadd.f32 %v3294_v7, %v8349_v29  ;;  %v6862_v27 = vpop.f32.mrb[59].mxu1  ;;  %v3367_v62 = vmul.f32 %v8878_v47, %v8878_v47  ;;  %v7161_v29 = vld [vmem:[%s9973_s3 + $0x28] sm:$0xff]   ;;  %6865 = vmatprep.subr.bf16.mxu0 %v7628_v11 }
 0xcc4   :  { %v3369_v21 = vsel %vm510_vm7, %v3367_v62, 0.0  ;;  %v3368_v20 = vmul.f32 %v8881_v14, %v8881_v14 }
 0xcc5   :  { %3370 = vadd.xlane.f32.xlu1 %v3369_v21  ;;  %6866 = vmatpush3.bf16.msra.mxu0 %v7161_v29 }
 0xcc6   :  { %v3372_v54 = vsel %vm510_vm7, %v3368_v20, 0.0  ;;  %3739 = vmatprep.subr.bf16.mxu0 %v7167_v17 }
 0xcc7   :  { %3373 = vadd.xlane.f32.xlu0 %v3372_v54 }
 0xd52   :  { %v3371_v26 = vpop.xlane.xlu1 %3370 }
 0xd53   :  { %v3375_v5 = vmul.f32 0.03125, %v3371_v26 }
 0xd54   :  { %v3374_v12 = vpop.xlane.xlu0 %3373 }
 0xd55   :  { %v3377_v2 = vadd.f32 1e-05, %v3375_v5  ;;  %v3376_v13 = vmul.f32 0.03125, %v3374_v12 }
 0xd57   :  { %7366 = vrsqrt.f32 %v3377_v2  ;;  %v3378_v42 = vadd.f32 1e-05, %v3376_v13  ;;  %v6309_v13 = vld [vmem:[%s9975_s5 + $0x2] ss:$0 sm:$0xff] }
 0xd59   :  { %7368 = vrsqrt.f32 %v3378_v42 }
 0xd61   :  { %v7367_v51 = vpop.eup %7366 }
 0xd62   :  { %v3381_v60 = vmul.f32 %v7367_v51, %v8878_v47 }
 0xd63   :  { %v7369_v53 = vpop.eup %7368 }
 0xd64   :  { %v3382_v16 = vmul.f32 %v7369_v53, %v8881_v14  ;;  %v3389_v57 = vmul.f32 %v6305_v9, %v3381_v60 }
 0xd66   :  { %v3390_v6 = vmul.f32 %v6305_v9, %v3382_v16 }
 0xd68   :  { %v3391_v18 = vpack.c.bf16 %v3390_v6, %v3389_v57 }
 0xd6a   :  { %6868 = vmatmul.mubr.msk.bf16.vlgmr.msra.gmra.mrb[48].mxu0 %vm510_vm7, %v3391_v18 }
 0xd6b   :  { %3771 = vmatprep.mubr.bf16.mxu0 %v7627_v3  ;;  %3740 = vmatpush1.bf16.msra.mxu0 %v7165_v50 }
 0xd6c   :  { %3741 = vmatprep.subr.bf16.mxu0 %v7173_v43 }
 0xd6f   :  { %3742 = vmatpush1.bf16.msra.mxu0 %v7171_v25 }
 0xd70   :  { %3743 = vmatprep.subr.bf16.mxu0 %v7179_v8 }
 0xd73   :  { %3744 = vmatpush1.bf16.msra.mxu0 %v7177_v15 }
 0xd74   :  { %3745 = vmatprep.subr.bf16.mxu0 %v7185_v44 }
 0xd77   :  { %3746 = vmatpush1.bf16.msra.mxu0 %v7183_v22  ;;  %v7189_v22 = vld [vmem:[%s9976_s6 + $0x258] ss:$36 sps:$4 sm:$0xff]  }
 0xd78   :  { %3825 = vmatprep.subr.bf16.mxu0 %v7191_v52  ;;  %v7194_v52 = vld [vmem:[%s9976_s6 + $0x29c] ss:$36 sps:$4 sm:$0xff]  }
 0xe3d   :  { %v3441_v34 = vpop.f32.mrb[48].mxu0 }
 0xe3e   :  { %3448 = vst.msk [vmem:[#allocation2 + $0x3] sm:$0xff] %vm364_vm9, %v3441_v34  ;;  %v6359_v63 = vmul.f32 -1.442695, %v3441_v34  ;;  %v6869_v61 = vpop.f32.mrb[49].mxu0  ;;  %v3454_v41 = vmul.f32 %v3453_v23, %v3441_v34 }
 0xe3f   :  { %v3444_v4 = vpop.f32.mrb[50].mxu0  ;;  %v7195_v61 = vld [vmem:[%s9976_s6 + $0x2a0] ss:$36 sps:$4 sm:$0xff]  }
 0xe40   :  { %7370 = vpow2.f32 %v6359_v63  ;;  %3449 = vst.msk [vmem:[#allocation2 + $0x13] sm:$0xff] %vm364_vm9, %v3444_v4  ;;  %v6360_v40 = vmul.f32 -1.442695, %v3444_v4  ;;  %v6870_v0 = vpop.f32.mrb[51].mxu0  ;;  %v3455_v20 = vmul.f32 %v3453_v23, %v3444_v4  ;;  %v7192_v63 = vld [vmem:[%s9976_s6 + $0x298] ss:$36 sps:$4 sm:$0xff]  }
 0xe41   :  { %v7201_v0 = vld [vmem:[%s9976_s6 + $0x2e8] ss:$36 sps:$4 sm:$0xff]  }
 0xe42   :  { %7372 = vpow2.f32 %v6360_v40  ;;  %v7198_v40 = vld [vmem:[%s9976_s6 + $0x2e0] ss:$36 sps:$4 sm:$0xff]   ;;  %v7206_v23 = vld [vmem:[%s9976_s6 + $0x32c] ss:$36 sps:$4 sm:$0xff]  }
 0xe45   :  { %v3456_v39 = vld [vmem:[#allocation2 + $0x2] sm:$0xff] }
 0xe46   :  { %v3466_v37 = vld [vmem:[#allocation2 + $0x1] sm:$0xff]  ;;  %v3462_v33 = vmul.f32 %v3461_v49, %v3456_v39  ;;  %v7207_v39 = vld [vmem:[%s9976_s6 + $0x330] ss:$36 sps:$4 sm:$0xff]  }
 0xe47   :  { %v3476_v1 = vld [vmem:[#allocation2] sm:$0xff]  ;;  %v3457_v7 = vld [vmem:[#allocation2 + $0x12] sm:$0xff]  ;;  %v3472_v21 = vmul.f32 %v3471_v58, %v3466_v37 }
 0xe48   :  { %v3467_v27 = vld [vmem:[#allocation2 + $0x11] sm:$0xff]  ;;  %v3464_v62 = vadd.f32 %v3462_v33, %v3454_v41  ;;  %v3463_v54 = vmul.f32 %v3461_v49, %v3457_v7  ;;  %v3482_v5 = vmul.f32 %v3481_v45, %v3476_v1  ;;  %v7210_v37 = vld [vmem:[%s9976_s6 + $0x260] ss:$36 sps:$4 sm:$0xff]   ;;  %v7211_v33 = vld [vmem:[%s9976_s6 + $0x2a8] ss:$36 sps:$4 sm:$0xff]  }
 0xe49   :  { %v3477_v24 = vld [vmem:[#allocation2 + $0x10] sm:$0xff]  ;;  %v3473_v2 = vmul.f32 %v3471_v58, %v3467_v27  ;;  %v7204_v58 = vld [vmem:[%s9976_s6 + $0x328] ss:$36 sps:$4 sm:$0xff]  }
 0xe4a   :  { %v7371_v29 = vpop.eup %7370  ;;  %v3474_v26 = vadd.f32 %v3472_v21, %v3464_v62  ;;  %v3465_v12 = vadd.f32 %v3463_v54, %v3455_v20  ;;  %v3483_v9 = vmul.f32 %v3481_v45, %v3477_v24  ;;  %v7209_v49 = vld [vmem:[%s9976_s6 + $0x334] ss:$36 sps:$4 sm:$0xff]   ;;  %v9047_v45 = vld [vmem:[%s9981_s11] ss:$16 sps:$4 sm:$0xff]   ;;  %v7513_v24 = vld [vmem:[%s9981_s11 + $0xc] ss:$16 sps:$4 sm:$0xff]  }
 0xe4b   :  { %v4502_v42 = vadd.f32 1.0, %v7371_v29  ;;  %v7506_v41 = vld [vmem:[%s9981_s11 + $0x4] ss:$16 sps:$4 sm:$0xff]   ;;  %v9064_v27 = vld [vmem:[%s9981_s11 + $0x20] ss:$16 sps:$4 sm:$0xff]  }
 0xe4c   :  { %v7373_v51 = vpop.eup %7372  ;;  %v3484_v60 = vadd.f32 %v3482_v5, %v3474_v26  ;;  %v3475_v53 = vadd.f32 %v3473_v2, %v3465_v12  ;;  %v9053_v1 = vld [vmem:[%s9981_s11 + $0x24] ss:$16 sps:$4 sm:$0xff]   ;;  %v7213_v21 = vld [vmem:[%s9976_s6 + $0x338] ss:$36 sps:$4 sm:$0xff]   ;;  %v9080_v20 = vld [vmem:[%s9981_s11 + $0x40] ss:$16 sps:$4 sm:$0xff]  }
 0xe4d   :  { %7374 = vrcp.f32 %v4502_v42  ;;  %v4503_v16 = vadd.f32 1.0, %v7373_v51  ;;  %v7212_v7 = vld [vmem:[%s9976_s6 + $0x2f0] ss:$36 sps:$4 sm:$0xff]   ;;  %v9103_v26 = vld [vmem:[%s9981_s11 + $0x8] ss:$16 sps:$4 sm:$0xff]  }
 0xe4e   :  { %v3492_v57 = vadd.f32 %v6309_v13, %v3484_v60  ;;  %v3485_v6 = vadd.f32 %v3483_v9, %v3475_v53  ;;  %v9070_v62 = vld [vmem:[%s9981_s11 + $0x44] ss:$16 sps:$4 sm:$0xff]   ;;  %v9095_v29 = vld [vmem:[%s9981_s11 + $0x60] ss:$16 sps:$4 sm:$0xff]   ;;  %v9110_v5 = vld [vmem:[%s9981_s11 + $0x2c] ss:$16 sps:$4 sm:$0xff]  }
 0xe4f   :  { %7376 = vrcp.f32 %v4503_v16  ;;  %v9086_v54 = vld [vmem:[%s9981_s11 + $0x64] ss:$16 sps:$4 sm:$0xff]   ;;  %v9116_v12 = vld [vmem:[%s9981_s11 + $0x28] ss:$16 sps:$4 sm:$0xff]   ;;  %v9122_v2 = vld [vmem:[%s9981_s11 + $0x4c] ss:$16 sps:$4 sm:$0xff]  }
 0xe50   :  { %v6310_v18 = vmul.f32 -1.442695, %v3492_v57  ;;  %v3493_v10 = vadd.f32 %v6309_v13, %v3485_v6  ;;  %v9128_v13 = vld [vmem:[%s9981_s11 + $0x48] ss:$16 sps:$4 sm:$0xff]   ;;  %v9134_v42 = vld [vmem:[%s9981_s11 + $0x6c] ss:$16 sps:$4 sm:$0xff]  }
 0xe51   :  { %v9140_v51 = vld [vmem:[%s9981_s11 + $0x68] ss:$16 sps:$4 sm:$0xff]  }
 0xe52   :  { %7378 = vpow2.f32 %v6310_v18  ;;  %v6311_v17 = vmul.f32 -1.442695, %v3493_v10 }
 0xe54   :  { %7380 = vpow2.f32 %v6311_v17 }
 0xe57   :  { %v7375_v56 = vpop.eup %7374 }
 0xe58   :  { %v4508_v50 = vmul.f32 %v7375_v56, %v3441_v34  ;;  %v7197_v34 = vld [vmem:[%s9976_s6 + $0x2a4] ss:$36 sps:$4 sm:$0xff]  }
 0xe59   :  { %v7377_v32 = vpop.eup %7376 }
 0xe5a   :  { %4512 = vrot.lane.b32.xlu0 %v4508_v50, %s7631_s19  ;;  %v4509_v43 = vmul.f32 %v7377_v32, %v3444_v4  ;;  %v7203_v4 = vld [vmem:[%s9976_s6 + $0x2ec] ss:$36 sps:$4 sm:$0xff]  }
 0xe5c   :  { %v7379_v55 = vpop.eup %7378  ;;  %4514 = vrot.lane.b32.xlu1 %v4509_v43, %s7631_s19 }
 0xe5d   :  { %v3500_v25 = vadd.f32 1.0, %v7379_v55 }
 0xe5e   :  { %v7381_v35 = vpop.eup %7380 }
 0xe5f   :  { %7382 = vrcp.f32 %v3500_v25  ;;  %v3501_v8 = vadd.f32 1.0, %v7381_v35 }
 0xe61   :  { %7384 = vrcp.f32 %v3501_v8  ;;  %v6353_v8 = vld [vmem:[%s9977_s7 + $0x2] ss:$0 sm:$0xff] }
 0xe69   :  { %v7383_v28 = vpop.eup %7382 }
 0xe6a   :  { %v8971_v19 = vmul.f32 %v7383_v28, %v3492_v57 }
 0xe6b   :  { %v7385_v15 = vpop.eup %7384 }
 0xe6c   :  { %v8973_v44 = vmul.f32 %v7385_v15, %v3493_v10 }
 0xe6e   :  { %v8983_v46 = vpack.c.bf16 %v8973_v44, %v8971_v19 }
 0xe70   :  { %6348 = vmatmul.mubr.msk.bf16.vlgmr.msra.gmra.mrb[60].mxu1 %vm364_vm9, %v8983_v46  ;;  %6349 = vmatmul.mubr.msk.bf16.vlgmr.msra.gmra.mrb[52].mxu0 %vm364_vm9, %v8983_v46 }
 0xe71   :  { %3783 = vmatpush1.bf16.msra.mxu1 %v7186_v48  ;;  %3826 = vmatpush1.bf16.msra.mxu0 %v7189_v22 }
 0xe72   :  { %3784 = vmatprep.subr.bf16.mxu1 %v7194_v52  ;;  %3827 = vmatprep.subr.bf16.mxu0 %v7197_v34 }
 0xe73   :  { %3814 = vmatprep.mubr.bf16.mxu1 %v7627_v3  ;;  %3857 = vmatprep.mubr.bf16.mxu0 %v7627_v3 }
 0xe75   :  { %3785 = vmatpush1.bf16.msra.mxu1 %v7192_v63  ;;  %3828 = vmatpush1.bf16.msra.mxu0 %v7195_v61 }
 0xe76   :  { %3786 = vmatprep.subr.bf16.mxu1 %v7200_v59  ;;  %3829 = vmatprep.subr.bf16.mxu0 %v7203_v4 }
 0xe79   :  { %3787 = vmatpush1.bf16.msra.mxu1 %v7198_v40  ;;  %3830 = vmatpush1.bf16.msra.mxu0 %v7201_v0 }
 0xe7a   :  { %3788 = vmatprep.subr.bf16.mxu1 %v7206_v23  ;;  %3831 = vmatprep.subr.bf16.mxu0 %v7209_v49 }
 0xe7d   :  { %3789 = vmatpush1.bf16.msra.mxu1 %v7204_v58  ;;  %3832 = vmatpush1.bf16.msra.mxu0 %v7207_v39 }
 0xe7e   :  { %6871 = vmatprep.subr.bf16.mxu1 %v7628_v11  ;;  %3939 = vmatprep.subr.bf16.mxu0 %v7506_v41 }
 0xe80   :  { %6350 = vmatmul.mubr.msk.bf16.vlgmr.msra.gmra.mrb[64].mxu1 %vm364_vm9, %v8983_v46  ;;  %6351 = vmatmul.mubr.msk.bf16.vlgmr.msra.gmra.mrb[56].mxu0 %vm364_vm9, %v8983_v46 }
 0xe81   :  { %6872 = vmatpush3.bf16.msra.mxu1 %v7210_v37  ;;  %6879 = vmatprep.mubr.msk.bf16.mxu1 %vm7630_vm8, %v7628_v11 }
 0xe82   :  { %6873 = vmatprep.subr.bf16.mxu1 %v7628_v11  ;;  %3940 = vmatpush1.bf16.msra.mxu0 %v9047_v45 }
 0xe83   :  { %3941 = vmatprep.subr.bf16.mxu0 %v9053_v1  ;;  %3971 = vmatprep.mubr.bf16.mxu0 %v7627_v3 }
 0xe85   :  { %6874 = vmatpush3.bf16.msra.mxu1 %v7211_v33 }
 0xe86   :  { %6875 = vmatprep.subr.bf16.mxu1 %v7628_v11  ;;  %3942 = vmatpush1.bf16.msra.mxu0 %v9064_v27 }
 0xe87   :  { %3943 = vmatprep.subr.bf16.mxu0 %v9070_v62 }
 0xe89   :  { %6876 = vmatpush3.bf16.msra.mxu1 %v7212_v7 }
 0xe8a   :  { %6877 = vmatprep.subr.bf16.mxu1 %v7628_v11  ;;  %3944 = vmatpush1.bf16.msra.mxu0 %v9080_v20 }
 0xe8b   :  { %3945 = vmatprep.subr.bf16.mxu0 %v9086_v54 }
 0xe8d   :  { %6878 = vmatpush3.bf16.msra.mxu1 %v7213_v21 }
 0xe8e   :  { %3982 = vmatprep.subr.bf16.mxu1 %v7513_v24  ;;  %3946 = vmatpush1.bf16.msra.mxu0 %v9095_v29 }
 0xe8f   :  { %4031 = vmatprep.subr.bf16.mxu0 %v7506_v41 }
 0xe90   :  { %6880 = vmatmul.mubr.msk.bf16.vlgmr.msra.gmra.mrb[68].mxu1 %vm364_vm9, %v8983_v46 }
 0xe91   :  { %3983 = vmatpush1.bf16.msra.mxu1 %v9103_v26  ;;  %4014 = vmatprep.mubr.bf16.mxu1 %v7627_v3 }
 0xe92   :  { %3984 = vmatprep.subr.bf16.mxu1 %v9110_v5 }
 0xe95   :  { %3985 = vmatpush1.bf16.msra.mxu1 %v9116_v12 }
 0xe96   :  { %3986 = vmatprep.subr.bf16.mxu1 %v9122_v2 }
 0xe99   :  { %3987 = vmatpush1.bf16.msra.mxu1 %v9128_v13 }
 0xe9a   :  { %3988 = vmatprep.subr.bf16.mxu1 %v9134_v42 }
 0xe9d   :  { %3989 = vmatpush1.bf16.msra.mxu1 %v9140_v51 }
 0xe9e   :  { %4074 = vmatprep.subr.bf16.mxu1 %v7513_v24 }
 0xf43   :  { %v9143_v60 = vpop.f32.mrb[60].mxu1  ;;  %v9145_v53 = vpop.f32.mrb[52].mxu0 }
 0xf44   :  { %v9147_v9 = vpop.f32.mrb[61].mxu1  ;;  %v9149_v16 = vpop.f32.mrb[53].mxu0 }
 0xf45   :  { %v9151_v57 = vpop.f32.mrb[62].mxu1  ;;  %v9153_v6 = vpop.f32.mrb[54].mxu0 }
 0xf46   :  { %v9155_v18 = vpop.f32.mrb[63].mxu1  ;;  %v9157_v10 = vpop.f32.mrb[55].mxu0 }
 0xf53   :  { %v9159_v17 = vpop.f32.mrb[64].mxu1  ;;  %v9161_v56 = vpop.f32.mrb[56].mxu0 }
 0xf54   :  { %v9163_v50 = vpop.f32.mrb[65].mxu1  ;;  %v9165_v32 = vpop.f32.mrb[57].mxu0 }
 0xf55   :  { %v9167_v43 = vpop.f32.mrb[66].mxu1  ;;  %v9169_v55 = vpop.f32.mrb[58].mxu0 }
 0xf56   :  { %v9171_v25 = vpop.f32.mrb[67].mxu1  ;;  %v9173_v35 = vpop.f32.mrb[59].mxu0 }
 0xf63   :  { %v3902_v28 = vpop.f32.mrb[68].mxu1 }
 0xf64   :  { %v3915_v15 = vadd.f32 %v6353_v8, %v3902_v28  ;;  %v6881_v48 = vpop.f32.mrb[69].mxu1 }
 0xf65   :  { %v3905_v22 = vpop.f32.mrb[70].mxu1 }
 0xf66   :  { %v3919_v46 = vand.u32 2147483647, %v3915_v15  ;;  %v3916_v52 = vadd.f32 %v6353_v8, %v3905_v22  ;;  %v6882_v34 = vpop.f32.mrb[71].mxu1  ;;  %v3917_v37 = vmax.f32 %v3915_v15, 0.0  ;;  %v7536_v15 = vld [vmem:[%s9982_s12 + $0x18] sm:$0xff]  }
 0xf67   :  { %v7538_v34 = vld [vmem:[%s9982_s12 + $0x60] sm:$0xff]  }
 0xf68   :  { %v3921_v63 = vsub.f32 0.0, %v3919_v46  ;;  %v3920_v61 = vand.u32 2147483647, %v3916_v52  ;;  %v3918_v21 = vmax.f32 %v3916_v52, 0.0  ;;  %v7537_v52 = vld [vmem:[%s9982_s12 + $0x98] sm:$0xff]  }
 0xf6a   :  { %v3923_v59 = vmul.f32 1.442695, %v3921_v63  ;;  %v3922_v4 = vsub.f32 0.0, %v3920_v61  ;;  %v7539_v63 = vld [vmem:[%s9982_s12 + $0xe0] sm:$0xff]  }
 0xf6b   :  { %v7540_v61 = vld [vmem:[%s9982_s12 + $0x20] sm:$0xff]  }
 0xf6c   :  { %7386 = vpow2.f32 %v3923_v59  ;;  %v3925_v40 = vmul.f32 1.442695, %v3922_v4  ;;  %v7541_v59 = vld [vmem:[%s9982_s12 + $0xa0] sm:$0xff]   ;;  %v7542_v4 = vld [vmem:[%s9982_s12 + $0x68] sm:$0xff]  }
 0xf6e   :  { %7388 = vpow2.f32 %v3925_v40  ;;  %v7543_v40 = vld [vmem:[%s9982_s12 + $0xe8] sm:$0xff]  }
 0xf76   :  { %v7387_v0 = vpop.eup %7386 }
 0xf77   :  { %v3927_v23 = vadd.f32 1.0, %v7387_v0  ;;  %v7544_v0 = vld [vmem:[%s9982_s12 + $0x28] sm:$0xff]  }
 0xf78   :  { %v7389_v49 = vpop.eup %7388 }
 0xf79   :  { %7390 = vlog2.f32 %v3927_v23  ;;  %v3928_v58 = vadd.f32 1.0, %v7389_v49  ;;  %v7545_v23 = vld [vmem:[%s9982_s12 + $0xa8] sm:$0xff]   ;;  %v7546_v49 = vld [vmem:[%s9982_s12 + $0x70] sm:$0xff]  }
 0xf7b   :  { %7392 = vlog2.f32 %v3928_v58  ;;  %v7547_v58 = vld [vmem:[%s9982_s12 + $0xf0] sm:$0xff]  }
 0xf83   :  { %v7391_v39 = vpop.eup %7390 }
 0xf84   :  { %v3930_v41 = vmul.f32 0.6931472, %v7391_v39  ;;  %v7548_v39 = vld [vmem:[%s9982_s12 + $0x30] sm:$0xff]  }
 0xf85   :  { %v7393_v33 = vpop.eup %7392 }
 0xf86   :  { %v3933_v7 = vadd.f32 %v3930_v41, %v3917_v37  ;;  %v3932_v24 = vmul.f32 0.6931472, %v7393_v33  ;;  %v7549_v37 = vld [vmem:[%s9982_s12 + $0xb0] sm:$0xff]   ;;  %v7550_v41 = vld [vmem:[%s9982_s12 + $0x78] sm:$0xff]  }
 0xf87   :  { %v7551_v33 = vld [vmem:[%s9982_s12 + $0xf8] sm:$0xff]  }
 0xf88   :  { %v3934_v8 = vadd.f32 %v3932_v24, %v3918_v21  ;;  %v4025_v28 = vmul.f32 %v3933_v7, %v8971_v19  ;;  %v7553_v21 = vld [vmem:[%s9982_s12 + $0xb8] sm:$0xff]   ;;  %v6295_v24 = vld [vmem:[%s9978_s8 + $0x8] sm:$0xf] }
 0xf8a   :  { %v3935_v48 = vpack.c.bf16 %v3934_v8, %v3933_v7  ;;  %v4026_v22 = vmul.f32 %v3934_v8, %v8973_v44  ;;  %v7552_v7 = vld [vmem:[%s9982_s12 + $0x38] sm:$0xff]   ;;  %v4121_v8 = vrot.slane %v6295_v24, %v7900_v38 }
 0xf8c   :  { %v4027_v46 = vpack.c.bf16 %v4026_v22, %v4025_v28  ;;  %6354 = vmatmul.mubr.msk.bf16.vlgmr.msra.gmra.mrb[60].mxu0 %vm364_vm9, %v3935_v48  ;;  %6355 = vmatmul.mubr.msk.bf16.vlgmr.msra.gmra.mrb[72].mxu1 %vm364_vm9, %v3935_v48  ;;  %v4129_v28 = vrot.slane %v6295_v24, %v7891_v31  ;;  %v4125_v48 = vrot.slane %v6295_v24, %v7897_v36 }
 0xf8d   :  { %4032 = vmatpush1.bf16.msra.mxu0 %v9047_v45  ;;  %4075 = vmatpush1.bf16.msra.mxu1 %v9103_v26  ;;  %v7522_v45 = vld [vmem:[%s9982_s12 + $0x40] sm:$0xff]   ;;  %v7529_v26 = vld [vmem:[%s9982_s12 + $0x88] sm:$0xff]   ;;  %v4133_v22 = vrot.slane %v6295_v24, %v7889_v30 }
 0xf8e   :  { %4033 = vmatprep.subr.bf16.mxu0 %v9053_v1  ;;  %4076 = vmatprep.subr.bf16.mxu1 %v9110_v5  ;;  %v7523_v1 = vld [vmem:[%s9982_s12 + $0xc0] sm:$0xff]   ;;  %v7530_v5 = vld [vmem:[%s9982_s12 + $0x50] sm:$0xff]  }
 0xf8f   :  { %4063 = vmatprep.mubr.bf16.mxu0 %v7627_v3  ;;  %4106 = vmatprep.mubr.bf16.mxu1 %v7627_v3 }
 0xf91   :  { %4034 = vmatpush1.bf16.msra.mxu0 %v9064_v27  ;;  %4077 = vmatpush1.bf16.msra.mxu1 %v9116_v12  ;;  %v7524_v27 = vld [vmem:[%s9982_s12] sm:$0xff]   ;;  %v7531_v12 = vld [vmem:[%s9982_s12 + $0xd0] sm:$0xff]  }
 0xf92   :  { %4035 = vmatprep.subr.bf16.mxu0 %v9070_v62  ;;  %4078 = vmatprep.subr.bf16.mxu1 %v9122_v2  ;;  %v7525_v62 = vld [vmem:[%s9982_s12 + $0x80] sm:$0xff]   ;;  %v7532_v2 = vld [vmem:[%s9982_s12 + $0x10] sm:$0xff]  }
 0xf95   :  { %4036 = vmatpush1.bf16.msra.mxu0 %v9080_v20  ;;  %4079 = vmatpush1.bf16.msra.mxu1 %v9128_v13  ;;  %v7526_v20 = vld [vmem:[%s9982_s12 + $0x48] sm:$0xff]   ;;  %v7533_v13 = vld [vmem:[%s9982_s12 + $0x90] sm:$0xff]  }
 0xf96   :  { %4037 = vmatprep.subr.bf16.mxu0 %v9086_v54  ;;  %4080 = vmatprep.subr.bf16.mxu1 %v9134_v42  ;;  %v7527_v54 = vld [vmem:[%s9982_s12 + $0xc8] sm:$0xff]   ;;  %v7534_v42 = vld [vmem:[%s9982_s12 + $0x58] sm:$0xff]  }
 0xf99   :  { %4038 = vmatpush1.bf16.msra.mxu0 %v9095_v29  ;;  %4081 = vmatpush1.bf16.msra.mxu1 %v9140_v51  ;;  %v7528_v29 = vld [vmem:[%s9982_s12 + $0x8] sm:$0xff]   ;;  %v7535_v51 = vld [vmem:[%s9982_s12 + $0xd8] sm:$0xff]  }
 0xf9a   :  { %6639 = vmatprep.subr.bf16.mxu0 %v7522_v45  ;;  %6661 = vmatprep.subr.bf16.mxu1 %v7523_v1 }
 0xf9c   :  { %6356 = vmatmul.mubr.msk.bf16.vlgmr.msra.gmra.mrb[64].mxu0 %vm364_vm9, %v4027_v46  ;;  %6357 = vmatmul.mubr.msk.bf16.vlgmr.msra.gmra.mrb[76].mxu1 %vm364_vm9, %v4027_v46 }
 0xf9d   :  { %6640 = vmatpush3.bf16.msra.mxu0 %v7524_v27  ;;  %6662 = vmatpush3.bf16.msra.mxu1 %v7525_v62 }
 0xf9e   :  { %6641 = vmatprep.subr.bf16.mxu0 %v7526_v20  ;;  %6663 = vmatprep.subr.bf16.mxu1 %v7527_v54 }
 0xfa1   :  { %6642 = vmatpush3.bf16.msra.mxu0 %v7528_v29  ;;  %6664 = vmatpush3.bf16.msra.mxu1 %v7529_v26 }
 0xfa2   :  { %6643 = vmatprep.subr.bf16.mxu0 %v7530_v5  ;;  %6665 = vmatprep.subr.bf16.mxu1 %v7531_v12 }
 0xfa5   :  { %6644 = vmatpush3.bf16.msra.mxu0 %v7532_v2  ;;  %6666 = vmatpush3.bf16.msra.mxu1 %v7533_v13 }
 0xfa6   :  { %6645 = vmatprep.subr.bf16.mxu0 %v7534_v42  ;;  %6667 = vmatprep.subr.bf16.mxu1 %v7535_v51 }
 0xfa9   :  { %6646 = vmatpush3.bf16.msra.mxu0 %v7536_v15  ;;  %6668 = vmatpush3.bf16.msra.mxu1 %v7537_v52 }
 0xfaa   :  { %6647 = vmatprep.subr.bf16.mxu0 %v7538_v34  ;;  %6669 = vmatprep.subr.bf16.mxu1 %v7539_v63 }
 0xfad   :  { %6648 = vmatpush3.bf16.msra.mxu0 %v7540_v61  ;;  %6670 = vmatpush3.bf16.msra.mxu1 %v7541_v59 }
 0xfae   :  { %6649 = vmatprep.subr.bf16.mxu0 %v7542_v4  ;;  %6671 = vmatprep.subr.bf16.mxu1 %v7543_v40 }
 0xfb1   :  { %6650 = vmatpush3.bf16.msra.mxu0 %v7544_v0  ;;  %6672 = vmatpush3.bf16.msra.mxu1 %v7545_v23 }
 0xfb2   :  { %6651 = vmatprep.subr.bf16.mxu0 %v7546_v49  ;;  %6673 = vmatprep.subr.bf16.mxu1 %v7547_v58 }
 0xfb5   :  { %6652 = vmatpush3.bf16.msra.mxu0 %v7548_v39  ;;  %6674 = vmatpush3.bf16.msra.mxu1 %v7549_v37 }
 0xfb6   :  { %6653 = vmatprep.subr.bf16.mxu0 %v7550_v41  ;;  %6675 = vmatprep.subr.bf16.mxu1 %v7551_v33 }
 0xfb9   :  { %6654 = vmatpush3.bf16.msra.mxu0 %v7552_v7  ;;  %6676 = vmatpush3.bf16.msra.mxu1 %v7553_v21 }
 0xfba   :  { %6883 = vmatprep.subr.bf16.mxu0 %v7628_v11  ;;  %6895 = vmatprep.subr.bf16.mxu1 %v7628_v11 }
0x105f   :  { %v3973_v46 = vpop.f32.mrb[60].mxu0  ;;  %v4016_v45 = vpop.f32.mrb[72].mxu1 }
0x1060   :  { %v4138_v1 = vmul.f32 %v4121_v8, %v3973_v46  ;;  %v4140_v27 = vmul.f32 %v4129_v28, %v4016_v45  ;;  %v3975_v62 = vpop.f32.mrb[61].mxu0  ;;  %v4018_v20 = vpop.f32.mrb[73].mxu1 }
0x1061   :  { %v4139_v54 = vmul.f32 %v4125_v48, %v3975_v62  ;;  %v4141_v29 = vmul.f32 %v4133_v22, %v4018_v20  ;;  %v3977_v26 = vpop.f32.mrb[62].mxu0  ;;  %v4020_v5 = vpop.f32.mrb[74].mxu1 }
0x1062   :  { %v4146_v12 = vmul.f32 1.442695, %v4138_v1  ;;  %v4150_v2 = vmul.f32 1.442695, %v4140_v27  ;;  %v3979_v13 = vpop.f32.mrb[63].mxu0  ;;  %v4022_v42 = vpop.f32.mrb[75].mxu1  ;;  %v4142_v52 = vmul.f32 %v4121_v8, %v3977_v26  ;;  %v4144_v34 = vmul.f32 %v4129_v28, %v4020_v5 }
0x1063   :  { %v4148_v51 = vmul.f32 1.442695, %v4139_v54  ;;  %v4152_v15 = vmul.f32 1.442695, %v4141_v29  ;;  %v4143_v63 = vmul.f32 %v4125_v48, %v3979_v13  ;;  %v4145_v4 = vmul.f32 %v4133_v22, %v4022_v42 }
0x1064   :  { %7394 = vpow2.f32 %v4146_v12  ;;  %v4154_v61 = vmul.f32 1.442695, %v4142_v52  ;;  %v4158_v59 = vmul.f32 1.442695, %v4144_v34 }
0x1065   :  { %7396 = vpow2.f32 %v4150_v2  ;;  %v4156_v40 = vmul.f32 1.442695, %v4143_v63  ;;  %v4160_v49 = vmul.f32 1.442695, %v4145_v4 }
0x1066   :  { %7398 = vpow2.f32 %v4148_v51 }
0x1067   :  { %7400 = vpow2.f32 %v4152_v15 }
0x1068   :  { %7402 = vpow2.f32 %v4154_v61 }
0x1069   :  { %7404 = vpow2.f32 %v4158_v59 }
0x106a   :  { %7406 = vpow2.f32 %v4156_v40 }
0x106b   :  { %7408 = vpow2.f32 %v4160_v49 }
0x106e   :  { %v7395_v0 = vpop.eup %7394 }
0x106f   :  { %v7397_v23 = vpop.eup %7396  ;;  %v4065_v58 = vpop.f32.mrb[64].mxu0  ;;  %v4178_v39 = vrot.slane %v7395_v0, 7 }
0x1070   :  { %v4108_v37 = vpop.f32.mrb[76].mxu1  ;;  %v7399_v41 = vpop.eup %7398  ;;  %v4162_v33 = vmul.f32 %v4065_v58, %v9143_v60  ;;  %v4180_v21 = vrot.slane %v7397_v23, 7 }
0x1071   :  { %v4164_v7 = vmul.f32 %v4108_v37, %v9145_v53  ;;  %v4067_v24 = vpop.f32.mrb[65].mxu0  ;;  %v4110_v8 = vpop.f32.mrb[77].mxu1  ;;  %v4194_v48 = vsel %vm1417_vm11, 1.0, %v4178_v39  ;;  %v4179_v46 = vrot.slane %v7399_v41, 7 }
0x1072   :  { %v7401_v28 = vpop.eup %7400  ;;  %v4163_v22 = vmul.f32 %v4067_v24, %v9147_v9  ;;  %v4165_v45 = vmul.f32 %v4110_v8, %v9149_v16  ;;  %v4069_v1 = vpop.f32.mrb[66].mxu0  ;;  %v4210_v62 = vrot.slane %v4162_v33, 7  ;;  %v4250_v20 = vmul.f32 %v7395_v0, %v4194_v48 }
0x1073   :  { %v4112_v27 = vpop.f32.mrb[78].mxu1  ;;  %v4196_v54 = vsel %vm1417_vm11, 1.0, %v4180_v21  ;;  %v4212_v60 = vrot.slane %v4164_v7, 7  ;;  %v9311_v29 = vpop.f32.mrb[67].mxu0  ;;  %v4195_v5 = vsel %vm1417_vm11, 1.0, %v4179_v46  ;;  %v4181_v2 = vrot.slane %v7401_v28, 7 }
0x1074   :  { %v9313_v53 = vpop.f32.mrb[79].mxu1  ;;  %v4252_v26 = vmul.f32 %v7397_v23, %v4196_v54  ;;  %v4211_v12 = vrot.slane %v4163_v22, 7  ;;  %v4226_v9 = vsel %vm1417_vm11, 0.0, %v4210_v62  ;;  %v4266_v13 = vrot.slane %v4250_v20, 6  ;;  %v7403_v40 = vpop.eup %7402 }
0x1075   :  { %v4228_v16 = vsel %vm1417_vm11, 0.0, %v4212_v60  ;;  %v4251_v42 = vmul.f32 %v7399_v41, %v4195_v5  ;;  %v4234_v51 = vmul.f32 %v7395_v0, %v4226_v9  ;;  %v4197_v4 = vsel %vm1417_vm11, 1.0, %v4181_v2 }
0x1076   :  { %v4236_v15 = vmul.f32 %v7397_v23, %v4228_v16  ;;  %v4268_v52 = vrot.slane %v4252_v26, 6  ;;  %v4227_v34 = vsel %vm1417_vm11, 0.0, %v4211_v12  ;;  %v4282_v63 = vsel %vm1506_vm12, 1.0, %v4266_v13  ;;  %v7405_v23 = vpop.eup %7404 }
0x1077   :  { %v4235_v61 = vmul.f32 %v7399_v41, %v4227_v34  ;;  %v4267_v59 = vrot.slane %v4251_v42, 6  ;;  %v4242_v58 = vadd.f32 %v4234_v51, %v4162_v33  ;;  %v4338_v21 = vmul.f32 %v4282_v63, %v4250_v20  ;;  %v9323_v41 = vpop.eup %7406 }
0x1078   :  { %v4244_v39 = vadd.f32 %v4236_v15, %v4164_v7  ;;  %v4284_v37 = vsel %vm1506_vm12, 1.0, %v4268_v52  ;;  %v4213_v0 = vrot.slane %v4165_v45, 7  ;;  %v4253_v54 = vmul.f32 %v7401_v28, %v4197_v4 }
0x1079   :  { %v4340_v24 = vmul.f32 %v4284_v37, %v4252_v26  ;;  %v4243_v8 = vadd.f32 %v4235_v61, %v4163_v22  ;;  %v4298_v48 = vrot.slane %v4242_v58, 6  ;;  %v4283_v62 = vsel %vm1506_vm12, 1.0, %v4267_v59 }
0x107a   :  { %v4300_v46 = vrot.slane %v4244_v39, 6  ;;  %v4229_v5 = vsel %vm1417_vm11, 0.0, %v4213_v0  ;;  %v4166_v49 = vmul.f32 %v4069_v1, %v9151_v57  ;;  %v4182_v33 = vrot.slane %v7403_v40, 7 }
0x107b   :  { %v4299_v60 = vrot.slane %v4243_v8, 6  ;;  %v4314_v7 = vsel %vm1506_vm12, 0.0, %v4298_v48  ;;  %v4237_v22 = vmul.f32 %v7401_v28, %v4229_v5  ;;  %v4269_v2 = vrot.slane %v4253_v54, 6 }
0x107c   :  { %v4316_v12 = vsel %vm1506_vm12, 0.0, %v4300_v46  ;;  %v4322_v9 = vmul.f32 %v4314_v7, %v4250_v20  ;;  %v4198_v51 = vsel %vm1417_vm11, 1.0, %v4182_v33  ;;  %v4339_v52 = vmul.f32 %v4283_v62, %v4251_v42 }
0x107d   :  { %v4324_v13 = vmul.f32 %v4316_v12, %v4252_v26  ;;  %v4315_v16 = vsel %vm1506_vm12, 0.0, %v4299_v60  ;;  %v4245_v34 = vadd.f32 %v4237_v22, %v4165_v45  ;;  %v4214_v63 = vrot.slane %v4166_v49, 7  ;;  %v9334_v60 = vpop.eup %7408 }
0x107e   :  { %v4323_v15 = vmul.f32 %v4315_v16, %v4251_v42  ;;  %v4330_v61 = vadd.f32 %v4322_v9, %v4242_v58  ;;  %v4285_v57 = vsel %vm1506_vm12, 1.0, %v4269_v2  ;;  %v4254_v1 = vmul.f32 %v7403_v40, %v4198_v51 }
0x107f   :  { %v4332_v59 = vadd.f32 %v4324_v13, %v4244_v39  ;;  %v4301_v37 = vrot.slane %v4245_v34, 6  ;;  %v4230_v28 = vsel %vm1417_vm11, 0.0, %v4214_v63  ;;  %v4168_v20 = vmul.f32 %v4112_v27, %v9153_v6 }
0x1080   :  { %v4331_v4 = vadd.f32 %v4323_v15, %v4243_v8  ;;  %v4354_v26 = vrot.slane %v4330_v61, 4  ;;  %v4238_v48 = vmul.f32 %v7403_v40, %v4230_v28  ;;  %v4270_v46 = vrot.slane %v4254_v1, 6 }
0x1081   :  { %v4356_v0 = vrot.slane %v4332_v59, 4  ;;  %v4317_v45 = vsel %vm1506_vm12, 0.0, %v4301_v37  ;;  %v4184_v58 = vrot.slane %v7405_v23, 7  ;;  %v4216_v39 = vrot.slane %v4168_v20, 7 }
0x1082   :  { %v4355_v42 = vrot.slane %v4331_v4, 4  ;;  %v4370_v62 = vsel %vm1595_vm13, 0.0, %v4354_v26  ;;  %v4325_v5 = vmul.f32 %v4317_v45, %v4253_v54  ;;  %v4246_v33 = vadd.f32 %v4238_v48, %v4166_v49 }
0x1083   :  { %v4372_v8 = vsel %vm1595_vm13, 0.0, %v4356_v0  ;;  %v4378_v7 = vmul.f32 %v4370_v62, %v4338_v21  ;;  %v4341_v27 = vmul.f32 %v4285_v57, %v4253_v54  ;;  %v4286_v2 = vsel %vm1506_vm12, 1.0, %v4270_v46 }
0x1084   :  { %v4380_v12 = vmul.f32 %v4372_v8, %v4340_v24  ;;  %v4371_v6 = vsel %vm1595_vm13, 0.0, %v4355_v42  ;;  %v4333_v22 = vadd.f32 %v4325_v5, %v4245_v34  ;;  %v4302_v9 = vrot.slane %v4246_v33, 6 }
0x1085   :  { %v4379_v40 = vmul.f32 %v4371_v6, %v4339_v52  ;;  %v4386_v13 = vadd.f32 %v4378_v7, %v4330_v61  ;;  %v4200_v51 = vsel %vm1417_vm11, 1.0, %v4184_v58  ;;  %v4232_v15 = vsel %vm1417_vm11, 0.0, %v4216_v39 }
0x1086   :  { %v4388_v16 = vadd.f32 %v4380_v12, %v4332_v59  ;;  %v4357_v37 = vrot.slane %v4333_v22, 4  ;;  %v4318_v49 = vsel %vm1506_vm12, 0.0, %v4302_v9  ;;  %v4240_v21 = vmul.f32 %v7405_v23, %v4232_v15 }
0x1087   :  { %v4387_v63 = vadd.f32 %v4379_v40, %v4331_v4  ;;  %v9345_v24 = vmul.f32 %v4386_v13, %v9159_v17  ;;  %v4326_v52 = vmul.f32 %v4318_v49, %v4254_v1  ;;  %v4256_v34 = vmul.f32 %v7405_v23, %v4200_v51 }
0x1088   :  { %v9348_v54 = vmul.f32 %v4388_v16, %v9161_v56  ;;  %v4373_v61 = vsel %vm1595_vm13, 0.0, %v4357_v37  ;;  %v4248_v59 = vadd.f32 %v4240_v21, %v4168_v20  ;;  %v4167_v57 = vmul.f32 %v9311_v29, %v9155_v18 }
0x1089   :  { %v4183_v4 = vrot.slane %v9323_v41, 7  ;;  %v4381_v28 = vmul.f32 %v4373_v61, %v4341_v27  ;;  %v4334_v26 = vadd.f32 %v4326_v52, %v4246_v33  ;;  %v4272_v0 = vrot.slane %v4256_v34, 6 }
0x108a   :  { %v4169_v17 = vmul.f32 %v9313_v53, %v9157_v10  ;;  %v4304_v48 = vrot.slane %v4248_v59, 6  ;;  %v4215_v46 = vrot.slane %v4167_v57, 7  ;;  %v4185_v45 = vrot.slane %v9334_v60, 7 }
0x108b   :  { %v4389_v56 = vadd.f32 %v4381_v28, %v4333_v22  ;;  %v4358_v42 = vrot.slane %v4334_v26, 4  ;;  %v4199_v23 = vsel %vm1417_vm11, 1.0, %v4183_v4  ;;  %v4342_v20 = vmul.f32 %v4286_v2, %v4254_v1 }
0x108c   :  { %v4320_v58 = vsel %vm1506_vm12, 0.0, %v4304_v48  ;;  %v4231_v18 = vsel %vm1417_vm11, 0.0, %v4215_v46  ;;  %v4288_v39 = vsel %vm1506_vm12, 1.0, %v4272_v0  ;;  %v4255_v8 = vmul.f32 %v9323_v41, %v4199_v23 }
0x108d   :  { %v4374_v29 = vsel %vm1595_vm13, 0.0, %v4358_v42  ;;  %v4328_v62 = vmul.f32 %v4320_v58, %v4256_v34  ;;  %v4239_v10 = vmul.f32 %v9323_v41, %v4231_v18  ;;  %v4217_v5 = vrot.slane %v4169_v17, 7  ;;  %v7214_v18 = vld [vmem:[%s9980_s10 + $0x40] sm:$0xff]  }
0x108e   :  { %v4382_v53 = vmul.f32 %v4374_v29, %v4342_v20  ;;  %v4395_v33 = vmul.f32 %v4387_v63, %v9163_v50  ;;  %v4201_v1 = vsel %vm1417_vm11, 1.0, %v4185_v45  ;;  %v4397_v6 = vmul.f32 %v4389_v56, %v9165_v32 }
0x108f   :  { %v4336_v7 = vadd.f32 %v4328_v62, %v4248_v59  ;;  %v4247_v12 = vadd.f32 %v4239_v10, %v4167_v57  ;;  %v4233_v40 = vsel %vm1417_vm11, 0.0, %v4217_v5  ;;  %v4344_v16 = vmul.f32 %v4288_v39, %v4256_v34  ;;  %v7217_v39 = vld [vmem:[%s9980_s10 + $0x58] sm:$0xff]   ;;  %v6358_v62 = vld [vmem:[%s9979_s9 + $0x2] ss:$0 sm:$0xff] }
0x1090   :  { %v4390_v27 = vadd.f32 %v4382_v53, %v4334_v26  ;;  %v4241_v9 = vmul.f32 %v9334_v60, %v4233_v40  ;;  %v4271_v41 = vrot.slane %v4255_v8, 6  ;;  %v4257_v51 = vmul.f32 %v9334_v60, %v4201_v1 }
0x1091   :  { %v4360_v22 = vrot.slane %v4336_v7, 4  ;;  %v4303_v2 = vrot.slane %v4247_v12, 6 }
0x1092   :  { %v4398_v13 = vmul.f32 %v4390_v27, %v9167_v43  ;;  %v4249_v63 = vadd.f32 %v4241_v9, %v4169_v17  ;;  %v4287_v61 = vsel %vm1506_vm12, 1.0, %v4271_v41  ;;  %v4273_v57 = vrot.slane %v4257_v51, 6 }
0x1093   :  { %v4376_v50 = vsel %vm1595_vm13, 0.0, %v4360_v22  ;;  %v4319_v15 = vsel %vm1506_vm12, 0.0, %v4303_v2  ;;  %v4343_v28 = vmul.f32 %v4287_v61, %v4255_v8 }
0x1094   :  { %v4384_v37 = vmul.f32 %v4376_v50, %v4344_v16  ;;  %v4327_v32 = vmul.f32 %v4319_v15, %v4255_v8  ;;  %v4402_v49 = vpack.c.bf16 %v4398_v13, %v9345_v24  ;;  %v4305_v21 = vrot.slane %v4249_v63, 6  ;;  %v4513_v50 = vpop.permute.xlu0 %4512  ;;  %v4515_v15 = vpop.permute.xlu1 %4514 }
0x1095   :  { %v4289_v0 = vsel %vm1506_vm12, 1.0, %v4273_v57  ;;  %v4412_v8 = vmul.f32 %v6358_v62, %v8971_v19 }
0x1096   :  { %v4392_v52 = vadd.f32 %v4384_v37, %v4336_v7  ;;  %v4335_v59 = vadd.f32 %v4327_v32, %v4247_v12  ;;  %v4321_v43 = vsel %vm1506_vm12, 0.0, %v4305_v21  ;;  %v4345_v42 = vmul.f32 %v4289_v0, %v4257_v51 }
0x1097   :  { %v4329_v4 = vmul.f32 %v4321_v43, %v4257_v51 }
0x1098   :  { %v4400_v34 = vmul.f32 %v4392_v52, %v9169_v55  ;;  %v4359_v60 = vrot.slane %v4335_v59, 4 }
0x1099   :  { %v4337_v17 = vadd.f32 %v4329_v4, %v4249_v63 }
0x109a   :  { %v4375_v26 = vsel %vm1595_vm13, 0.0, %v4359_v60  ;;  %v4404_v24 = vpack.c.bf16 %v4400_v34, %v9348_v54 }
0x109b   :  { %v4383_v48 = vmul.f32 %v4375_v26, %v4343_v28  ;;  %v4361_v46 = vrot.slane %v4337_v17, 4 }
0x109d   :  { %v4391_v56 = vadd.f32 %v4383_v48, %v4335_v59  ;;  %v4377_v23 = vsel %vm1595_vm13, 0.0, %v4361_v46 }
0x109e   :  { %v4385_v45 = vmul.f32 %v4377_v23, %v4345_v42 }
0x109f   :  { %v4399_v20 = vmul.f32 %v4391_v56, %v9171_v25  ;;  %v7215_v25 = vld [vmem:[%s9980_s10 + $0x48] sm:$0xff]   ;;  %v6424_v56 = vld [vmem:[%s9972_s2 + $0x3] ss:$0 sm:$0xff] }
0x10a0   :  { %v4393_v55 = vadd.f32 %v4385_v45, %v4337_v17 }
0x10a1   :  { %v4403_v58 = vpack.c.bf16 %v4399_v20, %v4395_v33 }
0x10a2   :  { %v4401_v29 = vmul.f32 %v4393_v55, %v9173_v35  ;;  %v7216_v35 = vld [vmem:[%s9980_s10 + $0x50] sm:$0xff]   ;;  %v7222_v55 = vld [vmem:[%s9976_s6 + $0x364] ss:$36 sps:$4 sm:$0xff]  }
0x10a3   :  { %4446 = vmatprep.mubr.bf16.mxu0 %v4403_v58  ;;  %v7225_v58 = vld [vmem:[%s9976_s6 + $0x36c] ss:$36 sps:$4 sm:$0xff]  }
0x10a4   :  { %4447 = vmatmul.mubr.bf16.vlgmr.msra.gmra.mrb[68].mxu0 %v4402_v49  ;;  %v4405_v54 = vpack.c.bf16 %v4401_v29, %v4397_v6  ;;  %v4413_v6 = vmul.f32 %v6358_v62, %v8973_v44  ;;  %v7223_v29 = vld [vmem:[%s9976_s6 + $0x368] ss:$36 sps:$4 sm:$0xff]   ;;  %v7234_v62 = vld [vmem:[%s9976_s6 + $0x3f4] ss:$36 sps:$4 sm:$0xff]  }
0x10a5   :  { %6884 = vmatpush3.bf16.msra.mxu0 %v7214_v18  ;;  %6891 = vmatprep.mubr.msk.bf16.mxu0 %vm7630_vm8, %v7628_v11  ;;  %v7220_v18 = vld [vmem:[%s9976_s6 + $0x360] ss:$36 sps:$4 sm:$0xff]  }
0x10a6   :  { %6885 = vmatprep.subr.bf16.mxu0 %v7628_v11  ;;  %4487 = vmatprep.mubr.bf16.mxu1 %v4405_v54  ;;  %v7228_v54 = vld [vmem:[%s9976_s6 + $0x3ac] ss:$36 sps:$4 sm:$0xff]  }
0x10a7   :  { %4488 = vmatmul.mubr.bf16.vlgmr.msra.gmra.mrb[80].mxu1 %v4404_v24 }
0x10a8   :  { %6899 = vmatprep.mubr.msk.bf16.mxu1 %vm7630_vm8, %v7628_v11 }
0x10a9   :  { %6886 = vmatpush3.bf16.msra.mxu0 %v7215_v25  ;;  %v7231_v25 = vld [vmem:[%s9976_s6 + $0x3b4] ss:$36 sps:$4 sm:$0xff]  }
0x10aa   :  { %6887 = vmatprep.subr.bf16.mxu0 %v7628_v11 }
0x10ad   :  { %6888 = vmatpush3.bf16.msra.mxu0 %v7216_v35  ;;  %v7226_v35 = vld [vmem:[%s9976_s6 + $0x3a8] ss:$36 sps:$4 sm:$0xff]  }
0x10ae   :  { %6889 = vmatprep.subr.bf16.mxu0 %v7628_v11 }
0x10b1   :  { %6890 = vmatpush3.bf16.msra.mxu0 %v7217_v39  ;;  %v7229_v39 = vld [vmem:[%s9976_s6 + $0x3b0] ss:$36 sps:$4 sm:$0xff]  }
0x10b2   :  { %4987 = vmatprep.subr.bf16.mxu0 %v7222_v55 }
0x1177   :  { %v6655_v10 = vpop.f32.mrb[68].mxu0 }
0x1178   :  { %v6656_v53 = vpop.f32.mrb[69].mxu0 }
0x1179   :  { %v6657_v5 = vadd.f32 %v6656_v53, %v6655_v10  ;;  %v6658_v33 = vpop.f32.mrb[70].mxu0  ;;  %v7237_v10 = vld [vmem:[%s9976_s6 + $0x3fc] ss:$36 sps:$4 sm:$0xff]   ;;  %v7232_v53 = vld [vmem:[%s9976_s6 + $0x3f0] ss:$36 sps:$4 sm:$0xff]  }
0x117a   :  { %v6659_v7 = vpop.f32.mrb[71].mxu0  ;;  %v6677_v12 = vpop.f32.mrb[80].mxu1 }
0x117b   :  { %v4449_v1 = vadd.f32 %v6657_v5, %v4412_v8  ;;  %v6660_v27 = vadd.f32 %v6659_v7, %v6658_v33  ;;  %v6678_v40 = vpop.f32.mrb[81].mxu1  ;;  %v7235_v8 = vld [vmem:[%s9976_s6 + $0x3f8] ss:$36 sps:$4 sm:$0xff]   ;;  %v7243_v33 = vld [vmem:[%s9976_s6 + $0x444] ss:$36 sps:$4 sm:$0xff]  }
0x117c   :  { %v6679_v22 = vadd.f32 %v6678_v40, %v6677_v12  ;;  %v6680_v2 = vpop.f32.mrb[82].mxu1  ;;  %v7240_v5 = vld [vmem:[%s9976_s6 + $0x43c] ss:$36 sps:$4 sm:$0xff]  }
0x117d   :  { %v4452_v9 = vadd.f32 %v6660_v27, %v4413_v6  ;;  %v6681_v13 = vpop.f32.mrb[83].mxu1  ;;  %v7238_v7 = vld [vmem:[%s9976_s6 + $0x438] ss:$36 sps:$4 sm:$0xff]   ;;  %v7241_v12 = vld [vmem:[%s9976_s6 + $0x440] ss:$36 sps:$4 sm:$0xff]  }
0x117e   :  { %v4490_v16 = vadd.f32 %v6679_v22, %v4449_v1  ;;  %v6682_v41 = vadd.f32 %v6681_v13, %v6680_v2  ;;  %v7246_v1 = vld [vmem:[%s9976_s6 + $0x374] ss:$36 sps:$4 sm:$0xff]   ;;  %v7249_v6 = vld [vmem:[%s9976_s6 + $0x37c] ss:$36 sps:$4 sm:$0xff]   ;;  %v6371_v2 = vld [vmem:[%s9974_s4 + $0xc] sm:$0xf] }
0x1180   :  { %v4493_v51 = vadd.f32 %v6682_v41, %v4452_v9  ;;  %v4518_v63 = vmul.f32 %v4513_v50, %v4490_v16  ;;  %v4744_v41 = vrot.slane %v6371_v2, %v7889_v30  ;;  %v4762_v50 = vrot.slane %v6371_v2, %v7897_v36 }
0x1182   :  { %v4519_v19 = vmul.f32 %v4515_v15, %v4493_v51  ;;  %v4752_v51 = vrot.slane %v6371_v2, %v7891_v31 }
0x1184   :  { %v4520_v37 = vpack.c.bf16 %v4519_v19, %v4518_v63 }
0x1186   :  { %6892 = vmatmul.mubr.msk.bf16.vlgmr.msra.gmra.mrb[72].mxu0 %vm364_vm9, %v4520_v37 }
0x1187   :  { %5019 = vmatprep.mubr.bf16.mxu0 %v7627_v3  ;;  %4988 = vmatpush1.bf16.msra.mxu0 %v7220_v18 }
0x1188   :  { %4989 = vmatprep.subr.bf16.mxu0 %v7228_v54 }
0x118b   :  { %4990 = vmatpush1.bf16.msra.mxu0 %v7226_v35 }
0x118c   :  { %4991 = vmatprep.subr.bf16.mxu0 %v7234_v62 }
0x118f   :  { %4992 = vmatpush1.bf16.msra.mxu0 %v7232_v53 }
0x1190   :  { %4993 = vmatprep.subr.bf16.mxu0 %v7240_v5 }
0x1193   :  { %4994 = vmatpush1.bf16.msra.mxu0 %v7238_v7  ;;  %v7244_v7 = vld [vmem:[%s9976_s6 + $0x370] ss:$36 sps:$4 sm:$0xff]  }
0x1194   :  { %5073 = vmatprep.subr.bf16.mxu0 %v7246_v1 }
0x1259   :  { %v4582_v32 = vpop.f32.mrb[72].mxu0 }
0x125a   :  { %v9410_v44 = vadd.f32 %v4582_v32, %v8878_v47  ;;  %v6893_v49 = vpop.f32.mrb[73].mxu0  ;;  %v7218_v47 = vld [vmem:[%s9973_s3 + $0x30] sm:$0xff]   ;;  %v4772_v32 = vrot.slane %v6371_v2, %v7900_v38  ;;  %v7258_v2 = vld [vmem:[%s9976_s6 + $0x404] ss:$36 sps:$4 sm:$0xff]  }
0x125b   :  { %v4585_v21 = vpop.f32.mrb[74].mxu0  ;;  %6896 = vmatpush3.bf16.msra.mxu1 %v7218_v47 }
0x125c   :  { %v9413_v52 = vadd.f32 %v4585_v21, %v8881_v14  ;;  %v6894_v61 = vpop.f32.mrb[75].mxu0  ;;  %v4658_v59 = vmul.f32 %v9410_v44, %v9410_v44  ;;  %v7219_v14 = vld [vmem:[%s9973_s3 + $0x38] sm:$0xff]   ;;  %6897 = vmatprep.subr.bf16.mxu1 %v7628_v11 }
0x125e   :  { %v4660_v57 = vsel %vm510_vm7, %v4658_v59, 0.0  ;;  %v4659_v43 = vmul.f32 %v9413_v52, %v9413_v52 }
0x125f   :  { %4661 = vadd.xlane.f32.xlu1 %v4660_v57  ;;  %6898 = vmatpush3.bf16.msra.mxu1 %v7219_v14 }
0x1260   :  { %v4663_v34 = vsel %vm510_vm7, %v4659_v43, 0.0  ;;  %5030 = vmatprep.subr.bf16.mxu1 %v7225_v58 }
0x1261   :  { %4664 = vadd.xlane.f32.xlu0 %v4663_v34 }
0x12ec   :  { %v4662_v60 = vpop.xlane.xlu1 %4661 }
0x12ed   :  { %v4666_v4 = vmul.f32 0.03125, %v4662_v60 }
0x12ee   :  { %v4665_v28 = vpop.xlane.xlu0 %4664 }
0x12ef   :  { %v4668_v26 = vadd.f32 1e-05, %v4666_v4  ;;  %v4667_v0 = vmul.f32 0.03125, %v4665_v28 }
0x12f1   :  { %7410 = vrsqrt.f32 %v4668_v26  ;;  %v4669_v17 = vadd.f32 1e-05, %v4667_v0  ;;  %v6428_v0 = vld [vmem:[%s9975_s5 + $0x3] ss:$0 sm:$0xff] }
0x12f3   :  { %7412 = vrsqrt.f32 %v4669_v17 }
0x12fb   :  { %v7411_v24 = vpop.eup %7410 }
0x12fc   :  { %v4672_v48 = vmul.f32 %v7411_v24, %v9410_v44 }
0x12fd   :  { %v7413_v46 = vpop.eup %7412 }
0x12fe   :  { %v4673_v42 = vmul.f32 %v7413_v46, %v9413_v52  ;;  %v4680_v23 = vmul.f32 %v6424_v56, %v4672_v48 }
0x1300   :  { %v4681_v45 = vmul.f32 %v6424_v56, %v4673_v42 }
0x1302   :  { %v4682_v20 = vpack.c.bf16 %v4681_v45, %v4680_v23 }
0x1304   :  { %6900 = vmatmul.mubr.msk.bf16.vlgmr.msra.gmra.mrb[84].mxu1 %vm510_vm7, %v4682_v20 }
0x1305   :  { %5062 = vmatprep.mubr.bf16.mxu1 %v7627_v3  ;;  %5031 = vmatpush1.bf16.msra.mxu1 %v7223_v29 }
0x1306   :  { %5032 = vmatprep.subr.bf16.mxu1 %v7231_v25 }
0x1309   :  { %5033 = vmatpush1.bf16.msra.mxu1 %v7229_v39 }
0x130a   :  { %5034 = vmatprep.subr.bf16.mxu1 %v7237_v10 }
0x130d   :  { %5035 = vmatpush1.bf16.msra.mxu1 %v7235_v8 }
0x130e   :  { %5036 = vmatprep.subr.bf16.mxu1 %v7243_v33 }
0x1311   :  { %5037 = vmatpush1.bf16.msra.mxu1 %v7241_v12  ;;  %v7247_v12 = vld [vmem:[%s9976_s6 + $0x378] ss:$36 sps:$4 sm:$0xff]  }
0x1312   :  { %5116 = vmatprep.subr.bf16.mxu1 %v7249_v6  ;;  %v7252_v6 = vld [vmem:[%s9976_s6 + $0x3bc] ss:$36 sps:$4 sm:$0xff]  }
0x13d7   :  { %v4732_v27 = vpop.f32.mrb[84].mxu1 }
0x13d8   :  { %4739 = vst.msk [vmem:[#allocation2 + $0x3] sm:$0xff] %vm364_vm9, %v4732_v27  ;;  %v6478_v40 = vmul.f32 -1.442695, %v4732_v27  ;;  %v6901_v22 = vpop.f32.mrb[85].mxu1  ;;  %v4745_v19 = vmul.f32 %v4744_v41, %v4732_v27 }
0x13d9   :  { %v4735_v9 = vpop.f32.mrb[86].mxu1  ;;  %v7253_v22 = vld [vmem:[%s9976_s6 + $0x3c0] ss:$36 sps:$4 sm:$0xff]  }
0x13da   :  { %7414 = vpow2.f32 %v6478_v40  ;;  %4740 = vst.msk [vmem:[#allocation2 + $0x13] sm:$0xff] %vm364_vm9, %v4735_v9  ;;  %v6479_v13 = vmul.f32 -1.442695, %v4735_v9  ;;  %v6902_v16 = vpop.f32.mrb[87].mxu1  ;;  %v4746_v43 = vmul.f32 %v4744_v41, %v4735_v9  ;;  %v7250_v40 = vld [vmem:[%s9976_s6 + $0x3b8] ss:$36 sps:$4 sm:$0xff]  }
0x13db   :  { %v7259_v16 = vld [vmem:[%s9976_s6 + $0x408] ss:$36 sps:$4 sm:$0xff]  }
0x13dc   :  { %7416 = vpow2.f32 %v6479_v13  ;;  %v7256_v13 = vld [vmem:[%s9976_s6 + $0x400] ss:$36 sps:$4 sm:$0xff]   ;;  %v7264_v41 = vld [vmem:[%s9976_s6 + $0x44c] ss:$36 sps:$4 sm:$0xff]  }
0x13df   :  { %v4747_v15 = vld [vmem:[#allocation2 + $0x2] sm:$0xff] }
0x13e0   :  { %v4757_v63 = vld [vmem:[#allocation2 + $0x1] sm:$0xff]  ;;  %v4753_v37 = vmul.f32 %v4752_v51, %v4747_v15  ;;  %v7265_v15 = vld [vmem:[%s9976_s6 + $0x450] ss:$36 sps:$4 sm:$0xff]  }
0x13e1   :  { %v4767_v49 = vld [vmem:[#allocation2] sm:$0xff]  ;;  %v4748_v21 = vld [vmem:[#allocation2 + $0x12] sm:$0xff]  ;;  %v4763_v57 = vmul.f32 %v4762_v50, %v4757_v63 }
0x13e2   :  { %v4758_v61 = vld [vmem:[#allocation2 + $0x11] sm:$0xff]  ;;  %v4755_v59 = vadd.f32 %v4753_v37, %v4745_v19  ;;  %v4754_v34 = vmul.f32 %v4752_v51, %v4748_v21  ;;  %v4773_v4 = vmul.f32 %v4772_v32, %v4767_v49  ;;  %v7268_v63 = vld [vmem:[%s9976_s6 + $0x380] ss:$36 sps:$4 sm:$0xff]   ;;  %v7269_v37 = vld [vmem:[%s9976_s6 + $0x3c8] ss:$36 sps:$4 sm:$0xff]  }
0x13e3   :  { %v4768_v47 = vld [vmem:[#allocation2 + $0x10] sm:$0xff]  ;;  %v4764_v26 = vmul.f32 %v4762_v50, %v4758_v61  ;;  %v7262_v50 = vld [vmem:[%s9976_s6 + $0x448] ss:$36 sps:$4 sm:$0xff]  }
0x13e4   :  { %v7415_v14 = vpop.eup %7414  ;;  %v4765_v60 = vadd.f32 %v4763_v57, %v4755_v59  ;;  %v4756_v28 = vadd.f32 %v4754_v34, %v4746_v43  ;;  %v4774_v56 = vmul.f32 %v4772_v32, %v4768_v47  ;;  %v7267_v51 = vld [vmem:[%s9976_s6 + $0x454] ss:$36 sps:$4 sm:$0xff]   ;;  %v9579_v32 = vld [vmem:[%s9981_s11] ss:$16 sps:$4 sm:$0xff]   ;;  %v7561_v47 = vld [vmem:[%s9981_s11 + $0xc] ss:$16 sps:$4 sm:$0xff]  }
0x13e5   :  { %v5793_v17 = vadd.f32 1.0, %v7415_v14  ;;  %v7554_v19 = vld [vmem:[%s9981_s11 + $0x4] ss:$16 sps:$4 sm:$0xff]   ;;  %v9596_v61 = vld [vmem:[%s9981_s11 + $0x20] ss:$16 sps:$4 sm:$0xff]  }
0x13e6   :  { %v7417_v24 = vpop.eup %7416  ;;  %v4775_v48 = vadd.f32 %v4773_v4, %v4765_v60  ;;  %v4766_v46 = vadd.f32 %v4764_v26, %v4756_v28  ;;  %v9585_v49 = vld [vmem:[%s9981_s11 + $0x24] ss:$16 sps:$4 sm:$0xff]   ;;  %v7271_v57 = vld [vmem:[%s9976_s6 + $0x458] ss:$36 sps:$4 sm:$0xff]   ;;  %v9612_v43 = vld [vmem:[%s9981_s11 + $0x40] ss:$16 sps:$4 sm:$0xff]  }
0x13e7   :  { %7418 = vrcp.f32 %v5793_v17  ;;  %v5794_v42 = vadd.f32 1.0, %v7417_v24  ;;  %v7270_v21 = vld [vmem:[%s9976_s6 + $0x410] ss:$36 sps:$4 sm:$0xff]   ;;  %v9635_v60 = vld [vmem:[%s9981_s11 + $0x8] ss:$16 sps:$4 sm:$0xff]  }
0x13e8   :  { %v4783_v23 = vadd.f32 %v6428_v0, %v4775_v48  ;;  %v4776_v45 = vadd.f32 %v4774_v56, %v4766_v46  ;;  %v9602_v59 = vld [vmem:[%s9981_s11 + $0x44] ss:$16 sps:$4 sm:$0xff]   ;;  %v9627_v14 = vld [vmem:[%s9981_s11 + $0x60] ss:$16 sps:$4 sm:$0xff]   ;;  %v9642_v4 = vld [vmem:[%s9981_s11 + $0x2c] ss:$16 sps:$4 sm:$0xff]  }
0x13e9   :  { %7420 = vrcp.f32 %v5794_v42  ;;  %v9618_v34 = vld [vmem:[%s9981_s11 + $0x64] ss:$16 sps:$4 sm:$0xff]   ;;  %v9648_v28 = vld [vmem:[%s9981_s11 + $0x28] ss:$16 sps:$4 sm:$0xff]   ;;  %v9654_v26 = vld [vmem:[%s9981_s11 + $0x4c] ss:$16 sps:$4 sm:$0xff]  }
0x13ea   :  { %v6429_v20 = vmul.f32 -1.442695, %v4783_v23  ;;  %v4784_v55 = vadd.f32 %v6428_v0, %v4776_v45  ;;  %v9660_v0 = vld [vmem:[%s9981_s11 + $0x48] ss:$16 sps:$4 sm:$0xff]   ;;  %v9666_v17 = vld [vmem:[%s9981_s11 + $0x6c] ss:$16 sps:$4 sm:$0xff]  }
0x13eb   :  { %v9672_v24 = vld [vmem:[%s9981_s11 + $0x68] ss:$16 sps:$4 sm:$0xff]  }
0x13ec   :  { %7422 = vpow2.f32 %v6429_v20  ;;  %v6430_v58 = vmul.f32 -1.442695, %v4784_v55 }
0x13ee   :  { %7424 = vpow2.f32 %v6430_v58 }
0x13f1   :  { %v7419_v18 = vpop.eup %7418 }
0x13f2   :  { %v5799_v29 = vmul.f32 %v7419_v18, %v4732_v27  ;;  %v7255_v27 = vld [vmem:[%s9976_s6 + $0x3c4] ss:$36 sps:$4 sm:$0xff]  }
0x13f3   :  { %v7421_v54 = vpop.eup %7420 }
0x13f4   :  { %5803 = vrot.lane.b32.xlu0 %v5799_v29, %s7631_s19  ;;  %v5800_v25 = vmul.f32 %v7421_v54, %v4735_v9  ;;  %v7261_v9 = vld [vmem:[%s9976_s6 + $0x40c] ss:$36 sps:$4 sm:$0xff]  }
0x13f6   :  { %v7423_v35 = vpop.eup %7422  ;;  %5805 = vrot.lane.b32.xlu1 %v5800_v25, %s7631_s19 }
0x13f7   :  { %v4791_v39 = vadd.f32 1.0, %v7423_v35 }
0x13f8   :  { %v7425_v62 = vpop.eup %7424 }
0x13f9   :  { %7426 = vrcp.f32 %v4791_v39  ;;  %v4792_v10 = vadd.f32 1.0, %v7425_v62 }
0x13fb   :  { %7428 = vrcp.f32 %v4792_v10  ;;  %v6472_v10 = vld [vmem:[%s9977_s7 + $0x3] ss:$0 sm:$0xff] }
0x1403   :  { %v7427_v53 = vpop.eup %7426 }
0x1404   :  { %v9503_v5 = vmul.f32 %v7427_v53, %v4783_v23 }
0x1405   :  { %v7429_v8 = vpop.eup %7428 }
0x1406   :  { %v9505_v33 = vmul.f32 %v7429_v8, %v4784_v55 }
0x1408   :  { %v9515_v1 = vpack.c.bf16 %v9505_v33, %v9503_v5 }
0x140a   :  { %6467 = vmatmul.mubr.msk.bf16.vlgmr.msra.gmra.mrb[76].mxu0 %vm364_vm9, %v9515_v1  ;;  %6468 = vmatmul.mubr.msk.bf16.vlgmr.msra.gmra.mrb[88].mxu1 %vm364_vm9, %v9515_v1 }
0x140b   :  { %5074 = vmatpush1.bf16.msra.mxu0 %v7244_v7  ;;  %5117 = vmatpush1.bf16.msra.mxu1 %v7247_v12 }
0x140c   :  { %5075 = vmatprep.subr.bf16.mxu0 %v7252_v6  ;;  %5118 = vmatprep.subr.bf16.mxu1 %v7255_v27 }
0x140d   :  { %5105 = vmatprep.mubr.bf16.mxu0 %v7627_v3  ;;  %5148 = vmatprep.mubr.bf16.mxu1 %v7627_v3 }
0x140f   :  { %5076 = vmatpush1.bf16.msra.mxu0 %v7250_v40  ;;  %5119 = vmatpush1.bf16.msra.mxu1 %v7253_v22 }
0x1410   :  { %5077 = vmatprep.subr.bf16.mxu0 %v7258_v2  ;;  %5120 = vmatprep.subr.bf16.mxu1 %v7261_v9 }
0x1413   :  { %5078 = vmatpush1.bf16.msra.mxu0 %v7256_v13  ;;  %5121 = vmatpush1.bf16.msra.mxu1 %v7259_v16 }
0x1414   :  { %5079 = vmatprep.subr.bf16.mxu0 %v7264_v41  ;;  %5122 = vmatprep.subr.bf16.mxu1 %v7267_v51 }
0x1417   :  { %5080 = vmatpush1.bf16.msra.mxu0 %v7262_v50  ;;  %5123 = vmatpush1.bf16.msra.mxu1 %v7265_v15 }
0x1418   :  { %6903 = vmatprep.subr.bf16.mxu0 %v7628_v11  ;;  %5230 = vmatprep.subr.bf16.mxu1 %v7554_v19 }
0x141a   :  { %6469 = vmatmul.mubr.msk.bf16.vlgmr.msra.gmra.mrb[80].mxu0 %vm364_vm9, %v9515_v1  ;;  %6470 = vmatmul.mubr.msk.bf16.vlgmr.msra.gmra.mrb[92].mxu1 %vm364_vm9, %v9515_v1 }
0x141b   :  { %6904 = vmatpush3.bf16.msra.mxu0 %v7268_v63  ;;  %6911 = vmatprep.mubr.msk.bf16.mxu0 %vm7630_vm8, %v7628_v11 }
0x141c   :  { %6905 = vmatprep.subr.bf16.mxu0 %v7628_v11  ;;  %5231 = vmatpush1.bf16.msra.mxu1 %v9579_v32 }
0x141d   :  { %5232 = vmatprep.subr.bf16.mxu1 %v9585_v49  ;;  %5262 = vmatprep.mubr.bf16.mxu1 %v7627_v3 }
0x141f   :  { %6906 = vmatpush3.bf16.msra.mxu0 %v7269_v37 }
0x1420   :  { %6907 = vmatprep.subr.bf16.mxu0 %v7628_v11  ;;  %5233 = vmatpush1.bf16.msra.mxu1 %v9596_v61 }
0x1421   :  { %5234 = vmatprep.subr.bf16.mxu1 %v9602_v59 }
0x1423   :  { %6908 = vmatpush3.bf16.msra.mxu0 %v7270_v21 }
0x1424   :  { %6909 = vmatprep.subr.bf16.mxu0 %v7628_v11  ;;  %5235 = vmatpush1.bf16.msra.mxu1 %v9612_v43 }
0x1425   :  { %5236 = vmatprep.subr.bf16.mxu1 %v9618_v34 }
0x1427   :  { %6910 = vmatpush3.bf16.msra.mxu0 %v7271_v57 }
0x1428   :  { %5273 = vmatprep.subr.bf16.mxu0 %v7561_v47  ;;  %5237 = vmatpush1.bf16.msra.mxu1 %v9627_v14 }
0x1429   :  { %5322 = vmatprep.subr.bf16.mxu1 %v7554_v19 }
0x142a   :  { %6912 = vmatmul.mubr.msk.bf16.vlgmr.msra.gmra.mrb[84].mxu0 %vm364_vm9, %v9515_v1 }
0x142b   :  { %5274 = vmatpush1.bf16.msra.mxu0 %v9635_v60  ;;  %5305 = vmatprep.mubr.bf16.mxu0 %v7627_v3 }
0x142c   :  { %5275 = vmatprep.subr.bf16.mxu0 %v9642_v4 }
0x142f   :  { %5276 = vmatpush1.bf16.msra.mxu0 %v9648_v28 }
0x1430   :  { %5277 = vmatprep.subr.bf16.mxu0 %v9654_v26 }
0x1433   :  { %5278 = vmatpush1.bf16.msra.mxu0 %v9660_v0 }
0x1434   :  { %5279 = vmatprep.subr.bf16.mxu0 %v9666_v17 }
0x1437   :  { %5280 = vmatpush1.bf16.msra.mxu0 %v9672_v24 }
0x1438   :  { %5365 = vmatprep.subr.bf16.mxu0 %v7561_v47 }
0x14dd   :  { %v9675_v48 = vpop.f32.mrb[76].mxu0  ;;  %v9677_v46 = vpop.f32.mrb[88].mxu1 }
0x14de   :  { %v9679_v56 = vpop.f32.mrb[77].mxu0  ;;  %v9681_v42 = vpop.f32.mrb[89].mxu1 }
0x14df   :  { %v9683_v23 = vpop.f32.mrb[78].mxu0  ;;  %v9685_v45 = vpop.f32.mrb[90].mxu1 }
0x14e0   :  { %v9687_v20 = vpop.f32.mrb[79].mxu0  ;;  %v9689_v55 = vpop.f32.mrb[91].mxu1 }
0x14ed   :  { %v9691_v58 = vpop.f32.mrb[80].mxu0  ;;  %v9693_v18 = vpop.f32.mrb[92].mxu1 }
0x14ee   :  { %v9695_v29 = vpop.f32.mrb[81].mxu0  ;;  %v9697_v54 = vpop.f32.mrb[93].mxu1 }
0x14ef   :  { %v9699_v25 = vpop.f32.mrb[82].mxu0  ;;  %v9701_v35 = vpop.f32.mrb[94].mxu1 }
0x14f0   :  { %v9703_v39 = vpop.f32.mrb[83].mxu0  ;;  %v9705_v62 = vpop.f32.mrb[95].mxu1 }
0x14fd   :  { %v5193_v53 = vpop.f32.mrb[84].mxu0 }
0x14fe   :  { %v5206_v8 = vadd.f32 %v6472_v10, %v5193_v53  ;;  %v6913_v7 = vpop.f32.mrb[85].mxu0 }
0x14ff   :  { %v5196_v12 = vpop.f32.mrb[86].mxu0 }
0x1500   :  { %v5210_v1 = vand.u32 2147483647, %v5206_v8  ;;  %v5207_v6 = vadd.f32 %v6472_v10, %v5196_v12  ;;  %v6914_v27 = vpop.f32.mrb[87].mxu0  ;;  %v5208_v63 = vmax.f32 %v5206_v8, 0.0  ;;  %v7585_v8 = vld [vmem:[%s9982_s12 + $0x98] sm:$0xff]  }
0x1501   :  { %v7587_v27 = vld [vmem:[%s9982_s12 + $0xe0] sm:$0xff]  }
0x1502   :  { %v5212_v40 = vsub.f32 0.0, %v5210_v1  ;;  %v5211_v22 = vand.u32 2147483647, %v5207_v6  ;;  %v5209_v57 = vmax.f32 %v5207_v6, 0.0  ;;  %v7586_v6 = vld [vmem:[%s9982_s12 + $0x60] sm:$0xff]  }
0x1504   :  { %v5214_v2 = vmul.f32 1.442695, %v5212_v40  ;;  %v5213_v9 = vsub.f32 0.0, %v5211_v22  ;;  %v7588_v40 = vld [vmem:[%s9982_s12 + $0x20] sm:$0xff]  }
0x1505   :  { %v7589_v22 = vld [vmem:[%s9982_s12 + $0xa0] sm:$0xff]  }
0x1506   :  { %7430 = vpow2.f32 %v5214_v2  ;;  %v5216_v13 = vmul.f32 1.442695, %v5213_v9  ;;  %v7590_v2 = vld [vmem:[%s9982_s12 + $0x68] sm:$0xff]  }
0x1507   :  { %v7591_v9 = vld [vmem:[%s9982_s12 + $0xe8] sm:$0xff]  }
0x1508   :  { %7432 = vpow2.f32 %v5216_v13  ;;  %v7592_v13 = vld [vmem:[%s9982_s12 + $0x28] sm:$0xff]  }
0x1510   :  { %v7431_v16 = vpop.eup %7430 }
0x1511   :  { %v5218_v41 = vadd.f32 1.0, %v7431_v16  ;;  %v7593_v16 = vld [vmem:[%s9982_s12 + $0xa8] sm:$0xff]  }
0x1512   :  { %v7433_v51 = vpop.eup %7432 }
0x1513   :  { %7434 = vlog2.f32 %v5218_v41  ;;  %v5219_v50 = vadd.f32 1.0, %v7433_v51  ;;  %v7594_v41 = vld [vmem:[%s9982_s12 + $0x70] sm:$0xff]  }
0x1514   :  { %v7595_v51 = vld [vmem:[%s9982_s12 + $0xf0] sm:$0xff]  }
0x1515   :  { %7436 = vlog2.f32 %v5219_v50  ;;  %v7596_v50 = vld [vmem:[%s9982_s12 + $0x30] sm:$0xff]  }
0x151d   :  { %v7435_v15 = vpop.eup %7434 }
0x151e   :  { %v5221_v19 = vmul.f32 0.6931472, %v7435_v15  ;;  %v7597_v15 = vld [vmem:[%s9982_s12 + $0xb0] sm:$0xff]  }
0x151f   :  { %v7437_v37 = vpop.eup %7436 }
0x1520   :  { %v5224_v21 = vadd.f32 %v5221_v19, %v5208_v63  ;;  %v5223_v47 = vmul.f32 0.6931472, %v7437_v37  ;;  %v7598_v63 = vld [vmem:[%s9982_s12 + $0x78] sm:$0xff]  }
0x1521   :  { %v7599_v19 = vld [vmem:[%s9982_s12 + $0xf8] sm:$0xff]  }
0x1522   :  { %v5225_v10 = vadd.f32 %v5223_v47, %v5209_v57  ;;  %v5316_v53 = vmul.f32 %v5224_v21, %v9503_v5  ;;  %v7600_v37 = vld [vmem:[%s9982_s12 + $0x38] sm:$0xff]   ;;  %v6414_v57 = vld [vmem:[%s9978_s8 + $0xc] sm:$0xf] }
0x1523   :  { %v5412_v47 = vrot.slane %v6414_v57, %v7900_v38 }
0x1524   :  { %v5226_v7 = vpack.c.bf16 %v5225_v10, %v5224_v21  ;;  %v5317_v12 = vmul.f32 %v5225_v10, %v9505_v33  ;;  %v7601_v21 = vld [vmem:[%s9982_s12 + $0xb8] sm:$0xff]   ;;  %v5420_v10 = vrot.slane %v6414_v57, %v7891_v31 }
0x1526   :  { %v5318_v1 = vpack.c.bf16 %v5317_v12, %v5316_v53  ;;  %6473 = vmatmul.mubr.msk.bf16.vlgmr.msra.gmra.mrb[96].mxu1 %vm364_vm9, %v5226_v7  ;;  %6474 = vmatmul.mubr.msk.bf16.vlgmr.msra.gmra.mrb[88].mxu0 %vm364_vm9, %v5226_v7  ;;  %v5416_v53 = vrot.slane %v6414_v57, %v7897_v36  ;;  %v5424_v7 = vrot.slane %v6414_v57, %v7889_v30 }
0x1527   :  { %5323 = vmatpush1.bf16.msra.mxu1 %v9579_v32  ;;  %5366 = vmatpush1.bf16.msra.mxu0 %v9635_v60  ;;  %v7571_v32 = vld [vmem:[%s9982_s12 + $0xc0] sm:$0xff]   ;;  %v7578_v60 = vld [vmem:[%s9982_s12 + $0x50] sm:$0xff]  }
0x1528   :  { %5324 = vmatprep.subr.bf16.mxu1 %v9585_v49  ;;  %5367 = vmatprep.subr.bf16.mxu0 %v9642_v4  ;;  %v7572_v49 = vld [vmem:[%s9982_s12] sm:$0xff]   ;;  %v7579_v4 = vld [vmem:[%s9982_s12 + $0xd0] sm:$0xff]  }
0x1529   :  { %5354 = vmatprep.mubr.bf16.mxu1 %v7627_v3  ;;  %5397 = vmatprep.mubr.bf16.mxu0 %v7627_v3  ;;  %v7570_v3 = vld [vmem:[%s9982_s12 + $0x40] sm:$0xff]  }
0x152b   :  { %5325 = vmatpush1.bf16.msra.mxu1 %v9596_v61  ;;  %5368 = vmatpush1.bf16.msra.mxu0 %v9648_v28  ;;  %v7573_v61 = vld [vmem:[%s9982_s12 + $0x80] sm:$0xff]   ;;  %v7580_v28 = vld [vmem:[%s9982_s12 + $0x10] sm:$0xff]  }
0x152c   :  { %5326 = vmatprep.subr.bf16.mxu1 %v9602_v59  ;;  %5369 = vmatprep.subr.bf16.mxu0 %v9654_v26  ;;  %v7574_v59 = vld [vmem:[%s9982_s12 + $0x48] sm:$0xff]   ;;  %v7581_v26 = vld [vmem:[%s9982_s12 + $0x90] sm:$0xff]  }
0x152f   :  { %5327 = vmatpush1.bf16.msra.mxu1 %v9612_v43  ;;  %5370 = vmatpush1.bf16.msra.mxu0 %v9660_v0  ;;  %v7575_v43 = vld [vmem:[%s9982_s12 + $0xc8] sm:$0xff]   ;;  %v7582_v0 = vld [vmem:[%s9982_s12 + $0x58] sm:$0xff]  }
0x1530   :  { %5328 = vmatprep.subr.bf16.mxu1 %v9618_v34  ;;  %5371 = vmatprep.subr.bf16.mxu0 %v9666_v17  ;;  %v7576_v34 = vld [vmem:[%s9982_s12 + $0x8] sm:$0xff]   ;;  %v7583_v17 = vld [vmem:[%s9982_s12 + $0xd8] sm:$0xff]  }
0x1533   :  { %5329 = vmatpush1.bf16.msra.mxu1 %v9627_v14  ;;  %5372 = vmatpush1.bf16.msra.mxu0 %v9672_v24  ;;  %v7577_v14 = vld [vmem:[%s9982_s12 + $0x88] sm:$0xff]   ;;  %v7584_v24 = vld [vmem:[%s9982_s12 + $0x18] sm:$0xff]  }
0x1534   :  { %6696 = vmatprep.subr.bf16.mxu1 %v7570_v3  ;;  %6718 = vmatprep.subr.bf16.mxu0 %v7571_v32 }
0x1536   :  { %6475 = vmatmul.mubr.msk.bf16.vlgmr.msra.gmra.mrb[100].mxu1 %vm364_vm9, %v5318_v1  ;;  %6476 = vmatmul.mubr.msk.bf16.vlgmr.msra.gmra.mrb[92].mxu0 %vm364_vm9, %v5318_v1 }
0x1537   :  { %6697 = vmatpush3.bf16.msra.mxu1 %v7572_v49  ;;  %6719 = vmatpush3.bf16.msra.mxu0 %v7573_v61 }
0x1538   :  { %6698 = vmatprep.subr.bf16.mxu1 %v7574_v59  ;;  %6720 = vmatprep.subr.bf16.mxu0 %v7575_v43 }
0x153b   :  { %6699 = vmatpush3.bf16.msra.mxu1 %v7576_v34  ;;  %6721 = vmatpush3.bf16.msra.mxu0 %v7577_v14 }
0x153c   :  { %6700 = vmatprep.subr.bf16.mxu1 %v7578_v60  ;;  %6722 = vmatprep.subr.bf16.mxu0 %v7579_v4 }
0x153f   :  { %6701 = vmatpush3.bf16.msra.mxu1 %v7580_v28  ;;  %6723 = vmatpush3.bf16.msra.mxu0 %v7581_v26 }
0x1540   :  { %6702 = vmatprep.subr.bf16.mxu1 %v7582_v0  ;;  %6724 = vmatprep.subr.bf16.mxu0 %v7583_v17 }
0x1543   :  { %6703 = vmatpush3.bf16.msra.mxu1 %v7584_v24  ;;  %6725 = vmatpush3.bf16.msra.mxu0 %v7585_v8 }
0x1544   :  { %6704 = vmatprep.subr.bf16.mxu1 %v7586_v6  ;;  %6726 = vmatprep.subr.bf16.mxu0 %v7587_v27 }
0x1547   :  { %6705 = vmatpush3.bf16.msra.mxu1 %v7588_v40  ;;  %6727 = vmatpush3.bf16.msra.mxu0 %v7589_v22 }
0x1548   :  { %6706 = vmatprep.subr.bf16.mxu1 %v7590_v2  ;;  %6728 = vmatprep.subr.bf16.mxu0 %v7591_v9 }
0x154b   :  { %6707 = vmatpush3.bf16.msra.mxu1 %v7592_v13  ;;  %6729 = vmatpush3.bf16.msra.mxu0 %v7593_v16 }
0x154c   :  { %6708 = vmatprep.subr.bf16.mxu1 %v7594_v41  ;;  %6730 = vmatprep.subr.bf16.mxu0 %v7595_v51 }
0x154f   :  { %6709 = vmatpush3.bf16.msra.mxu1 %v7596_v50  ;;  %6731 = vmatpush3.bf16.msra.mxu0 %v7597_v15 }
0x1550   :  { %6710 = vmatprep.subr.bf16.mxu1 %v7598_v63  ;;  %6732 = vmatprep.subr.bf16.mxu0 %v7599_v19 }
0x1553   :  { %6711 = vmatpush3.bf16.msra.mxu1 %v7600_v37  ;;  %6733 = vmatpush3.bf16.msra.mxu0 %v7601_v21 }
0x1554   :  { %6915 = vmatprep.subr.bf16.mxu1 %v7628_v11  ;;  %6927 = vmatprep.subr.bf16.mxu0 %v7628_v11 }
0x15f9   :  { %v5264_v12 = vpop.f32.mrb[96].mxu1  ;;  %v5307_v1 = vpop.f32.mrb[88].mxu0 }
0x15fa   :  { %v5429_v3 = vmul.f32 %v5412_v47, %v5264_v12  ;;  %v5431_v32 = vmul.f32 %v5420_v10, %v5307_v1  ;;  %v5266_v49 = vpop.f32.mrb[97].mxu1  ;;  %v5309_v61 = vpop.f32.mrb[89].mxu0 }
0x15fb   :  { %v5430_v59 = vmul.f32 %v5416_v53, %v5266_v49  ;;  %v5432_v43 = vmul.f32 %v5424_v7, %v5309_v61  ;;  %v5268_v34 = vpop.f32.mrb[98].mxu1  ;;  %v5311_v14 = vpop.f32.mrb[90].mxu0 }
0x15fc   :  { %v5437_v60 = vmul.f32 1.442695, %v5429_v3  ;;  %v5441_v4 = vmul.f32 1.442695, %v5431_v32  ;;  %v5270_v28 = vpop.f32.mrb[99].mxu1  ;;  %v5313_v38 = vpop.f32.mrb[91].mxu0  ;;  %v5433_v36 = vmul.f32 %v5412_v47, %v5268_v34  ;;  %v5435_v30 = vmul.f32 %v5420_v10, %v5311_v14 }
0x15fd   :  { %v5439_v26 = vmul.f32 1.442695, %v5430_v59  ;;  %v5443_v31 = vmul.f32 1.442695, %v5432_v43  ;;  %v5434_v0 = vmul.f32 %v5416_v53, %v5270_v28  ;;  %v5436_v8 = vmul.f32 %v5424_v7, %v5313_v38 }
0x15fe   :  { %7438 = vpow2.f32 %v5437_v60  ;;  %v5445_v17 = vmul.f32 1.442695, %v5433_v36  ;;  %v5449_v24 = vmul.f32 1.442695, %v5435_v30 }
0x15ff   :  { %7440 = vpow2.f32 %v5441_v4  ;;  %v5447_v6 = vmul.f32 1.442695, %v5434_v0  ;;  %v5451_v22 = vmul.f32 1.442695, %v5436_v8 }
0x1600   :  { %7442 = vpow2.f32 %v5439_v26 }
0x1601   :  { %7444 = vpow2.f32 %v5443_v31 }
0x1602   :  { %7446 = vpow2.f32 %v5445_v17 }
0x1603   :  { %7448 = vpow2.f32 %v5449_v24 }
0x1604   :  { %7450 = vpow2.f32 %v5447_v6 }
0x1605   :  { %7452 = vpow2.f32 %v5451_v22 }
0x1608   :  { %v7439_v27 = vpop.eup %7438 }
0x1609   :  { %v7441_v40 = vpop.eup %7440  ;;  %v5356_v2 = vpop.f32.mrb[100].mxu1  ;;  %v5469_v9 = vrot.slane %v7439_v27, 7 }
0x160a   :  { %v5399_v13 = vpop.f32.mrb[92].mxu0  ;;  %v7443_v16 = vpop.eup %7442  ;;  %v5453_v41 = vmul.f32 %v5356_v2, %v9675_v48  ;;  %v5471_v50 = vrot.slane %v7441_v40, 7 }
0x160b   :  { %v5455_v51 = vmul.f32 %v5399_v13, %v9677_v46  ;;  %v5358_v15 = vpop.f32.mrb[101].mxu1  ;;  %v5401_v63 = vpop.f32.mrb[93].mxu0  ;;  %v5485_v37 = vsel %vm1417_vm11, 1.0, %v5469_v9  ;;  %v5470_v57 = vrot.slane %v7443_v16, 7 }
0x160c   :  { %v7445_v19 = vpop.eup %7444  ;;  %v5454_v21 = vmul.f32 %v5358_v15, %v9679_v56  ;;  %v5456_v47 = vmul.f32 %v5401_v63, %v9681_v42  ;;  %v5360_v10 = vpop.f32.mrb[102].mxu1  ;;  %v5501_v7 = vrot.slane %v5453_v41, 7  ;;  %v5541_v12 = vmul.f32 %v7439_v27, %v5485_v37 }
0x160d   :  { %v5403_v53 = vpop.f32.mrb[94].mxu0  ;;  %v5487_v1 = vsel %vm1417_vm11, 1.0, %v5471_v50  ;;  %v5503_v48 = vrot.slane %v5455_v51, 7  ;;  %v9843_v3 = vpop.f32.mrb[103].mxu1  ;;  %v5486_v49 = vsel %vm1417_vm11, 1.0, %v5470_v57  ;;  %v5472_v59 = vrot.slane %v7445_v19, 7 }
0x160e   :  { %v9845_v46 = vpop.f32.mrb[95].mxu0  ;;  %v5543_v32 = vmul.f32 %v7441_v40, %v5487_v1  ;;  %v5502_v61 = vrot.slane %v5454_v21, 7  ;;  %v5517_v56 = vsel %vm1417_vm11, 0.0, %v5501_v7  ;;  %v5557_v43 = vrot.slane %v5541_v12, 6  ;;  %v7447_v30 = vpop.eup %7446 }
0x160f   :  { %v5519_v42 = vsel %vm1417_vm11, 0.0, %v5503_v48  ;;  %v5542_v34 = vmul.f32 %v7443_v16, %v5486_v49  ;;  %v5525_v14 = vmul.f32 %v7439_v27, %v5517_v56  ;;  %v5488_v36 = vsel %vm1417_vm11, 1.0, %v5472_v59 }
0x1610   :  { %v5527_v60 = vmul.f32 %v7441_v40, %v5519_v42  ;;  %v5559_v4 = vrot.slane %v5543_v32, 6  ;;  %v5518_v28 = vsel %vm1417_vm11, 0.0, %v5502_v61  ;;  %v5573_v38 = vsel %vm1506_vm12, 1.0, %v5557_v43  ;;  %v7449_v40 = vpop.eup %7448 }
0x1611   :  { %v5526_v26 = vmul.f32 %v7443_v16, %v5518_v28  ;;  %v5558_v31 = vrot.slane %v5542_v34, 6  ;;  %v5533_v0 = vadd.f32 %v5525_v14, %v5453_v41  ;;  %v5629_v8 = vmul.f32 %v5573_v38, %v5541_v12  ;;  %v9855_v16 = vpop.eup %7450 }
0x1612   :  { %v5535_v17 = vadd.f32 %v5527_v60, %v5455_v51  ;;  %v5575_v24 = vsel %vm1506_vm12, 1.0, %v5559_v4  ;;  %v5504_v27 = vrot.slane %v5456_v47, 7  ;;  %v5544_v15 = vmul.f32 %v7445_v19, %v5488_v36  ;;  %v9866_v36 = vpop.eup %7452 }
0x1613   :  { %v5631_v6 = vmul.f32 %v5575_v24, %v5543_v32  ;;  %v5534_v2 = vadd.f32 %v5526_v26, %v5454_v21  ;;  %v5589_v9 = vrot.slane %v5533_v0, 6  ;;  %v5574_v50 = vsel %vm1506_vm12, 1.0, %v5558_v31 }
0x1614   :  { %v5591_v13 = vrot.slane %v5535_v17, 6  ;;  %v5520_v37 = vsel %vm1417_vm11, 0.0, %v5504_v27  ;;  %v5457_v22 = vmul.f32 %v5360_v10, %v9683_v23  ;;  %v5473_v41 = vrot.slane %v7447_v30, 7 }
0x1615   :  { %v5590_v63 = vrot.slane %v5534_v2, 6  ;;  %v5605_v51 = vsel %vm1506_vm12, 0.0, %v5589_v9  ;;  %v5528_v21 = vmul.f32 %v7445_v19, %v5520_v37  ;;  %v5560_v7 = vrot.slane %v5544_v15, 6 }
0x1616   :  { %v5607_v57 = vsel %vm1506_vm12, 0.0, %v5591_v13  ;;  %v5613_v1 = vmul.f32 %v5605_v51, %v5541_v12  ;;  %v5489_v61 = vsel %vm1417_vm11, 1.0, %v5473_v41  ;;  %v5630_v56 = vmul.f32 %v5574_v50, %v5542_v34 }
0x1617   :  { %v5615_v48 = vmul.f32 %v5607_v57, %v5543_v32  ;;  %v5606_v49 = vsel %vm1506_vm12, 0.0, %v5590_v63  ;;  %v5536_v43 = vadd.f32 %v5528_v21, %v5456_v47  ;;  %v5505_v42 = vrot.slane %v5457_v22, 7 }
0x1618   :  { %v5614_v59 = vmul.f32 %v5606_v49, %v5542_v34  ;;  %v5621_v14 = vadd.f32 %v5613_v1, %v5533_v0  ;;  %v5576_v23 = vsel %vm1506_vm12, 1.0, %v5560_v7  ;;  %v5545_v10 = vmul.f32 %v7447_v30, %v5489_v61 }
0x1619   :  { %v5623_v60 = vadd.f32 %v5615_v48, %v5535_v17  ;;  %v5592_v28 = vrot.slane %v5536_v43, 6  ;;  %v5521_v19 = vsel %vm1417_vm11, 0.0, %v5505_v42  ;;  %v5459_v12 = vmul.f32 %v5403_v53, %v9685_v45 }
0x161a   :  { %v5622_v4 = vadd.f32 %v5614_v59, %v5534_v2  ;;  %v5645_v32 = vrot.slane %v5621_v14, 4  ;;  %v5529_v26 = vmul.f32 %v7447_v30, %v5521_v19  ;;  %v5561_v31 = vrot.slane %v5545_v10, 6 }
0x161b   :  { %v5647_v38 = vrot.slane %v5623_v60, 4  ;;  %v5608_v47 = vsel %vm1506_vm12, 0.0, %v5592_v28  ;;  %v5475_v0 = vrot.slane %v7449_v40, 7  ;;  %v5507_v17 = vrot.slane %v5459_v12, 7 }
0x161c   :  { %v5646_v34 = vrot.slane %v5622_v4, 4  ;;  %v5661_v24 = vsel %vm1595_vm13, 0.0, %v5645_v32  ;;  %v5616_v27 = vmul.f32 %v5608_v47, %v5544_v15  ;;  %v5537_v9 = vadd.f32 %v5529_v26, %v5457_v22 }
0x161d   :  { %v5663_v2 = vsel %vm1595_vm13, 0.0, %v5647_v38  ;;  %v5669_v13 = vmul.f32 %v5661_v24, %v5629_v8  ;;  %v5632_v53 = vmul.f32 %v5576_v23, %v5544_v15  ;;  %v5577_v37 = vsel %vm1506_vm12, 1.0, %v5561_v31 }
0x161e   :  { %v5671_v50 = vmul.f32 %v5663_v2, %v5631_v6  ;;  %v5662_v45 = vsel %vm1595_vm13, 0.0, %v5646_v34  ;;  %v5624_v63 = vadd.f32 %v5616_v27, %v5536_v43  ;;  %v5593_v41 = vrot.slane %v5537_v9, 6 }
0x161f   :  { %v5670_v30 = vmul.f32 %v5662_v45, %v5630_v56  ;;  %v5677_v51 = vadd.f32 %v5669_v13, %v5621_v14  ;;  %v5491_v21 = vsel %vm1417_vm11, 1.0, %v5475_v0  ;;  %v5523_v7 = vsel %vm1417_vm11, 0.0, %v5507_v17 }
0x1620   :  { %v5679_v57 = vadd.f32 %v5671_v50, %v5623_v60  ;;  %v5648_v48 = vrot.slane %v5624_v63, 4  ;;  %v5609_v22 = vsel %vm1506_vm12, 0.0, %v5593_v41  ;;  %v5531_v8 = vmul.f32 %v7449_v40, %v5523_v7 }
0x1621   :  { %v5678_v1 = vadd.f32 %v5670_v30, %v5622_v4  ;;  %v9877_v6 = vmul.f32 %v5677_v51, %v9691_v58  ;;  %v5617_v49 = vmul.f32 %v5609_v22, %v5545_v10  ;;  %v5547_v61 = vmul.f32 %v7449_v40, %v5491_v21 }
0x1622   :  { %v9880_v15 = vmul.f32 %v5679_v57, %v9693_v18  ;;  %v5664_v59 = vsel %vm1595_vm13, 0.0, %v5648_v48  ;;  %v5539_v56 = vadd.f32 %v5531_v8, %v5459_v12  ;;  %v5458_v43 = vmul.f32 %v9843_v3, %v9687_v20 }
0x1623   :  { %v5474_v42 = vrot.slane %v9855_v16, 7  ;;  %v5672_v14 = vmul.f32 %v5664_v59, %v5632_v53  ;;  %v5625_v60 = vadd.f32 %v5617_v49, %v5537_v9  ;;  %v5563_v23 = vrot.slane %v5547_v61, 6 }
0x1624   :  { %v5460_v58 = vmul.f32 %v9845_v46, %v9689_v55  ;;  %v5595_v4 = vrot.slane %v5539_v56, 6  ;;  %v5506_v28 = vrot.slane %v5458_v43, 7  ;;  %v5476_v32 = vrot.slane %v9866_v36, 7 }
0x1625   :  { %v5680_v18 = vadd.f32 %v5672_v14, %v5624_v63  ;;  %v5649_v19 = vrot.slane %v5625_v60, 4  ;;  %v5490_v40 = vsel %vm1417_vm11, 1.0, %v5474_v42  ;;  %v5633_v12 = vmul.f32 %v5577_v37, %v5545_v10 }
0x1626   :  { %v5611_v38 = vsel %vm1506_vm12, 0.0, %v5595_v4  ;;  %v5522_v20 = vsel %vm1417_vm11, 0.0, %v5506_v28  ;;  %v5579_v26 = vsel %vm1506_vm12, 1.0, %v5563_v23  ;;  %v5546_v34 = vmul.f32 %v9855_v16, %v5490_v40 }
0x1627   :  { %v5665_v3 = vsel %vm1595_vm13, 0.0, %v5649_v19  ;;  %v5619_v31 = vmul.f32 %v5611_v38, %v5547_v61  ;;  %v5530_v55 = vmul.f32 %v9855_v16, %v5522_v20  ;;  %v5508_v47 = vrot.slane %v5460_v58, 7  ;;  %v7272_v19 = vld [vmem:[%s9980_s10 + $0x60] sm:$0xff]  }
0x1628   :  { %v5673_v46 = vmul.f32 %v5665_v3, %v5633_v12  ;;  %v5686_v0 = vmul.f32 %v5678_v1, %v9695_v29  ;;  %v5492_v10 = vsel %vm1417_vm11, 1.0, %v5476_v32  ;;  %v5688_v2 = vmul.f32 %v5680_v18, %v9697_v54  ;;  %v7275_v32 = vld [vmem:[%s9980_s10 + $0x78] sm:$0xff]   ;;  %v6477_v12 = vld [vmem:[%s9979_s9 + $0x3] ss:$0 sm:$0xff] }
0x1629   :  { %v5627_v17 = vadd.f32 %v5619_v31, %v5539_v56  ;;  %v5538_v24 = vadd.f32 %v5530_v55, %v5458_v43  ;;  %v5524_v9 = vsel %vm1417_vm11, 0.0, %v5508_v47  ;;  %v5635_v30 = vmul.f32 %v5579_v26, %v5547_v61 }
0x162a   :  { %v5681_v27 = vadd.f32 %v5673_v46, %v5625_v60  ;;  %v5532_v45 = vmul.f32 %v9866_v36, %v5524_v9  ;;  %v5562_v16 = vrot.slane %v5546_v34, 6  ;;  %v5548_v63 = vmul.f32 %v9866_v36, %v5492_v10 }
0x162b   :  { %v5651_v13 = vrot.slane %v5627_v17, 4  ;;  %v5594_v50 = vrot.slane %v5538_v24, 6  ;;  %v5703_v3 = vmul.f32 %v6477_v12, %v9503_v5  ;;  %v5704_v47 = vmul.f32 %v6477_v12, %v9505_v33 }
0x162c   :  { %v5689_v53 = vmul.f32 %v5681_v27, %v9699_v25  ;;  %v5540_v41 = vadd.f32 %v5532_v45, %v5460_v58  ;;  %v5578_v1 = vsel %vm1506_vm12, 1.0, %v5562_v16  ;;  %v5564_v22 = vrot.slane %v5548_v63, 6  ;;  %v5804_v45 = vpop.permute.xlu0 %5803 }
0x162d   :  { %v5667_v29 = vsel %vm1595_vm13, 0.0, %v5651_v13  ;;  %v5610_v37 = vsel %vm1506_vm12, 0.0, %v5594_v50  ;;  %v5634_v61 = vmul.f32 %v5578_v1, %v5546_v34  ;;  %v7276_v1 = vld [vmem:[%s9984_s14] sm:$0xff]  }
0x162e   :  { %v5675_v51 = vmul.f32 %v5667_v29, %v5635_v30  ;;  %v5618_v54 = vmul.f32 %v5610_v37, %v5546_v34  ;;  %v5693_v57 = vpack.c.bf16 %v5689_v53, %v9877_v6  ;;  %v5596_v21 = vrot.slane %v5540_v41, 6  ;;  %v5806_v53 = vpop.permute.xlu1 %5805 }
0x162f   :  { %v5580_v56 = vsel %vm1506_vm12, 1.0, %v5564_v22 }
0x1630   :  { %v5683_v7 = vadd.f32 %v5675_v51, %v5627_v17  ;;  %v5626_v48 = vadd.f32 %v5618_v54, %v5538_v24  ;;  %v5612_v25 = vsel %vm1506_vm12, 0.0, %v5596_v21  ;;  %v5636_v23 = vmul.f32 %v5580_v56, %v5548_v63 }
0x1631   :  { %v5620_v49 = vmul.f32 %v5612_v25, %v5548_v63 }
0x1632   :  { %v5691_v8 = vmul.f32 %v5683_v7, %v9701_v35  ;;  %v5650_v36 = vrot.slane %v5626_v48, 4 }
0x1633   :  { %v5628_v43 = vadd.f32 %v5620_v49, %v5540_v41 }
0x1634   :  { %v5666_v59 = vsel %vm1595_vm13, 0.0, %v5650_v36  ;;  %v5695_v6 = vpack.c.bf16 %v5691_v8, %v9880_v15 }
0x1635   :  { %v5674_v42 = vmul.f32 %v5666_v59, %v5634_v61  ;;  %v5652_v14 = vrot.slane %v5628_v43, 4 }
0x1637   :  { %v5682_v60 = vadd.f32 %v5674_v42, %v5626_v48  ;;  %v5668_v58 = vsel %vm1595_vm13, 0.0, %v5652_v14  ;;  %v6486_v14 = vld [vmem:[%s9985_s15] ss:$0 sm:$0xff] }
0x1638   :  { %v5676_v4 = vmul.f32 %v5668_v58, %v5636_v23 }
0x1639   :  { %v5690_v28 = vmul.f32 %v5682_v60, %v9703_v39  ;;  %v7273_v39 = vld [vmem:[%s9980_s10 + $0x68] sm:$0xff]  }
0x163a   :  { %v5684_v35 = vadd.f32 %v5676_v4, %v5628_v43 }
0x163b   :  { %v5694_v18 = vpack.c.bf16 %v5690_v28, %v5686_v0 }
0x163c   :  { %v5692_v40 = vmul.f32 %v5684_v35, %v9705_v62  ;;  %v7274_v62 = vld [vmem:[%s9980_s10 + $0x70] sm:$0xff]  }
0x163d   :  { %5737 = vmatprep.mubr.bf16.mxu1 %v5694_v18 }
0x163e   :  { %5738 = vmatmul.mubr.bf16.vlgmr.msra.gmra.mrb[104].mxu1 %v5693_v57  ;;  %v5696_v15 = vpack.c.bf16 %v5692_v40, %v5688_v2 }
0x163f   :  { %6916 = vmatpush3.bf16.msra.mxu1 %v7272_v19  ;;  %6923 = vmatprep.mubr.msk.bf16.mxu1 %vm7630_vm8, %v7628_v11 }
0x1640   :  { %6917 = vmatprep.subr.bf16.mxu1 %v7628_v11  ;;  %5778 = vmatprep.mubr.bf16.mxu0 %v5696_v15 }
0x1641   :  { %5779 = vmatmul.mubr.bf16.vlgmr.msra.gmra.mrb[96].mxu0 %v5695_v6 }
0x1642   :  { %6931 = vmatprep.mubr.msk.bf16.mxu0 %vm7630_vm8, %v7628_v11  ;;  %6928 = vmatpush3.bf16.msra.mxu0 %v7276_v1 }
0x1643   :  { %6918 = vmatpush3.bf16.msra.mxu1 %v7273_v39  ;;  %6929 = vmatprep.subr.bf16.mxu0 %v7628_v11 }
0x1644   :  { %6919 = vmatprep.subr.bf16.mxu1 %v7628_v11 }
0x1647   :  { %6920 = vmatpush3.bf16.msra.mxu1 %v7274_v62 }
0x1648   :  { %6921 = vmatprep.subr.bf16.mxu1 %v7628_v11  ;;  %v6485_v11 = vld [vmem:[%s9983_s13] ss:$0 sm:$0xff]  ;;  %s7602_s13 = scalar_lea.vmem %s5983_s20, 256 }
0x1649   :  { %p7603_p0 = scmp.ne.s32.totalorder %s5983_s20, %s7602_s13  ;;  %p7608_p2 = scmp.lt.s32.totalorder %s7602_s13, %s7602_s13 }
0x164b   :  { %6922 = vmatpush3.bf16.msra.mxu1 %v7275_v32  ;;  %p7609_p3 = por %p7608_p2, %p7607_p1 }
0x164d   :  { %p7610_p4 = pnand %p7609_p3, %p7603_p0 }
0x1711   :  { %v6712_v38 = vpop.f32.mrb[104].mxu1 }
0x1712   :  { %v6713_v20 = vpop.f32.mrb[105].mxu1 }
0x1713   :  { %v6714_v26 = vadd.f32 %v6713_v20, %v6712_v38  ;;  %v6715_v31 = vpop.f32.mrb[106].mxu1 }
0x1714   :  { %v6716_v55 = vpop.f32.mrb[107].mxu1  ;;  %v6734_v46 = vpop.f32.mrb[96].mxu0 }
0x1715   :  { %v5740_v34 = vadd.f32 %v6714_v26, %v5703_v3  ;;  %v6717_v0 = vadd.f32 %v6716_v55, %v6715_v31  ;;  %v6735_v17 = vpop.f32.mrb[97].mxu0 }
0x1716   :  { %v6736_v24 = vadd.f32 %v6735_v17, %v6734_v46  ;;  %v6737_v10 = vpop.f32.mrb[98].mxu0 }
0x1717   :  { %v5743_v2 = vadd.f32 %v6717_v0, %v5704_v47  ;;  %v6738_v27 = vpop.f32.mrb[99].mxu0 }
0x1718   :  { %v5781_v9 = vadd.f32 %v6736_v24, %v5740_v34  ;;  %v6739_v13 = vadd.f32 %v6738_v27, %v6737_v10 }
0x171a   :  { %v5784_v50 = vadd.f32 %v6739_v13, %v5743_v2  ;;  %v5809_v30 = vmul.f32 %v5804_v45, %v5781_v9 }
0x171c   :  { %v5810_v5 = vmul.f32 %v5806_v53, %v5784_v50 }
0x171e   :  { %v5811_v16 = vpack.c.bf16 %v5810_v5, %v5809_v30 }
0x1720   :  { %6924 = vmatmul.mubr.msk.bf16.vlgmr.msra.gmra.mrb[108].mxu1 %vm364_vm9, %v5811_v16 }
0x17f3   :  { %v5873_v63 = vpop.f32.mrb[108].mxu1 }
0x17f4   :  { %v5880_v29 = vadd.f32 %v5873_v63, %v9410_v44  ;;  %v6925_v33 = vpop.f32.mrb[109].mxu1  ;;  %v7277_v44 = vld [vmem:[%s9984_s14 + $0x8] sm:$0xff]  }
0x17f5   :  { %v5876_v37 = vpop.f32.mrb[110].mxu1  ;;  %6930 = vmatpush3.bf16.msra.mxu0 %v7277_v44 }
0x17f6   :  { %v5881_v41 = vadd.f32 %v5876_v37, %v9413_v52  ;;  %v6926_v51 = vpop.f32.mrb[111].mxu1  ;;  %v5883_v54 = vmul.f32 %v5880_v29, %v5880_v29 }
0x17f8   :  { %v5885_v57 = vsel %vm510_vm7, %v5883_v54, 0.0  ;;  %v5884_v21 = vmul.f32 %v5881_v41, %v5881_v41 }
0x17f9   :  { %5886 = vadd.xlane.f32.xlu1 %v5885_v57 }
0x17fa   :  { %v5888_v7 = vsel %vm510_vm7, %v5884_v21, 0.0 }
0x17fb   :  { %5889 = vadd.xlane.f32.xlu0 %v5888_v7 }
0x1886   :  { %v5887_v52 = vpop.xlane.xlu1 %5886 }
0x1887   :  { %v5891_v48 = vmul.f32 0.03125, %v5887_v52 }
0x1888   :  { %v5890_v22 = vpop.xlane.xlu0 %5889 }
0x1889   :  { %v5893_v25 = vadd.f32 1e-05, %v5891_v48  ;;  %v5892_v8 = vmul.f32 0.03125, %v5890_v22 }
0x188b   :  { %7454 = vrsqrt.f32 %v5893_v25  ;;  %v5894_v36 = vadd.f32 1e-05, %v5892_v8 }
0x188d   :  { %7456 = vrsqrt.f32 %v5894_v36 }
0x1895   :  { %v7455_v49 = vpop.eup %7454 }
0x1896   :  { %v5897_v61 = vmul.f32 %v7455_v49, %v5880_v29 }
0x1897   :  { %v7457_v59 = vpop.eup %7456 }
0x1898   :  { %v5898_v56 = vmul.f32 %v7457_v59, %v5881_v41  ;;  %v5905_v43 = vmul.f32 %v6485_v11, %v5897_v61 }
0x189a   :  { %v5906_v6 = vmul.f32 %v6485_v11, %v5898_v56 }
0x189c   :  { %v5907_v42 = vpack.c.bf16 %v5906_v6, %v5905_v43 }
0x189e   :  { %6932 = vmatmul.mubr.msk.bf16.vlgmr.msra.gmra.mrb[100].mxu0 %vm510_vm7, %v5907_v42 }
0x1971   :  { %v5968_v60 = vpop.f32.mrb[100].mxu0 }
0x1972   :  { %v5969_v23 = vadd.f32 %v6486_v14, %v5968_v60  ;;  %v6933_v58 = vpop.f32.mrb[101].mxu0 }
0x1973   :  { %v5971_v4 = vpop.f32.mrb[102].mxu0 }
0x1974   :  { %5975 = vst [vmem:[#allocation3] sm:$0xff] %v5969_v23  ;;  %v5972_v28 = vadd.f32 %v6486_v14, %v5971_v4  ;;  %v6934_v35 = vpop.f32.mrb[103].mxu0 }
0x1976   :  { %5976 = vst [vmem:[#allocation3 + $0x8] sm:$0xff] %v5972_v28 }
0x1977   :  { %7613 = shalt.err (!%p7610_p4)
}
0x1978   :  { %s7614_s21 = scalar_lea.hbm %s9986_s16, 256 }
0x1979   :  { %p7615_p5 = scmp.ne.s32.totalorder %s9986_s16, %s7614_s21  ;;  %p7618_p6 = scmp.lt.u32.totalorder %s7614_s21, %s9986_s16 }
0x197b   :  { %p7620_p7 = pnand %p7618_p6, %p7615_p5 }
0x197d   :  { %7623 = shalt.err (!%p7620_p7)
}
0x197e   :  { %s7633_s19 = smov 128   ;;  %s7634_s23 = smov 8  }
0x197f   :  { %5988 = dma.vmem_to_hbm [thread:$0]  %s5983_s20, 256, %s9986_s16, [#allocation4], %s7633_s19, %s7633_s19, %s7634_s23  }
0x1980   :  { %7624 = dma.done.wait [#allocation4], 256  }
0x1981   :  { %7625 = vsyncadd [#allocation4], 4294967040 }
0x1982   :  { %5992 = vsyncpa [#allocation4], 1 }

</bundles_post_ra>
